<compile_context>
chip_gen: v7x
topology: tpu7x:2x2x1
jax: 0.10.0
libtpu: 0.0.40
codegen_flags: <defaults>
</compile_context>

<pallas_src>
from itertools import product

import numpy as np
import jax
import jax.numpy as jnp
from jax.experimental import pallas as pl
from jax.experimental.pallas import tpu as pltpu


def _round_up(x, m):
    return (x + m - 1) // m * m


# Static table: for pool phase pm (2x2x2) and conv tap k (3x3x3) the padded-input
# position along one spatial dim is 2*out + (pm + k) = 2*(out + q) + r.
# idx[pm, q, r] = flat tap index (kd*9 + kh*3 + kw), or 27 ("no tap") -> zero weight.
def _build_tap_index():
    idx = np.full((8, 8, 8), 27, dtype=np.int32)
    for pmd, pmh, pmw in product(range(2), repeat=3):
        pm_i = pmd * 4 + pmh * 2 + pmw
        for kd, kh, kw in product(range(3), repeat=3):
            td, th, tw = pmd + kd, pmh + kh, pmw + kw
            q_i = (td // 2) * 4 + (th // 2) * 2 + (tw // 2)
            r_i = (td % 2) * 4 + (th % 2) * 2 + (tw % 2)
            idx[pm_i, q_i, r_i] = kd * 9 + kh * 3 + kw
    return idx


_TAP_IDX = _build_tap_index()


def _pool_pad_mask(batch, s, do, n_out):
    """Additive mask (8, n_out): -1e30 where a pooling-window element of a given phase
    is a MaxPool padding element (pool padding = 1), else 0."""
    n = np.arange(n_out)
    valid = n < batch * s ** 3
    rem = n % (s ** 3)
    d = rem // (s * s)
    h = (rem // s) % s
    w = rem % s
    mask = np.zeros((8, n_out), dtype=np.float32)
    for pmd, pmh, pmw in product(range(2), repeat=3):
        pm_i = pmd * 4 + pmh * 2 + pmw
        bad = np.zeros(n_out, dtype=bool)
        for pm1, c in ((pmd, d), (pmh, h), (pmw, w)):
            bad |= (c == 0) if pm1 == 0 else (c == do - 1)
        mask[pm_i] = np.where(bad & valid, np.float32(-1e30), np.float32(0.0))
    return mask


# --------------------------------------------------------------------------------------
# Fused Conv3d(k3,s1,p1) + bias + ReLU + MaxPool3d(2,2[,pad 1]) Pallas kernel.
# One MXU matmul per n_out tile; all post-processing on the f32 result in VMEM.
# --------------------------------------------------------------------------------------
def _make_conv_pool_kernel(cout_k, with_mask):
    def kernel(*refs):
        if with_mask:
            x_ref, w_ref, b_ref, m_ref, o_ref = refs
        else:
            x_ref, w_ref, b_ref, o_ref = refs
            m_ref = None
        # (8*cout_k, k_pad) @ (k_pad, tile_n) -> f32 (8*cout_k, tile_n)
        big = jnp.dot(w_ref[...], x_ref[...], preferred_element_type=jnp.float32)
        if m_ref is not None:
            big = big + m_ref[...]                       # -inf-like pool padding (layer 3)
        res = big[0:cout_k, :]                           # 2x2x2 pool max over phases
        for pm in range(1, 8):
            res = jnp.maximum(res, big[pm * cout_k:(pm + 1) * cout_k, :])
        res = res + b_ref[:, 0:1]                        # bias (phase-invariant, post-max OK)
        o_ref[...] = jnp.maximum(res, 0.0)               # ReLU (monotone, post-pool OK)

    return kernel


def conv3d_relu_maxpool(a, w, b, *, pool_pad=0):
    """a: (Cin, B, D, D, D); w: (Cout, Cin, 3, 3, 3); b: (Cout,).
    Returns (Cout, B, Do, Do, Do) with Do = (D + 2*pool_pad) // 2."""
    cin, batch, dim, dim_h, dim_w = a.shape
    assert dim == dim_h == dim_w and dim % 2 == 0
    cout = w.shape[0]
    pp = int(pool_pad)
    do = (dim + 2 * pp) // 2
    s = do + 1                    # phase-slab extent per spatial dim
    pad = 1 + pp                  # conv zero-pad (1) + extra room for pool padding

    # Pad Cout to a multiple of 8 so every sublane slice in the kernel is tile-aligned.
    cout_k = _round_up(cout, 8)
    if cout_k != cout:
        w = jnp.pad(w, ((0, cout_k - cout), (0, 0), (0, 0), (0, 0), (0, 0)))
        b = jnp.pad(b, (0, cout_k - cout))

    n_valid = batch * s ** 3
    tile_n = min(2048, _round_up(n_valid, 128))          # lane-dense output tile
    n_out = _round_up(n_valid, tile_n)
    n_tiles = n_out // tile_n
    k_raw = 8 * cin * 8
    k_pad = _round_up(k_raw, 128)                         # fill MXU K depth (layer 1: 64->128)
    qoffs = tuple(qd * s * s + qh * s + qw
                  for qd in range(2) for qh in range(2) for qw in range(2))
    max_qoff = qoffs[-1]

    # --- XLA glue: zero-pad + 8-way phase split + hoisted shift gather -> bf16 slab ---
    ap = jnp.pad(a, ((0, 0), (0, 0), (pad, pad), (pad, pad), (pad, pad)))
    xph = ap.reshape(cin, batch, s, 2, s, 2, s, 2)
    xph = xph.transpose(0, 3, 5, 7, 1, 2, 4, 6).reshape(cin * 8, n_valid)
    xph = jnp.pad(xph, ((0, 0), (0, n_out + max_qoff - n_valid)))
    slab = jnp.concatenate([xph[:, q:q + n_out] for q in qoffs], axis=0)   # (k_raw, n_out)
    if k_pad != k_raw:
        slab = jnp.pad(slab, ((0, k_pad - k_raw), (0, 0)))
    slab = slab.astype(jnp.bfloat16)

    # --- weights rearranged to (8*Cout_k, k_pad): rows (phase, co), cols (q, ci, r) ---
    wr = w.reshape(cout_k, cin, 27).astype(jnp.float32)
    wr = jnp.concatenate([wr, jnp.zeros((cout_k, cin, 1), jnp.float32)], axis=-1)
    wg = wr[:, :, _TAP_IDX]                                    # (Cout_k, Cin, 8, 8, 8)
    wmat = wg.transpose(2, 0, 3, 1, 4).reshape(8 * cout_k, k_raw)
    if k_pad != k_raw:
        wmat = jnp.pad(wmat, ((0, 0), (0, k_pad - k_raw)))
    wmat = wmat.astype(jnp.bfloat16)

    bias = jnp.broadcast_to(b.astype(jnp.float32).reshape(cout_k, 1), (cout_k, 128))

    inputs = [slab, wmat, bias]
    in_specs = [
        pl.BlockSpec((k_pad, tile_n), lambda i: (0, i)),
        pl.BlockSpec((8 * cout_k, k_pad), lambda i: (0, 0)),
        pl.BlockSpec((cout_k, 128), lambda i: (0, 0)),
    ]
    if pp:
        mask = np.repeat(_pool_pad_mask(batch, s, do, n_out), cout_k, axis=0)
        inputs.append(jnp.asarray(mask))                       # (8*cout_k, n_out) f32
        in_specs.append(pl.BlockSpec((8 * cout_k, tile_n), lambda i: (0, i)))

    kernel = _make_conv_pool_kernel(cout_k, with_mask=bool(pp))
    out = pl.pallas_call(
        kernel,
        out_shape=jax.ShapeDtypeStruct((cout_k, n_out), jnp.float32),
        grid=(n_tiles,),
        in_specs=in_specs,
        out_specs=pl.BlockSpec((cout_k, tile_n), lambda i: (0, i)),
        compiler_params=pltpu.CompilerParams(
            dimension_semantics=("parallel",),
            vmem_limit_bytes=32 * 1024 * 1024),
        cost_estimate=pl.CostEstimate(
            flops=2 * (8 * cout_k) * k_pad * n_out,
            transcendentals=0,
            bytes_accessed=2 * (k_pad * n_out + 8 * cout_k * k_pad)
                           + 4 * (cout_k * 128 + cout_k * n_out)),
    )(*inputs)

    out = out[:cout, :n_valid].reshape(cout, batch, s, s, s)[:, :, :do, :do, :do]
    return out


# --------------------------------------------------------------------------------------
# fc head: fc2(fc1(x)) with no intermediate nonlinearity -> one small affine kernel
# (weights are pre-collapsed in the wrapper: W = fw1 @ fw2, b = fb1 @ fw2 + fb2).
# --------------------------------------------------------------------------------------
def _fc_kernel(x_ref, w_ref, b_ref, o_ref):
    o_ref[...] = (jnp.dot(x_ref[...], w_ref[...], preferred_element_type=jnp.float32)
                  + b_ref[...])


def fc_head(x, w, b):
    batch, feat = x.shape
    out_dim = w.shape[1]
    feat_p = _round_up(feat, 128)
    out_p = _round_up(out_dim, 128)            # lane-dense output, sliced after
    xp = jnp.pad(x, ((0, 0), (0, feat_p - feat))).astype(jnp.float32)
    wp = jnp.pad(w, ((0, feat_p - feat), (0, out_p - out_dim))).astype(jnp.float32)
    bp = jnp.pad(b, (0, out_p - out_dim)).reshape(1, out_p).astype(jnp.float32)
    out = pl.pallas_call(
        _fc_kernel,
        out_shape=jax.ShapeDtypeStruct((batch, out_p), jnp.float32),
        grid=(1,),
        in_specs=[pl.BlockSpec((batch, feat_p), lambda i: (0, 0)),
                  pl.BlockSpec((feat_p, out_p), lambda i: (0, 0)),
                  pl.BlockSpec((1, out_p), lambda i: (0, 0))],
        out_specs=pl.BlockSpec((batch, out_p), lambda i: (0, 0)),
        compiler_params=pltpu.CompilerParams(
            dimension_semantics=("arbitrary",)),
        cost_estimate=pl.CostEstimate(
            flops=2 * batch * feat_p * out_p, transcendentals=0,
            bytes_accessed=4 * (batch * feat_p + feat_p * out_p + out_p + batch * out_p)),
    )(xp, wp, bp)
    return out[:, :out_dim]


# --------------------------------------------------------------------------------------
# Full forward pass (matches CNN.forward exactly; Dropout p = 1 - keepprobab = 0)
# --------------------------------------------------------------------------------------
def cnn_forward(x, params):
    # x: (B, Cin, 32, 32, 32)  ->  channel-leading layout (Cin, B, D, H, W)
    a = jnp.transpose(x, (1, 0, 2, 3, 4)).astype(jnp.float32)
    a = conv3d_relu_maxpool(a, params["w1"], params["b1"], pool_pad=0)  # (4,  B, 16,16,16)
    a = conv3d_relu_maxpool(a, params["w2"], params["b2"], pool_pad=0)  # (8,  B, 8, 8, 8)
    a = conv3d_relu_maxpool(a, params["w3"], params["b3"], pool_pad=1)  # (16, B, 5, 5, 5)
    batch = x.shape[0]
    # flatten in (C, D, H, W) order like output.view(B, -1)
    flat = jnp.transpose(a, (1, 0, 2, 3, 4)).reshape(batch, -1)         # (B, 2000)
    # forward() is fc2(fc1(x)) with NO activation in between (layer4's ReLU is unused)
    # and dropout p=0, so fc1∘fc2 collapses to a single (2000, out) affine map.
    w = jnp.dot(params["fw1"], params["fw2"])                           # (2000, out_dim)
    bias = jnp.dot(params["fb1"], params["fw2"]) + params["fb2"]        # (out_dim,)
    return fc_head(flat, w, bias)                                       # (B, output_dim)


# --------------------------------------------------------------------------------------
# Deterministic parameter init (PyTorch-like uniform scales; synthetic weights)
# --------------------------------------------------------------------------------------
def init_params(key, input_dim, output_dim):
    ks = jax.random.split(key, 10)

    def u(k, shape, fan_in):
        bound = 1.0 / jnp.sqrt(jnp.float32(fan_in))
        return jax.random.uniform(k, shape, jnp.float32, -bound, bound)

    p = {}
    p["w1"] = u(ks[0], (4, input_dim, 3, 3, 3), input_dim * 27)
    p["b1"] = u(ks[1], (4,), input_dim * 27)
    p["w2"] = u(ks[2], (8, 4, 3, 3, 3), 4 * 27)
    p["b2"] = u(ks[3], (8,), 4 * 27)
    p["w3"] = u(ks[4], (16, 8, 3, 3, 3), 8 * 27)
    p["b3"] = u(ks[5], (16,), 8 * 27)
    p["fw1"] = u(ks[6], (2000, 512), 2000)       # stored as fc1.weight.T: (in, out)
    p["fb1"] = u(ks[7], (512,), 2000)
    p["fw2"] = u(ks[8], (512, output_dim), 512)  # fc2.weight.T
    p["fb2"] = u(ks[9], (output_dim,), 512)
    return p


if __name__ == "__main__":
    key = jax.random.PRNGKey(0)
    kx, kp = jax.random.split(key)

    B, input_dim, output_dim = 2, 1, 10
    # Spatial size 32 is required so the flattened layer3 output is 16*5*5*5 = 2000.
    x = jax.random.normal(kx, (B, input_dim, 32, 32, 32), dtype=jnp.float32)
    params = init_params(kp, input_dim, output_dim)

    out = jax.jit(cnn_forward)(x, params)
    jax.block_until_ready(out)
    assert out.shape == (B, output_dim), out.shape
    print("KERNEL_OK")
</pallas_src>

<mosaic_0001>
module attributes {stable_mosaic.version = 11 : i64} {
  func.func @kernel(%arg0: i32, %arg1: memref<128x2048xbf16, #tpu.memory_space<vmem>>, %arg2: memref<64x128xbf16, #tpu.memory_space<vmem>>, %arg3: memref<8x128xf32, #tpu.memory_space<vmem>>, %arg4: memref<8x2048xf32, #tpu.memory_space<vmem>>) attributes {dimension_semantics = [#tpu.dimension_semantics<parallel>], iteration_bounds = array<i64: 5>, scalar_prefetch = 0 : i64, scratch_operands = 0 : i64, tpu.core_type = #tpu.core_type<tc>, window_params = [{transform_indices = @transform_0, window_bounds = array<i64: 128, 2048>}, {pipeline_mode = #tpu.pipeline_mode<synchronous>, transform_indices = @transform_1, window_bounds = array<i64: 64, 128>}, {pipeline_mode = #tpu.pipeline_mode<synchronous>, transform_indices = @transform_2, window_bounds = array<i64: 8, 128>}, {transform_indices = @transform_3, window_bounds = array<i64: 8, 2048>}]} {
    %c0 = arith.constant 0 : index
    %c0_0 = arith.constant 0 : index
    %0 = vector.load %arg2[%c0, %c0_0] : memref<64x128xbf16, #tpu.memory_space<vmem>>, vector<64x128xbf16>
    %c0_1 = arith.constant 0 : index
    %c0_2 = arith.constant 0 : index
    %1 = vector.load %arg1[%c0_1, %c0_2] : memref<128x2048xbf16, #tpu.memory_space<vmem>>, vector<128x2048xbf16>
    %cst = arith.constant dense<0.000000e+00> : vector<64x2048xf32>
    %2 = tpu.matmul %0, %1, %cst {dimension_numbers = #tpu.dot_dimension_numbers<[1], [0], [0], [1], [0, 0, 1, 1], [], []>} : vector<64x128xbf16>, vector<128x2048xbf16>, vector<64x2048xf32> -> vector<64x2048xf32>
    %3 = vector.extract_strided_slice %2 {offsets = [0, 0], sizes = [8, 2048], strides = [1, 1]} : vector<64x2048xf32> to vector<8x2048xf32>
    %4 = vector.extract_strided_slice %2 {offsets = [8, 0], sizes = [8, 2048], strides = [1, 1]} : vector<64x2048xf32> to vector<8x2048xf32>
    %5 = arith.maximumf %3, %4 : vector<8x2048xf32>
    %6 = vector.extract_strided_slice %2 {offsets = [16, 0], sizes = [8, 2048], strides = [1, 1]} : vector<64x2048xf32> to vector<8x2048xf32>
    %7 = arith.maximumf %5, %6 : vector<8x2048xf32>
    %8 = vector.extract_strided_slice %2 {offsets = [24, 0], sizes = [8, 2048], strides = [1, 1]} : vector<64x2048xf32> to vector<8x2048xf32>
    %9 = arith.maximumf %7, %8 : vector<8x2048xf32>
    %10 = vector.extract_strided_slice %2 {offsets = [32, 0], sizes = [8, 2048], strides = [1, 1]} : vector<64x2048xf32> to vector<8x2048xf32>
    %11 = arith.maximumf %9, %10 : vector<8x2048xf32>
    %12 = vector.extract_strided_slice %2 {offsets = [40, 0], sizes = [8, 2048], strides = [1, 1]} : vector<64x2048xf32> to vector<8x2048xf32>
    %13 = arith.maximumf %11, %12 : vector<8x2048xf32>
    %14 = vector.extract_strided_slice %2 {offsets = [48, 0], sizes = [8, 2048], strides = [1, 1]} : vector<64x2048xf32> to vector<8x2048xf32>
    %15 = arith.maximumf %13, %14 : vector<8x2048xf32>
    %16 = vector.extract_strided_slice %2 {offsets = [56, 0], sizes = [8, 2048], strides = [1, 1]} : vector<64x2048xf32> to vector<8x2048xf32>
    %17 = arith.maximumf %15, %16 : vector<8x2048xf32>
    %c0_3 = arith.constant 0 : index
    %c0_4 = arith.constant 0 : index
    %18 = vector.load %arg3[%c0_3, %c0_4] : memref<8x128xf32, #tpu.memory_space<vmem>>, vector<8x1xf32>
    %19 = vector.broadcast %18 : vector<8x1xf32> to vector<8x2048xf32>
    %20 = arith.addf %17, %19 : vector<8x2048xf32>
    %cst_5 = arith.constant 0.000000e+00 : f32
    %21 = vector.broadcast %cst_5 : f32 to vector<8x2048xf32>
    %22 = arith.maximumf %20, %21 : vector<8x2048xf32>
    %c0_6 = arith.constant 0 : index
    %c0_7 = arith.constant 0 : index
    %23 = vector.load %arg4[%c0_6, %c0_7] : memref<8x2048xf32, #tpu.memory_space<vmem>>, vector<8x2048xf32>
    tpu.vector_store %arg4[%c0_6, %c0_7], %22 {strides = array<i32>} : memref<8x2048xf32, #tpu.memory_space<vmem>>, vector<8x2048xf32>,
    return
  }
  func.func @transform_0(%arg0: i32) -> (i32, i32) {
    %c0_i32 = arith.constant 0 : i32
    %c0_i32_0 = arith.constant 0 : i32
    return %c0_i32, %arg0 : i32, i32
  }
  func.func @transform_1(%arg0: i32) -> (i32, i32) {
    %c0_i32 = arith.constant 0 : i32
    %c0_i32_0 = arith.constant 0 : i32
    %c0_i32_1 = arith.constant 0 : i32
    return %c0_i32, %c0_i32_0 : i32, i32
  }
  func.func @transform_2(%arg0: i32) -> (i32, i32) {
    %c0_i32 = arith.constant 0 : i32
    %c0_i32_0 = arith.constant 0 : i32
    %c0_i32_1 = arith.constant 0 : i32
    return %c0_i32, %c0_i32_0 : i32, i32
  }
  func.func @transform_3(%arg0: i32) -> (i32, i32) {
    %c0_i32 = arith.constant 0 : i32
    %c0_i32_0 = arith.constant 0 : i32
    return %c0_i32, %arg0 : i32, i32
  }
}

module attributes {stable_mosaic.version = 11 : i64} {
  func.func @kernel(%arg0: i32, %arg1: memref<256x1536xbf16, #tpu.memory_space<vmem>>, %arg2: memref<64x256xbf16, #tpu.memory_space<vmem>>, %arg3: memref<8x128xf32, #tpu.memory_space<vmem>>, %arg4: memref<8x1536xf32, #tpu.memory_space<vmem>>) attributes {dimension_semantics = [#tpu.dimension_semantics<parallel>], iteration_bounds = array<i64: 1>, scalar_prefetch = 0 : i64, scratch_operands = 0 : i64, tpu.core_type = #tpu.core_type<tc>, window_params = [{transform_indices = @transform_0, window_bounds = array<i64: 256, 1536>}, {pipeline_mode = #tpu.pipeline_mode<synchronous>, transform_indices = @transform_1, window_bounds = array<i64: 64, 256>}, {pipeline_mode = #tpu.pipeline_mode<synchronous>, transform_indices = @transform_2, window_bounds = array<i64: 8, 128>}, {transform_indices = @transform_3, window_bounds = array<i64: 8, 1536>}]} {
    %c0 = arith.constant 0 : index
    %c0_0 = arith.constant 0 : index
    %0 = vector.load %arg2[%c0, %c0_0] : memref<64x256xbf16, #tpu.memory_space<vmem>>, vector<64x256xbf16>
    %c0_1 = arith.constant 0 : index
    %c0_2 = arith.constant 0 : index
    %1 = vector.load %arg1[%c0_1, %c0_2] : memref<256x1536xbf16, #tpu.memory_space<vmem>>, vector<256x1536xbf16>
    %cst = arith.constant dense<0.000000e+00> : vector<64x1536xf32>
    %2 = tpu.matmul %0, %1, %cst {dimension_numbers = #tpu.dot_dimension_numbers<[1], [0], [0], [1], [0, 0, 1, 1], [], []>} : vector<64x256xbf16>, vector<256x1536xbf16>, vector<64x1536xf32> -> vector<64x1536xf32>
    %3 = vector.extract_strided_slice %2 {offsets = [0, 0], sizes = [8, 1536], strides = [1, 1]} : vector<64x1536xf32> to vector<8x1536xf32>
    %4 = vector.extract_strided_slice %2 {offsets = [8, 0], sizes = [8, 1536], strides = [1, 1]} : vector<64x1536xf32> to vector<8x1536xf32>
    %5 = arith.maximumf %3, %4 : vector<8x1536xf32>
    %6 = vector.extract_strided_slice %2 {offsets = [16, 0], sizes = [8, 1536], strides = [1, 1]} : vector<64x1536xf32> to vector<8x1536xf32>
    %7 = arith.maximumf %5, %6 : vector<8x1536xf32>
    %8 = vector.extract_strided_slice %2 {offsets = [24, 0], sizes = [8, 1536], strides = [1, 1]} : vector<64x1536xf32> to vector<8x1536xf32>
    %9 = arith.maximumf %7, %8 : vector<8x1536xf32>
    %10 = vector.extract_strided_slice %2 {offsets = [32, 0], sizes = [8, 1536], strides = [1, 1]} : vector<64x1536xf32> to vector<8x1536xf32>
    %11 = arith.maximumf %9, %10 : vector<8x1536xf32>
    %12 = vector.extract_strided_slice %2 {offsets = [40, 0], sizes = [8, 1536], strides = [1, 1]} : vector<64x1536xf32> to vector<8x1536xf32>
    %13 = arith.maximumf %11, %12 : vector<8x1536xf32>
    %14 = vector.extract_strided_slice %2 {offsets = [48, 0], sizes = [8, 1536], strides = [1, 1]} : vector<64x1536xf32> to vector<8x1536xf32>
    %15 = arith.maximumf %13, %14 : vector<8x1536xf32>
    %16 = vector.extract_strided_slice %2 {offsets = [56, 0], sizes = [8, 1536], strides = [1, 1]} : vector<64x1536xf32> to vector<8x1536xf32>
    %17 = arith.maximumf %15, %16 : vector<8x1536xf32>
    %c0_3 = arith.constant 0 : index
    %c0_4 = arith.constant 0 : index
    %18 = vector.load %arg3[%c0_3, %c0_4] : memref<8x128xf32, #tpu.memory_space<vmem>>, vector<8x1xf32>
    %19 = vector.broadcast %18 : vector<8x1xf32> to vector<8x1536xf32>
    %20 = arith.addf %17, %19 : vector<8x1536xf32>
    %cst_5 = arith.constant 0.000000e+00 : f32
    %21 = vector.broadcast %cst_5 : f32 to vector<8x1536xf32>
    %22 = arith.maximumf %20, %21 : vector<8x1536xf32>
    %c0_6 = arith.constant 0 : index
    %c0_7 = arith.constant 0 : index
    %23 = vector.load %arg4[%c0_6, %c0_7] : memref<8x1536xf32, #tpu.memory_space<vmem>>, vector<8x1536xf32>
    tpu.vector_store %arg4[%c0_6, %c0_7], %22 {strides = array<i32>} : memref<8x1536xf32, #tpu.memory_space<vmem>>, vector<8x1536xf32>,
    return
  }
  func.func @transform_0(%arg0: i32) -> (i32, i32) {
    %c0_i32 = arith.constant 0 : i32
    %c0_i32_0 = arith.constant 0 : i32
    return %c0_i32, %arg0 : i32, i32
  }
  func.func @transform_1(%arg0: i32) -> (i32, i32) {
    %c0_i32 = arith.constant 0 : i32
    %c0_i32_0 = arith.constant 0 : i32
    %c0_i32_1 = arith.constant 0 : i32
    return %c0_i32, %c0_i32_0 : i32, i32
  }
  func.func @transform_2(%arg0: i32) -> (i32, i32) {
    %c0_i32 = arith.constant 0 : i32
    %c0_i32_0 = arith.constant 0 : i32
    %c0_i32_1 = arith.constant 0 : i32
    return %c0_i32, %c0_i32_0 : i32, i32
  }
  func.func @transform_3(%arg0: i32) -> (i32, i32) {
    %c0_i32 = arith.constant 0 : i32
    %c0_i32_0 = arith.constant 0 : i32
    return %c0_i32, %arg0 : i32, i32
  }
}

module attributes {stable_mosaic.version = 11 : i64} {
  func.func @kernel(%arg0: i32, %arg1: memref<512x512xbf16, #tpu.memory_space<vmem>>, %arg2: memref<128x512xbf16, #tpu.memory_space<vmem>>, %arg3: memref<16x128xf32, #tpu.memory_space<vmem>>, %arg4: memref<128x512xf32, #tpu.memory_space<vmem>>, %arg5: memref<16x512xf32, #tpu.memory_space<vmem>>) attributes {dimension_semantics = [#tpu.dimension_semantics<parallel>], iteration_bounds = array<i64: 1>, scalar_prefetch = 0 : i64, scratch_operands = 0 : i64, tpu.core_type = #tpu.core_type<tc>, window_params = [{transform_indices = @transform_0, window_bounds = array<i64: 512, 512>}, {pipeline_mode = #tpu.pipeline_mode<synchronous>, transform_indices = @transform_1, window_bounds = array<i64: 128, 512>}, {pipeline_mode = #tpu.pipeline_mode<synchronous>, transform_indices = @transform_2, window_bounds = array<i64: 16, 128>}, {transform_indices = @transform_3, window_bounds = array<i64: 128, 512>}, {transform_indices = @transform_4, window_bounds = array<i64: 16, 512>}]} {
    %c0 = arith.constant 0 : index
    %c0_0 = arith.constant 0 : index
    %0 = vector.load %arg2[%c0, %c0_0] : memref<128x512xbf16, #tpu.memory_space<vmem>>, vector<128x512xbf16>
    %c0_1 = arith.constant 0 : index
    %c0_2 = arith.constant 0 : index
    %1 = vector.load %arg1[%c0_1, %c0_2] : memref<512x512xbf16, #tpu.memory_space<vmem>>, vector<512x512xbf16>
    %cst = arith.constant dense<0.000000e+00> : vector<128x512xf32>
    %2 = tpu.matmul %0, %1, %cst {dimension_numbers = #tpu.dot_dimension_numbers<[1], [0], [0], [1], [0, 0, 1, 1], [], []>} : vector<128x512xbf16>, vector<512x512xbf16>, vector<128x512xf32> -> vector<128x512xf32>
    %c0_3 = arith.constant 0 : index
    %c0_4 = arith.constant 0 : index
    %3 = vector.load %arg4[%c0_3, %c0_4] : memref<128x512xf32, #tpu.memory_space<vmem>>, vector<128x512xf32>
    %4 = arith.addf %2, %3 : vector<128x512xf32>
    %5 = vector.extract_strided_slice %4 {offsets = [0, 0], sizes = [16, 512], strides = [1, 1]} : vector<128x512xf32> to vector<16x512xf32>
    %6 = vector.extract_strided_slice %4 {offsets = [16, 0], sizes = [16, 512], strides = [1, 1]} : vector<128x512xf32> to vector<16x512xf32>
    %7 = arith.maximumf %5, %6 : vector<16x512xf32>
    %8 = vector.extract_strided_slice %4 {offsets = [32, 0], sizes = [16, 512], strides = [1, 1]} : vector<128x512xf32> to vector<16x512xf32>
    %9 = arith.maximumf %7, %8 : vector<16x512xf32>
    %10 = vector.extract_strided_slice %4 {offsets = [48, 0], sizes = [16, 512], strides = [1, 1]} : vector<128x512xf32> to vector<16x512xf32>
    %11 = arith.maximumf %9, %10 : vector<16x512xf32>
    %12 = vector.extract_strided_slice %4 {offsets = [64, 0], sizes = [16, 512], strides = [1, 1]} : vector<128x512xf32> to vector<16x512xf32>
    %13 = arith.maximumf %11, %12 : vector<16x512xf32>
    %14 = vector.extract_strided_slice %4 {offsets = [80, 0], sizes = [16, 512], strides = [1, 1]} : vector<128x512xf32> to vector<16x512xf32>
    %15 = arith.maximumf %13, %14 : vector<16x512xf32>
    %16 = vector.extract_strided_slice %4 {offsets = [96, 0], sizes = [16, 512], strides = [1, 1]} : vector<128x512xf32> to vector<16x512xf32>
    %17 = arith.maximumf %15, %16 : vector<16x512xf32>
    %18 = vector.extract_strided_slice %4 {offsets = [112, 0], sizes = [16, 512], strides = [1, 1]} : vector<128x512xf32> to vector<16x512xf32>
    %19 = arith.maximumf %17, %18 : vector<16x512xf32>
    %c0_5 = arith.constant 0 : index
    %c0_6 = arith.constant 0 : index
    %20 = vector.load %arg3[%c0_5, %c0_6] : memref<16x128xf32, #tpu.memory_space<vmem>>, vector<16x1xf32>
    %21 = vector.broadcast %20 : vector<16x1xf32> to vector<16x512xf32>
    %22 = arith.addf %19, %21 : vector<16x512xf32>
    %cst_7 = arith.constant 0.000000e+00 : f32
    %23 = vector.broadcast %cst_7 : f32 to vector<16x512xf32>
    %24 = arith.maximumf %22, %23 : vector<16x512xf32>
    %c0_8 = arith.constant 0 : index
    %c0_9 = arith.constant 0 : index
    %25 = vector.load %arg5[%c0_8, %c0_9] : memref<16x512xf32, #tpu.memory_space<vmem>>, vector<16x512xf32>
    tpu.vector_store %arg5[%c0_8, %c0_9], %24 {strides = array<i32>} : memref<16x512xf32, #tpu.memory_space<vmem>>, vector<16x512xf32>,
    return
  }
  func.func @transform_0(%arg0: i32) -> (i32, i32) {
    %c0_i32 = arith.constant 0 : i32
    %c0_i32_0 = arith.constant 0 : i32
    return %c0_i32, %arg0 : i32, i32
  }
  func.func @transform_1(%arg0: i32) -> (i32, i32) {
    %c0_i32 = arith.constant 0 : i32
    %c0_i32_0 = arith.constant 0 : i32
    %c0_i32_1 = arith.constant 0 : i32
    return %c0_i32, %c0_i32_0 : i32, i32
  }
  func.func @transform_2(%arg0: i32) -> (i32, i32) {
    %c0_i32 = arith.constant 0 : i32
    %c0_i32_0 = arith.constant 0 : i32
    %c0_i32_1 = arith.constant 0 : i32
    return %c0_i32, %c0_i32_0 : i32, i32
  }
  func.func @transform_3(%arg0: i32) -> (i32, i32) {
    %c0_i32 = arith.constant 0 : i32
    %c0_i32_0 = arith.constant 0 : i32
    return %c0_i32, %arg0 : i32, i32
  }
  func.func @transform_4(%arg0: i32) -> (i32, i32) {
    %c0_i32 = arith.constant 0 : i32
    %c0_i32_0 = arith.constant 0 : i32
    return %c0_i32, %arg0 : i32, i32
  }
}

module attributes {stable_mosaic.version = 11 : i64} {
  func.func @_fc_kernel(%arg0: i32, %arg1: memref<2x2048xf32, #tpu.memory_space<vmem>>, %arg2: memref<2048x128xf32, #tpu.memory_space<vmem>>, %arg3: memref<1x128xf32, #tpu.memory_space<vmem>>, %arg4: memref<2x128xf32, #tpu.memory_space<vmem>>) attributes {dimension_semantics = [#tpu.dimension_semantics<arbitrary>], iteration_bounds = array<i64: 1>, scalar_prefetch = 0 : i64, scratch_operands = 0 : i64, tpu.core_type = #tpu.core_type<tc>, window_params = [{pipeline_mode = #tpu.pipeline_mode<synchronous>, transform_indices = @transform_0, window_bounds = array<i64: 2, 2048>}, {pipeline_mode = #tpu.pipeline_mode<synchronous>, transform_indices = @transform_1, window_bounds = array<i64: 2048, 128>}, {pipeline_mode = #tpu.pipeline_mode<synchronous>, transform_indices = @transform_2, window_bounds = array<i64: 1, 128>}, {pipeline_mode = #tpu.pipeline_mode<synchronous>, transform_indices = @transform_3, window_bounds = array<i64: 2, 128>}]} {
    %c0 = arith.constant 0 : index
    %c0_0 = arith.constant 0 : index
    %0 = vector.load %arg1[%c0, %c0_0] : memref<2x2048xf32, #tpu.memory_space<vmem>>, vector<2x2048xf32>
    %c0_1 = arith.constant 0 : index
    %c0_2 = arith.constant 0 : index
    %1 = vector.load %arg2[%c0_1, %c0_2] : memref<2048x128xf32, #tpu.memory_space<vmem>>, vector<2048x128xf32>
    %cst = arith.constant dense<0.000000e+00> : vector<2x128xf32>
    %2 = tpu.matmul %0, %1, %cst {dimension_numbers = #tpu.dot_dimension_numbers<[1], [0], [0], [1], [0, 0, 1, 1], [], []>} : vector<2x2048xf32>, vector<2048x128xf32>, vector<2x128xf32> -> vector<2x128xf32>
    %c0_3 = arith.constant 0 : index
    %c0_4 = arith.constant 0 : index
    %3 = vector.load %arg3[%c0_3, %c0_4] : memref<1x128xf32, #tpu.memory_space<vmem>>, vector<1x128xf32>
    %4 = vector.broadcast %3 : vector<1x128xf32> to vector<2x128xf32>
    %5 = arith.addf %2, %4 : vector<2x128xf32>
    %c0_5 = arith.constant 0 : index
    %c0_6 = arith.constant 0 : index
    %6 = vector.load %arg4[%c0_5, %c0_6] : memref<2x128xf32, #tpu.memory_space<vmem>>, vector<2x128xf32>
    tpu.vector_store %arg4[%c0_5, %c0_6], %5 {strides = array<i32>} : memref<2x128xf32, #tpu.memory_space<vmem>>, vector<2x128xf32>,
    return
  }
  func.func @transform_0(%arg0: i32) -> (i32, i32) {
    %c0_i32 = arith.constant 0 : i32
    %c0_i32_0 = arith.constant 0 : i32
    %c0_i32_1 = arith.constant 0 : i32
    return %c0_i32, %c0_i32_0 : i32, i32
  }
  func.func @transform_1(%arg0: i32) -> (i32, i32) {
    %c0_i32 = arith.constant 0 : i32
    %c0_i32_0 = arith.constant 0 : i32
    %c0_i32_1 = arith.constant 0 : i32
    return %c0_i32, %c0_i32_0 : i32, i32
  }
  func.func @transform_2(%arg0: i32) -> (i32, i32) {
    %c0_i32 = arith.constant 0 : i32
    %c0_i32_0 = arith.constant 0 : i32
    %c0_i32_1 = arith.constant 0 : i32
    return %c0_i32, %c0_i32_0 : i32, i32
  }
  func.func @transform_3(%arg0: i32) -> (i32, i32) {
    %c0_i32 = arith.constant 0 : i32
    %c0_i32_0 = arith.constant 0 : i32
    %c0_i32_1 = arith.constant 0 : i32
    return %c0_i32, %c0_i32_0 : i32, i32
  }
}

</mosaic_0001>

<bundles_post_ra>
// kernel: cnn_forward.4
= control target key start
LH: loop header
LB: loop body
LE: loop exit
PB: predicated region body
PF: predicated region fallthrough
CT: control target
= control target key end

     0   :  { %s2281_s12 = smov 0   ;;  %s2283_s13 = smov 0   ;;  %s2847_s0 = inlined_call_operand.vmem [shape: bf16[128,10240], index: 0, kind: input, shape index: {}]   ;;  %s2848_s1 = inlined_call_operand.vmem [shape: bf16[64,128], index: 1, kind: input, shape index: {}]   ;;  %s2849_s2 = inlined_call_operand.vmem [shape: f32[8,128], index: 2, kind: input, shape index: {}]   ;;  %s2850_s3 = inlined_call_operand.vmem [shape: f32[8,10240], index: 3, kind: output, shape index: {}]  }
   0x1   :  { %s2285_s14 = smov 0  }
   0x2 LB: > { %s2060_s15 = sadd.s32 4294967295, %s2258_s14   ;;  %s2298_s16 = sadd.s32 1, %s2258_s14   ;;  %s2258_s14 = sphi %s2285_s14, %s2853_s14   ;;  %s2254_s13 = sphi %s2283_s13, %s2852_s13   ;;  %s2250_s12 = sphi %s2281_s12, %s2851_s12  }
   0x3   : > { %s17_s17 = ssub.s32 %s2258_s14, %s2298_s16  ;;  %s20_s18 = sadd.s32 1, %s2254_s13 }
   0x4   : > { %p18_p0 = scmp.eq.s32.totalorder %s17_s17, 0  ;;  %p27_p1 = scmp.ne.s32.totalorder %s2254_s13, %s2250_s12 }
   0x5   : > { %p28_p2 = scmp.eq.s32.totalorder %s2258_s14, 0  ;;  %p2063_p4 = scmp.ge.s32.totalorder %s2258_s14, 5 }
   0x6   : > { %s2307_s19 = scalar_select %p18_p0, %s2254_s13, %s20_s18  }
   0x7   : > { %p29_p3 = por %p28_p2, %p27_p1  ;;  %127 = sbr.rel (%p2063_p4) target bundleno = 82 (0x52), region = 24 }
   0xe   : > { %130 = sbr.rel (!%p29_p3) target bundleno = 82 (0x52), region = 28  ;;  %s132_s20 = sand.u32 (%p29_p3), 1, %s2254_s13  }
   0xf   : > { %s2205_s21 = sshll.u32 (%p29_p3), %s2258_s14, 6  ;;  %s2064_s22 = sshll.u32 (%p29_p3), %s132_s20, 10 }
  0x10   : > { %s2315_s25 = scalar_lea.vmem (%p29_p3), %s2847_s0, %s2205_s21  ;;  %s2320_s26 = scalar_lea.vmem (%p29_p3), [#allocation2], %s2064_s22 }
  0x11   : > { %v150_v0 = vld [vmem:[%s2315_s25] sm:$0xff] (%p29_p3)  ;;  %v152_v1 = vld [vmem:[%s2315_s25 + $0x8] sm:$0xff] (%p29_p3)  ;;  %v154_v2 = vld [vmem:[%s2315_s25 + $0x10] sm:$0xff] (%p29_p3) }
  0x12   : > { %151 = vst [vmem:[%s2320_s26] sm:$0xff] (%p29_p3), %v150_v0  ;;  %153 = vst [vmem:[%s2320_s26 + $0x8] sm:$0xff] (%p29_p3), %v152_v1  ;;  %v156_v3 = vld [vmem:[%s2315_s25 + $0x18] sm:$0xff] (%p29_p3)  ;;  %v158_v4 = vld [vmem:[%s2315_s25 + $0x20] sm:$0xff] (%p29_p3) }
  0x13   : > { %155 = vst [vmem:[%s2320_s26 + $0x10] sm:$0xff] (%p29_p3), %v154_v2  ;;  %v160_v5 = vld [vmem:[%s2315_s25 + $0x28] sm:$0xff] (%p29_p3)  ;;  %157 = vst [vmem:[%s2320_s26 + $0x18] sm:$0xff] (%p29_p3), %v156_v3  ;;  %v162_v6 = vld [vmem:[%s2315_s25 + $0x30] sm:$0xff] (%p29_p3) }
  0x14   : > { %159 = vst [vmem:[%s2320_s26 + $0x20] sm:$0xff] (%p29_p3), %v158_v4  ;;  %161 = vst [vmem:[%s2320_s26 + $0x28] sm:$0xff] (%p29_p3), %v160_v5  ;;  %v164_v7 = vld [vmem:[%s2315_s25 + $0x38] sm:$0xff] (%p29_p3)  ;;  %v166_v8 = vld [vmem:[%s2315_s25 + $0x140] sm:$0xff] (%p29_p3) }
  0x15   : > { %163 = vst [vmem:[%s2320_s26 + $0x30] sm:$0xff] %v162_v6  ;;  %165 = vst [vmem:[%s2320_s26 + $0x38] sm:$0xff] %v164_v7  ;;  %v168_v9 = vld [vmem:[%s2315_s25 + $0x148] sm:$0xff]  ;;  %v170_v10 = vld [vmem:[%s2315_s25 + $0x150] sm:$0xff] }
  0x16   : > { %167 = vst [vmem:[%s2320_s26 + $0x40] sm:$0xff] %v166_v8  ;;  %v172_v11 = vld [vmem:[%s2315_s25 + $0x158] sm:$0xff]  ;;  %169 = vst [vmem:[%s2320_s26 + $0x48] sm:$0xff] %v168_v9  ;;  %v174_v12 = vld [vmem:[%s2315_s25 + $0x160] sm:$0xff] }
  0x17   : > { %171 = vst [vmem:[%s2320_s26 + $0x50] sm:$0xff] %v170_v10  ;;  %173 = vst [vmem:[%s2320_s26 + $0x58] sm:$0xff] %v172_v11  ;;  %v176_v13 = vld [vmem:[%s2315_s25 + $0x168] sm:$0xff]  ;;  %v178_v14 = vld [vmem:[%s2315_s25 + $0x170] sm:$0xff] }
  0x18   : > { %175 = vst [vmem:[%s2320_s26 + $0x60] sm:$0xff] %v174_v12  ;;  %177 = vst [vmem:[%s2320_s26 + $0x68] sm:$0xff] %v176_v13  ;;  %v180_v15 = vld [vmem:[%s2315_s25 + $0x178] sm:$0xff]  ;;  %v182_v16 = vld [vmem:[%s2315_s25 + $0x280] sm:$0xff] }
  0x19   : > { %179 = vst [vmem:[%s2320_s26 + $0x70] sm:$0xff] %v178_v14  ;;  %v184_v17 = vld [vmem:[%s2315_s25 + $0x288] sm:$0xff]  ;;  %181 = vst [vmem:[%s2320_s26 + $0x78] sm:$0xff] %v180_v15  ;;  %v186_v18 = vld [vmem:[%s2315_s25 + $0x290] sm:$0xff] }
  0x1a   : > { %183 = vst [vmem:[%s2320_s26 + $0x80] sm:$0xff] %v182_v16  ;;  %185 = vst [vmem:[%s2320_s26 + $0x88] sm:$0xff] %v184_v17  ;;  %v188_v19 = vld [vmem:[%s2315_s25 + $0x298] sm:$0xff]  ;;  %v190_v20 = vld [vmem:[%s2315_s25 + $0x2a0] sm:$0xff] }
  0x1b   : > { %187 = vst [vmem:[%s2320_s26 + $0x90] sm:$0xff] %v186_v18  ;;  %189 = vst [vmem:[%s2320_s26 + $0x98] sm:$0xff] %v188_v19  ;;  %v192_v21 = vld [vmem:[%s2315_s25 + $0x2a8] sm:$0xff]  ;;  %v194_v22 = vld [vmem:[%s2315_s25 + $0x2b0] sm:$0xff] }
  0x1c   : > { %191 = vst [vmem:[%s2320_s26 + $0xa0] sm:$0xff] %v190_v20  ;;  %v196_v23 = vld [vmem:[%s2315_s25 + $0x2b8] sm:$0xff]  ;;  %193 = vst [vmem:[%s2320_s26 + $0xa8] sm:$0xff] %v192_v21  ;;  %v198_v24 = vld [vmem:[%s2315_s25 + $0x3c0] sm:$0xff] }
  0x1d   : > { %195 = vst [vmem:[%s2320_s26 + $0xb0] sm:$0xff] %v194_v22  ;;  %197 = vst [vmem:[%s2320_s26 + $0xb8] sm:$0xff] %v196_v23  ;;  %v200_v25 = vld [vmem:[%s2315_s25 + $0x3c8] sm:$0xff]  ;;  %v202_v26 = vld [vmem:[%s2315_s25 + $0x3d0] sm:$0xff] }
  0x1e   : > { %199 = vst [vmem:[%s2320_s26 + $0xc0] sm:$0xff] %v198_v24  ;;  %201 = vst [vmem:[%s2320_s26 + $0xc8] sm:$0xff] %v200_v25  ;;  %v204_v27 = vld [vmem:[%s2315_s25 + $0x3d8] sm:$0xff]  ;;  %v206_v28 = vld [vmem:[%s2315_s25 + $0x3e0] sm:$0xff] }
  0x1f   : > { %203 = vst [vmem:[%s2320_s26 + $0xd0] sm:$0xff] %v202_v26  ;;  %v208_v29 = vld [vmem:[%s2315_s25 + $0x3e8] sm:$0xff]  ;;  %205 = vst [vmem:[%s2320_s26 + $0xd8] sm:$0xff] %v204_v27  ;;  %v210_v30 = vld [vmem:[%s2315_s25 + $0x3f0] sm:$0xff] }
  0x20   : > { %207 = vst [vmem:[%s2320_s26 + $0xe0] sm:$0xff] %v206_v28  ;;  %209 = vst [vmem:[%s2320_s26 + $0xe8] sm:$0xff] %v208_v29  ;;  %v212_v31 = vld [vmem:[%s2315_s25 + $0x3f8] sm:$0xff]  ;;  %v214_v32 = vld [vmem:[%s2315_s25 + $0x500] sm:$0xff] }
  0x21   : > { %211 = vst [vmem:[%s2320_s26 + $0xf0] sm:$0xff] %v210_v30  ;;  %213 = vst [vmem:[%s2320_s26 + $0xf8] sm:$0xff] %v212_v31  ;;  %v216_v33 = vld [vmem:[%s2315_s25 + $0x508] sm:$0xff]  ;;  %v218_v34 = vld [vmem:[%s2315_s25 + $0x510] sm:$0xff] }
  0x22   : > { %215 = vst [vmem:[%s2320_s26 + $0x100] sm:$0xff] %v214_v32  ;;  %v220_v35 = vld [vmem:[%s2315_s25 + $0x518] sm:$0xff]  ;;  %217 = vst [vmem:[%s2320_s26 + $0x108] sm:$0xff] %v216_v33  ;;  %v222_v36 = vld [vmem:[%s2315_s25 + $0x520] sm:$0xff] }
  0x23   : > { %219 = vst [vmem:[%s2320_s26 + $0x110] sm:$0xff] %v218_v34  ;;  %221 = vst [vmem:[%s2320_s26 + $0x118] sm:$0xff] %v220_v35  ;;  %v224_v37 = vld [vmem:[%s2315_s25 + $0x528] sm:$0xff]  ;;  %v226_v38 = vld [vmem:[%s2315_s25 + $0x530] sm:$0xff] }
  0x24   : > { %223 = vst [vmem:[%s2320_s26 + $0x120] sm:$0xff] %v222_v36  ;;  %225 = vst [vmem:[%s2320_s26 + $0x128] sm:$0xff] %v224_v37  ;;  %v228_v39 = vld [vmem:[%s2315_s25 + $0x538] sm:$0xff]  ;;  %v230_v40 = vld [vmem:[%s2315_s25 + $0x640] sm:$0xff] }
  0x25   : > { %227 = vst [vmem:[%s2320_s26 + $0x130] sm:$0xff] %v226_v38  ;;  %v232_v41 = vld [vmem:[%s2315_s25 + $0x648] sm:$0xff]  ;;  %229 = vst [vmem:[%s2320_s26 + $0x138] sm:$0xff] %v228_v39  ;;  %v234_v42 = vld [vmem:[%s2315_s25 + $0x650] sm:$0xff] }
  0x26   : > { %231 = vst [vmem:[%s2320_s26 + $0x140] sm:$0xff] %v230_v40  ;;  %233 = vst [vmem:[%s2320_s26 + $0x148] sm:$0xff] %v232_v41  ;;  %v236_v43 = vld [vmem:[%s2315_s25 + $0x658] sm:$0xff]  ;;  %v238_v44 = vld [vmem:[%s2315_s25 + $0x660] sm:$0xff] }
  0x27   : > { %235 = vst [vmem:[%s2320_s26 + $0x150] sm:$0xff] %v234_v42  ;;  %237 = vst [vmem:[%s2320_s26 + $0x158] sm:$0xff] %v236_v43  ;;  %v240_v45 = vld [vmem:[%s2315_s25 + $0x668] sm:$0xff]  ;;  %v242_v46 = vld [vmem:[%s2315_s25 + $0x670] sm:$0xff] }
  0x28   : > { %239 = vst [vmem:[%s2320_s26 + $0x160] sm:$0xff] %v238_v44  ;;  %v244_v47 = vld [vmem:[%s2315_s25 + $0x678] sm:$0xff]  ;;  %241 = vst [vmem:[%s2320_s26 + $0x168] sm:$0xff] %v240_v45  ;;  %v246_v48 = vld [vmem:[%s2315_s25 + $0x780] sm:$0xff] }
  0x29   : > { %243 = vst [vmem:[%s2320_s26 + $0x170] sm:$0xff] %v242_v46  ;;  %245 = vst [vmem:[%s2320_s26 + $0x178] sm:$0xff] %v244_v47  ;;  %v248_v49 = vld [vmem:[%s2315_s25 + $0x788] sm:$0xff]  ;;  %v250_v50 = vld [vmem:[%s2315_s25 + $0x790] sm:$0xff] }
  0x2a   : > { %247 = vst [vmem:[%s2320_s26 + $0x180] sm:$0xff] %v246_v48  ;;  %249 = vst [vmem:[%s2320_s26 + $0x188] sm:$0xff] %v248_v49  ;;  %v252_v51 = vld [vmem:[%s2315_s25 + $0x798] sm:$0xff]  ;;  %v254_v52 = vld [vmem:[%s2315_s25 + $0x7a0] sm:$0xff] }
  0x2b   : > { %251 = vst [vmem:[%s2320_s26 + $0x190] sm:$0xff] %v250_v50  ;;  %v256_v53 = vld [vmem:[%s2315_s25 + $0x7a8] sm:$0xff]  ;;  %253 = vst [vmem:[%s2320_s26 + $0x198] sm:$0xff] %v252_v51  ;;  %v258_v54 = vld [vmem:[%s2315_s25 + $0x7b0] sm:$0xff] }
  0x2c   : > { %255 = vst [vmem:[%s2320_s26 + $0x1a0] sm:$0xff] %v254_v52  ;;  %257 = vst [vmem:[%s2320_s26 + $0x1a8] sm:$0xff] %v256_v53  ;;  %v260_v55 = vld [vmem:[%s2315_s25 + $0x7b8] sm:$0xff]  ;;  %v262_v56 = vld [vmem:[%s2315_s25 + $0x8c0] sm:$0xff] }
  0x2d   : > { %259 = vst [vmem:[%s2320_s26 + $0x1b0] sm:$0xff] %v258_v54  ;;  %261 = vst [vmem:[%s2320_s26 + $0x1b8] sm:$0xff] %v260_v55  ;;  %v264_v57 = vld [vmem:[%s2315_s25 + $0x8c8] sm:$0xff]  ;;  %v266_v58 = vld [vmem:[%s2315_s25 + $0x8d0] sm:$0xff] }
  0x2e   : > { %263 = vst [vmem:[%s2320_s26 + $0x1c0] sm:$0xff] %v262_v56  ;;  %v268_v59 = vld [vmem:[%s2315_s25 + $0x8d8] sm:$0xff]  ;;  %265 = vst [vmem:[%s2320_s26 + $0x1c8] sm:$0xff] %v264_v57  ;;  %v270_v60 = vld [vmem:[%s2315_s25 + $0x8e0] sm:$0xff] }
  0x2f   : > { %267 = vst [vmem:[%s2320_s26 + $0x1d0] sm:$0xff] %v266_v58  ;;  %269 = vst [vmem:[%s2320_s26 + $0x1d8] sm:$0xff] %v268_v59  ;;  %v272_v61 = vld [vmem:[%s2315_s25 + $0x8e8] sm:$0xff]  ;;  %v274_v62 = vld [vmem:[%s2315_s25 + $0x8f0] sm:$0xff] }
  0x30   : > { %271 = vst [vmem:[%s2320_s26 + $0x1e0] sm:$0xff] %v270_v60  ;;  %273 = vst [vmem:[%s2320_s26 + $0x1e8] sm:$0xff] %v272_v61  ;;  %v276_v63 = vld [vmem:[%s2315_s25 + $0x8f8] sm:$0xff]  ;;  %v278_v0 = vld [vmem:[%s2315_s25 + $0xa00] sm:$0xff] }
  0x31   : > { %275 = vst [vmem:[%s2320_s26 + $0x1f0] sm:$0xff] %v274_v62  ;;  %v280_v1 = vld [vmem:[%s2315_s25 + $0xa08] sm:$0xff]  ;;  %277 = vst [vmem:[%s2320_s26 + $0x1f8] sm:$0xff] %v276_v63  ;;  %v282_v2 = vld [vmem:[%s2315_s25 + $0xa10] sm:$0xff] }
  0x32   : > { %279 = vst [vmem:[%s2320_s26 + $0x200] sm:$0xff] %v278_v0  ;;  %281 = vst [vmem:[%s2320_s26 + $0x208] sm:$0xff] %v280_v1  ;;  %v284_v3 = vld [vmem:[%s2315_s25 + $0xa18] sm:$0xff]  ;;  %v286_v4 = vld [vmem:[%s2315_s25 + $0xa20] sm:$0xff] }
  0x33   : > { %283 = vst [vmem:[%s2320_s26 + $0x210] sm:$0xff] %v282_v2  ;;  %285 = vst [vmem:[%s2320_s26 + $0x218] sm:$0xff] %v284_v3  ;;  %v288_v5 = vld [vmem:[%s2315_s25 + $0xa28] sm:$0xff]  ;;  %v290_v6 = vld [vmem:[%s2315_s25 + $0xa30] sm:$0xff] }
  0x34   : > { %287 = vst [vmem:[%s2320_s26 + $0x220] sm:$0xff] %v286_v4  ;;  %v292_v7 = vld [vmem:[%s2315_s25 + $0xa38] sm:$0xff]  ;;  %289 = vst [vmem:[%s2320_s26 + $0x228] sm:$0xff] %v288_v5  ;;  %v294_v8 = vld [vmem:[%s2315_s25 + $0xb40] sm:$0xff] }
  0x35   : > { %291 = vst [vmem:[%s2320_s26 + $0x230] sm:$0xff] %v290_v6  ;;  %293 = vst [vmem:[%s2320_s26 + $0x238] sm:$0xff] %v292_v7  ;;  %v296_v9 = vld [vmem:[%s2315_s25 + $0xb48] sm:$0xff]  ;;  %v298_v10 = vld [vmem:[%s2315_s25 + $0xb50] sm:$0xff] }
  0x36   : > { %295 = vst [vmem:[%s2320_s26 + $0x240] sm:$0xff] %v294_v8  ;;  %297 = vst [vmem:[%s2320_s26 + $0x248] sm:$0xff] %v296_v9  ;;  %v300_v11 = vld [vmem:[%s2315_s25 + $0xb58] sm:$0xff]  ;;  %v302_v12 = vld [vmem:[%s2315_s25 + $0xb60] sm:$0xff] }
  0x37   : > { %299 = vst [vmem:[%s2320_s26 + $0x250] sm:$0xff] %v298_v10  ;;  %v304_v13 = vld [vmem:[%s2315_s25 + $0xb68] sm:$0xff]  ;;  %301 = vst [vmem:[%s2320_s26 + $0x258] sm:$0xff] %v300_v11  ;;  %v306_v14 = vld [vmem:[%s2315_s25 + $0xb70] sm:$0xff] }
  0x38   : > { %303 = vst [vmem:[%s2320_s26 + $0x260] sm:$0xff] %v302_v12  ;;  %305 = vst [vmem:[%s2320_s26 + $0x268] sm:$0xff] %v304_v13  ;;  %v308_v15 = vld [vmem:[%s2315_s25 + $0xb78] sm:$0xff]  ;;  %v310_v16 = vld [vmem:[%s2315_s25 + $0xc80] sm:$0xff] }
  0x39   : > { %307 = vst [vmem:[%s2320_s26 + $0x270] sm:$0xff] %v306_v14  ;;  %309 = vst [vmem:[%s2320_s26 + $0x278] sm:$0xff] %v308_v15  ;;  %v312_v17 = vld [vmem:[%s2315_s25 + $0xc88] sm:$0xff]  ;;  %v314_v18 = vld [vmem:[%s2315_s25 + $0xc90] sm:$0xff] }
  0x3a   : > { %311 = vst [vmem:[%s2320_s26 + $0x280] sm:$0xff] %v310_v16  ;;  %v316_v19 = vld [vmem:[%s2315_s25 + $0xc98] sm:$0xff]  ;;  %313 = vst [vmem:[%s2320_s26 + $0x288] sm:$0xff] %v312_v17  ;;  %v318_v20 = vld [vmem:[%s2315_s25 + $0xca0] sm:$0xff] }
  0x3b   : > { %315 = vst [vmem:[%s2320_s26 + $0x290] sm:$0xff] %v314_v18  ;;  %317 = vst [vmem:[%s2320_s26 + $0x298] sm:$0xff] %v316_v19  ;;  %v320_v21 = vld [vmem:[%s2315_s25 + $0xca8] sm:$0xff]  ;;  %v322_v22 = vld [vmem:[%s2315_s25 + $0xcb0] sm:$0xff] }
  0x3c   : > { %319 = vst [vmem:[%s2320_s26 + $0x2a0] sm:$0xff] %v318_v20  ;;  %321 = vst [vmem:[%s2320_s26 + $0x2a8] sm:$0xff] %v320_v21  ;;  %v324_v23 = vld [vmem:[%s2315_s25 + $0xcb8] sm:$0xff]  ;;  %v326_v24 = vld [vmem:[%s2315_s25 + $0xdc0] sm:$0xff] }
  0x3d   : > { %323 = vst [vmem:[%s2320_s26 + $0x2b0] sm:$0xff] %v322_v22  ;;  %v328_v25 = vld [vmem:[%s2315_s25 + $0xdc8] sm:$0xff]  ;;  %325 = vst [vmem:[%s2320_s26 + $0x2b8] sm:$0xff] %v324_v23  ;;  %v330_v26 = vld [vmem:[%s2315_s25 + $0xdd0] sm:$0xff] }
  0x3e   : > { %327 = vst [vmem:[%s2320_s26 + $0x2c0] sm:$0xff] %v326_v24  ;;  %329 = vst [vmem:[%s2320_s26 + $0x2c8] sm:$0xff] %v328_v25  ;;  %v332_v27 = vld [vmem:[%s2315_s25 + $0xdd8] sm:$0xff]  ;;  %v334_v28 = vld [vmem:[%s2315_s25 + $0xde0] sm:$0xff] }
  0x3f   : > { %331 = vst [vmem:[%s2320_s26 + $0x2d0] sm:$0xff] %v330_v26  ;;  %333 = vst [vmem:[%s2320_s26 + $0x2d8] sm:$0xff] %v332_v27  ;;  %v336_v29 = vld [vmem:[%s2315_s25 + $0xde8] sm:$0xff]  ;;  %v338_v30 = vld [vmem:[%s2315_s25 + $0xdf0] sm:$0xff] }
  0x40   : > { %335 = vst [vmem:[%s2320_s26 + $0x2e0] sm:$0xff] %v334_v28  ;;  %v340_v31 = vld [vmem:[%s2315_s25 + $0xdf8] sm:$0xff]  ;;  %337 = vst [vmem:[%s2320_s26 + $0x2e8] sm:$0xff] %v336_v29  ;;  %v342_v32 = vld [vmem:[%s2315_s25 + $0xf00] sm:$0xff] }
  0x41   : > { %339 = vst [vmem:[%s2320_s26 + $0x2f0] sm:$0xff] %v338_v30  ;;  %341 = vst [vmem:[%s2320_s26 + $0x2f8] sm:$0xff] %v340_v31  ;;  %v344_v33 = vld [vmem:[%s2315_s25 + $0xf08] sm:$0xff]  ;;  %v346_v34 = vld [vmem:[%s2315_s25 + $0xf10] sm:$0xff] }
  0x42   : > { %343 = vst [vmem:[%s2320_s26 + $0x300] sm:$0xff] %v342_v32  ;;  %345 = vst [vmem:[%s2320_s26 + $0x308] sm:$0xff] %v344_v33  ;;  %v348_v35 = vld [vmem:[%s2315_s25 + $0xf18] sm:$0xff]  ;;  %v350_v36 = vld [vmem:[%s2315_s25 + $0xf20] sm:$0xff] }
  0x43   : > { %347 = vst [vmem:[%s2320_s26 + $0x310] sm:$0xff] %v346_v34  ;;  %v352_v37 = vld [vmem:[%s2315_s25 + $0xf28] sm:$0xff]  ;;  %349 = vst [vmem:[%s2320_s26 + $0x318] sm:$0xff] %v348_v35  ;;  %v354_v38 = vld [vmem:[%s2315_s25 + $0xf30] sm:$0xff] }
  0x44   : > { %351 = vst [vmem:[%s2320_s26 + $0x320] sm:$0xff] %v350_v36  ;;  %353 = vst [vmem:[%s2320_s26 + $0x328] sm:$0xff] %v352_v37  ;;  %v356_v39 = vld [vmem:[%s2315_s25 + $0xf38] sm:$0xff]  ;;  %v358_v40 = vld [vmem:[%s2315_s25 + $0x1040] sm:$0xff] }
  0x45   : > { %355 = vst [vmem:[%s2320_s26 + $0x330] sm:$0xff] %v354_v38  ;;  %357 = vst [vmem:[%s2320_s26 + $0x338] sm:$0xff] %v356_v39  ;;  %v360_v41 = vld [vmem:[%s2315_s25 + $0x1048] sm:$0xff]  ;;  %v362_v42 = vld [vmem:[%s2315_s25 + $0x1050] sm:$0xff] }
  0x46   : > { %359 = vst [vmem:[%s2320_s26 + $0x340] sm:$0xff] %v358_v40  ;;  %v364_v43 = vld [vmem:[%s2315_s25 + $0x1058] sm:$0xff]  ;;  %361 = vst [vmem:[%s2320_s26 + $0x348] sm:$0xff] %v360_v41  ;;  %v366_v44 = vld [vmem:[%s2315_s25 + $0x1060] sm:$0xff] }
  0x47   : > { %363 = vst [vmem:[%s2320_s26 + $0x350] sm:$0xff] %v362_v42  ;;  %365 = vst [vmem:[%s2320_s26 + $0x358] sm:$0xff] %v364_v43  ;;  %v368_v45 = vld [vmem:[%s2315_s25 + $0x1068] sm:$0xff]  ;;  %v370_v46 = vld [vmem:[%s2315_s25 + $0x1070] sm:$0xff] }
  0x48   : > { %367 = vst [vmem:[%s2320_s26 + $0x360] sm:$0xff] %v366_v44  ;;  %369 = vst [vmem:[%s2320_s26 + $0x368] sm:$0xff] %v368_v45  ;;  %v372_v47 = vld [vmem:[%s2315_s25 + $0x1078] sm:$0xff]  ;;  %v374_v48 = vld [vmem:[%s2315_s25 + $0x1180] sm:$0xff] }
  0x49   : > { %371 = vst [vmem:[%s2320_s26 + $0x370] sm:$0xff] %v370_v46  ;;  %v376_v49 = vld [vmem:[%s2315_s25 + $0x1188] sm:$0xff]  ;;  %373 = vst [vmem:[%s2320_s26 + $0x378] sm:$0xff] %v372_v47  ;;  %v378_v50 = vld [vmem:[%s2315_s25 + $0x1190] sm:$0xff] }
  0x4a   : > { %375 = vst [vmem:[%s2320_s26 + $0x380] sm:$0xff] %v374_v48  ;;  %377 = vst [vmem:[%s2320_s26 + $0x388] sm:$0xff] %v376_v49  ;;  %v380_v51 = vld [vmem:[%s2315_s25 + $0x1198] sm:$0xff]  ;;  %v382_v52 = vld [vmem:[%s2315_s25 + $0x11a0] sm:$0xff] }
  0x4b   : > { %379 = vst [vmem:[%s2320_s26 + $0x390] sm:$0xff] %v378_v50  ;;  %381 = vst [vmem:[%s2320_s26 + $0x398] sm:$0xff] %v380_v51  ;;  %v384_v53 = vld [vmem:[%s2315_s25 + $0x11a8] sm:$0xff]  ;;  %v386_v54 = vld [vmem:[%s2315_s25 + $0x11b0] sm:$0xff] }
  0x4c   : > { %383 = vst [vmem:[%s2320_s26 + $0x3a0] sm:$0xff] %v382_v52  ;;  %v388_v55 = vld [vmem:[%s2315_s25 + $0x11b8] sm:$0xff]  ;;  %385 = vst [vmem:[%s2320_s26 + $0x3a8] sm:$0xff] %v384_v53  ;;  %v390_v56 = vld [vmem:[%s2315_s25 + $0x12c0] sm:$0xff] }
  0x4d   : > { %387 = vst [vmem:[%s2320_s26 + $0x3b0] sm:$0xff] %v386_v54  ;;  %389 = vst [vmem:[%s2320_s26 + $0x3b8] sm:$0xff] %v388_v55  ;;  %v392_v57 = vld [vmem:[%s2315_s25 + $0x12c8] sm:$0xff]  ;;  %v394_v58 = vld [vmem:[%s2315_s25 + $0x12d0] sm:$0xff] }
  0x4e   : > { %391 = vst [vmem:[%s2320_s26 + $0x3c0] sm:$0xff] %v390_v56  ;;  %393 = vst [vmem:[%s2320_s26 + $0x3c8] sm:$0xff] %v392_v57  ;;  %v396_v59 = vld [vmem:[%s2315_s25 + $0x12d8] sm:$0xff]  ;;  %v398_v60 = vld [vmem:[%s2315_s25 + $0x12e0] sm:$0xff] }
  0x4f   : > { %395 = vst [vmem:[%s2320_s26 + $0x3d0] sm:$0xff] %v394_v58  ;;  %v400_v61 = vld [vmem:[%s2315_s25 + $0x12e8] sm:$0xff]  ;;  %397 = vst [vmem:[%s2320_s26 + $0x3d8] sm:$0xff] %v396_v59  ;;  %v402_v62 = vld [vmem:[%s2315_s25 + $0x12f0] sm:$0xff] }
  0x50   : > { %399 = vst [vmem:[%s2320_s26 + $0x3e0] sm:$0xff] %v398_v60  ;;  %401 = vst [vmem:[%s2320_s26 + $0x3e8] sm:$0xff] %v400_v61  ;;  %v404_v63 = vld [vmem:[%s2315_s25 + $0x12f8] sm:$0xff] }
  0x51   : > { %403 = vst [vmem:[%s2320_s26 + $0x3f0] sm:$0xff] %v402_v62  ;;  %405 = vst [vmem:[%s2320_s26 + $0x3f8] sm:$0xff] %v404_v63 }
  0x52 PF: > { %p2067_p5 = scmp.ge.s32.totalorder %s2258_s14, 1  ;;  %p410_p6 = scmp.lt.s32.totalorder %s2258_s14, 6 }
  0x54   : > { %p411_p7 = pnand %p2067_p5, %p410_p6 }
  0x55   : > { %s417_s27 = sand.u32 (!%p411_p7), 1, %s2250_s12   ;;  %v2260_v0 = vmov (!%p411_p7), 0   ;;  %s2069_s17 = sshll.u32 (!%p411_p7), %s2060_s15, 4 }
  0x56   : > { %414 = sbr.rel (%p411_p7) target bundleno = 466 (0x1d2), region = 51  ;;  %s2068_s28 = sshll.u32 (!%p411_p7), %s417_s27, 10  ;;  %1280 = vmatprep.mubr.bf16.mxu0 (!%p411_p7), %v2260_v0  ;;  %1353 = vmatprep.mubr.bf16.mxu1 (!%p411_p7), %v2260_v0 }
  0x57   : > { %2231 = vset.pattern.permute.xlu0 (!%p411_p7), %v2260_v0  ;;  %s2581_s29 = scalar_lea.vmem (!%p411_p7), [#allocation2], %s2068_s28  ;;  %p442_p8 = scmp.lt.s32.totalorder (!%p411_p7), %s2069_s17, 79 }
  0x58   : > { %v456_v1 = vld [vmem:[%s2581_s29] sm:$0xff] (!%p411_p7)  ;;  %v457_v3 = vld [vmem:[%s2581_s29 + $0x8] sm:$0xff] (!%p411_p7)  ;;  %v458_v63 = vld [vmem:[%s2581_s29 + $0x10] sm:$0xff] (!%p411_p7) }
  0x59   : > { %v464_v2 = vld [vmem:[%s2581_s29 + $0x40] sm:$0xff] (!%p411_p7)  ;;  %v465_v5 = vld [vmem:[%s2581_s29 + $0x48] sm:$0xff] (!%p411_p7) }
  0x5a   : > { %v2076_v4 = vcombine.high (!%p411_p7), %v456_v1, %v464_v2  ;;  %v2075_v6 = vcombine.low (!%p411_p7), %v456_v1, %v464_v2  ;;  %v472_v7 = vld [vmem:[%s2581_s29 + $0x80] sm:$0xff] (!%p411_p7)  ;;  %v2078_v9 = vcombine.high (!%p411_p7), %v457_v3, %v465_v5  ;;  %v2077_v10 = vcombine.low (!%p411_p7), %v457_v3, %v465_v5  ;;  %v473_v12 = vld [vmem:[%s2581_s29 + $0x88] sm:$0xff] (!%p411_p7)  ;;  %v466_v1 = vld [vmem:[%s2581_s29 + $0x50] sm:$0xff] (!%p411_p7) }
  0x5b   : > { %v480_v8 = vld [vmem:[%s2581_s29 + $0xc0] sm:$0xff] (!%p411_p7)  ;;  %v481_v13 = vld [vmem:[%s2581_s29 + $0xc8] sm:$0xff] (!%p411_p7)  ;;  %v459_v2 = vld [vmem:[%s2581_s29 + $0x18] sm:$0xff] (!%p411_p7) }
  0x5c   : > { %v2092_v11 = vcombine.high (!%p411_p7), %v472_v7, %v480_v8  ;;  %v488_v14 = vld [vmem:[%s2581_s29 + $0x100] sm:$0xff] (!%p411_p7)  ;;  %1248 = vmatprep.subr.bf16.mxu0 (!%p411_p7), %v2076_v4  ;;  %v2094_v15 = vcombine.high (!%p411_p7), %v473_v12, %v481_v13  ;;  %v489_v17 = vld [vmem:[%s2581_s29 + $0x108] sm:$0xff] (!%p411_p7)  ;;  %1321 = vmatprep.subr.bf16.mxu1 (!%p411_p7), %v2078_v9  ;;  %v2091_v19 = vcombine.low (!%p411_p7), %v472_v7, %v480_v8  ;;  %v467_v3 = vld [vmem:[%s2581_s29 + $0x58] sm:$0xff] (!%p411_p7) }
  0x5d   : > { %v496_v16 = vld [vmem:[%s2581_s29 + $0x140] sm:$0xff]  ;;  %v497_v18 = vld [vmem:[%s2581_s29 + $0x148] sm:$0xff]  ;;  %1249 = vmatpush1.bf16.msra.mxu0 %v2075_v6  ;;  %1322 = vmatpush1.bf16.msra.mxu1 %v2077_v10  ;;  %v2093_v20 = vcombine.low %v473_v12, %v481_v13  ;;  %v2080_v6 = vcombine.high %v458_v63, %v466_v1  ;;  %v2082_v7 = vcombine.high %v459_v2, %v467_v3  ;;  %v474_v8 = vld [vmem:[%s2581_s29 + $0x90] sm:$0xff]  ;;  %s2855_s17 = smov (!%p442_p8, %s2069_s17), 79 }
  0x5e   : > { %1250 = vmatprep.subr.bf16.mxu0 %v2092_v11  ;;  %v2108_v21 = vcombine.high %v488_v14, %v496_v16  ;;  %1323 = vmatprep.subr.bf16.mxu1 %v2094_v15  ;;  %v2110_v22 = vcombine.high %v489_v17, %v497_v18  ;;  %v504_v23 = vld [vmem:[%s2581_s29 + $0x180] sm:$0xff]  ;;  %v505_v25 = vld [vmem:[%s2581_s29 + $0x188] sm:$0xff]  ;;  %v2107_v27 = vcombine.low %v488_v14, %v496_v16  ;;  %v482_v9 = vld [vmem:[%s2581_s29 + $0xd0] sm:$0xff]  ;;  %s2070_s14 = sshll.u32 %s2855_s17, 3 }
  0x5f   : > { %v512_v24 = vld [vmem:[%s2581_s29 + $0x1c0] sm:$0xff]  ;;  %v513_v26 = vld [vmem:[%s2581_s29 + $0x1c8] sm:$0xff]  ;;  %v2109_v28 = vcombine.low %v489_v17, %v497_v18  ;;  %v475_v11 = vld [vmem:[%s2581_s29 + $0x98] sm:$0xff]  ;;  %v2079_v13 = vcombine.low %v458_v63, %v466_v1  ;;  %v2081_v14 = vcombine.low %v459_v2, %v467_v3  ;;  %v2096_v15 = vcombine.high %v474_v8, %v482_v9  ;;  %s2804_s20 = scalar_lea.vmem %s2850_s3, %s2070_s14 }
  0x60   : > { %v2124_v29 = vcombine.high %v504_v23, %v512_v24  ;;  %v2126_v30 = vcombine.high %v505_v25, %v513_v26  ;;  %v520_v31 = vld [vmem:[%s2581_s29 + $0x200] sm:$0xff]  ;;  %v521_v33 = vld [vmem:[%s2581_s29 + $0x208] sm:$0xff]  ;;  %v2123_v35 = vcombine.low %v504_v23, %v512_v24  ;;  %v2125_v36 = vcombine.low %v505_v25, %v513_v26  ;;  %v483_v12 = vld [vmem:[%s2581_s29 + $0xd8] sm:$0xff] }
  0x61   : > { %1251 = vmatpush1.bf16.msra.mxu0 %v2091_v19  ;;  %1324 = vmatpush1.bf16.msra.mxu1 %v2093_v20  ;;  %v528_v32 = vld [vmem:[%s2581_s29 + $0x240] sm:$0xff]  ;;  %v529_v34 = vld [vmem:[%s2581_s29 + $0x248] sm:$0xff]  ;;  %v2098_v16 = vcombine.high %v475_v11, %v483_v12  ;;  %v490_v17 = vld [vmem:[%s2581_s29 + $0x110] sm:$0xff] }
  0x62   : > { %1252 = vmatprep.subr.bf16.mxu0 %v2108_v21  ;;  %1325 = vmatprep.subr.bf16.mxu1 %v2110_v22  ;;  %v2140_v37 = vcombine.high %v520_v31, %v528_v32  ;;  %v2142_v38 = vcombine.high %v521_v33, %v529_v34  ;;  %v536_v39 = vld [vmem:[%s2581_s29 + $0x280] sm:$0xff]  ;;  %v537_v41 = vld [vmem:[%s2581_s29 + $0x288] sm:$0xff]  ;;  %v2139_v43 = vcombine.low %v520_v31, %v528_v32  ;;  %v498_v18 = vld [vmem:[%s2581_s29 + $0x150] sm:$0xff] }
  0x63   : > { %v544_v40 = vld [vmem:[%s2581_s29 + $0x2c0] sm:$0xff]  ;;  %v545_v42 = vld [vmem:[%s2581_s29 + $0x2c8] sm:$0xff]  ;;  %v2141_v44 = vcombine.low %v521_v33, %v529_v34  ;;  %v491_v19 = vld [vmem:[%s2581_s29 + $0x118] sm:$0xff]  ;;  %v2095_v21 = vcombine.low %v474_v8, %v482_v9  ;;  %v2097_v22 = vcombine.low %v475_v11, %v483_v12  ;;  %v2112_v23 = vcombine.high %v490_v17, %v498_v18 }
  0x64   : > { %v2156_v45 = vcombine.high %v536_v39, %v544_v40  ;;  %v2158_v46 = vcombine.high %v537_v41, %v545_v42  ;;  %v552_v47 = vld [vmem:[%s2581_s29 + $0x300] sm:$0xff]  ;;  %v553_v49 = vld [vmem:[%s2581_s29 + $0x308] sm:$0xff]  ;;  %v2155_v51 = vcombine.low %v536_v39, %v544_v40  ;;  %v2157_v52 = vcombine.low %v537_v41, %v545_v42  ;;  %v499_v20 = vld [vmem:[%s2581_s29 + $0x158] sm:$0xff] }
  0x65   : > { %1253 = vmatpush1.bf16.msra.mxu0 %v2107_v27  ;;  %1326 = vmatpush1.bf16.msra.mxu1 %v2109_v28  ;;  %v560_v48 = vld [vmem:[%s2581_s29 + $0x340] sm:$0xff]  ;;  %v561_v50 = vld [vmem:[%s2581_s29 + $0x348] sm:$0xff]  ;;  %v2114_v24 = vcombine.high %v491_v19, %v499_v20  ;;  %v506_v25 = vld [vmem:[%s2581_s29 + $0x190] sm:$0xff]  ;;  %v2113_v31 = vcombine.low %v491_v19, %v499_v20 }
  0x66   : > { %1254 = vmatprep.subr.bf16.mxu0 %v2124_v29  ;;  %1327 = vmatprep.subr.bf16.mxu1 %v2126_v30  ;;  %v2172_v53 = vcombine.high %v552_v47, %v560_v48  ;;  %v2174_v54 = vcombine.high %v553_v49, %v561_v50  ;;  %v568_v55 = vld [vmem:[%s2581_s29 + $0x380] sm:$0xff]  ;;  %v569_v57 = vld [vmem:[%s2581_s29 + $0x388] sm:$0xff]  ;;  %v2171_v59 = vcombine.low %v552_v47, %v560_v48  ;;  %v514_v26 = vld [vmem:[%s2581_s29 + $0x1d0] sm:$0xff] }
  0x67   : > { %v576_v56 = vld [vmem:[%s2581_s29 + $0x3c0] sm:$0xff]  ;;  %v577_v58 = vld [vmem:[%s2581_s29 + $0x3c8] sm:$0xff]  ;;  %v2173_v60 = vcombine.low %v553_v49, %v561_v50  ;;  %v507_v28 = vld [vmem:[%s2581_s29 + $0x198] sm:$0xff]  ;;  %v2111_v30 = vcombine.low %v490_v17, %v498_v18  ;;  %v2128_v32 = vcombine.high %v506_v25, %v514_v26 }
  0x68   : > { %v2188_v61 = vcombine.high %v568_v55, %v576_v56  ;;  %v2190_v62 = vcombine.high %v569_v57, %v577_v58  ;;  %v2187_v4 = vcombine.low %v568_v55, %v576_v56  ;;  %v2189_v5 = vcombine.low %v569_v57, %v577_v58  ;;  %v2624_v10 = vld [vmem:[%s2848_s1] sm:$0xff]   ;;  %v2641_v27 = vld [vmem:[%s2848_s1 + $0x8] sm:$0xff]   ;;  %v515_v29 = vld [vmem:[%s2581_s29 + $0x1d8] sm:$0xff] }
  0x69   : > { %1255 = vmatpush1.bf16.msra.mxu0 %v2123_v35  ;;  %1328 = vmatpush1.bf16.msra.mxu1 %v2125_v36  ;;  %v2130_v33 = vcombine.high %v507_v28, %v515_v29  ;;  %v522_v34 = vld [vmem:[%s2581_s29 + $0x210] sm:$0xff]  ;;  %v523_v36 = vld [vmem:[%s2581_s29 + $0x218] sm:$0xff]  ;;  %v1944_v39 = vld [vmem:[%s2849_s2] sm:$0xff]  ;;  %v2129_v40 = vcombine.low %v507_v28, %v515_v29 }
  0x6a   : > { %1256 = vmatprep.subr.bf16.mxu0 %v2140_v37  ;;  %1329 = vmatprep.subr.bf16.mxu1 %v2142_v38  ;;  %v530_v35 = vld [vmem:[%s2581_s29 + $0x250] sm:$0xff]  ;;  %v531_v37 = vld [vmem:[%s2581_s29 + $0x258] sm:$0xff]  ;;  %v2127_v38 = vcombine.low %v506_v25, %v514_v26  ;;  %v461_v8 = vld [vmem:[%s2581_s29 + $0x28] sm:$0xff] }
  0x6b   : > { %v2144_v41 = vcombine.high %v522_v34, %v530_v35  ;;  %v2146_v42 = vcombine.high %v523_v36, %v531_v37  ;;  %v547_v47 = vld [vmem:[%s2581_s29 + $0x2d8] sm:$0xff]  ;;  %1947 = vperm.xlu0 %2231, %v1944_v39   ;;  %v2143_v48 = vcombine.low %v522_v34, %v530_v35  ;;  %v2145_v49 = vcombine.low %v523_v36, %v531_v37  ;;  %v469_v9 = vld [vmem:[%s2581_s29 + $0x68] sm:$0xff] }
  0x6c   : > { %v563_v55 = vld [vmem:[%s2581_s29 + $0x358] sm:$0xff]  ;;  %v477_v17 = vld [vmem:[%s2581_s29 + $0xa8] sm:$0xff]  ;;  %v2085_v20 = vcombine.low %v461_v8, %v469_v9 }
  0x6d   : > { %1257 = vmatpush1.bf16.msra.mxu0 %v2139_v43  ;;  %1330 = vmatpush1.bf16.msra.mxu1 %v2141_v44  ;;  %v538_v43 = vld [vmem:[%s2581_s29 + $0x290] sm:$0xff]  ;;  %v571_v63 = vld [vmem:[%s2581_s29 + $0x398] sm:$0xff]  ;;  %v485_v18 = vld [vmem:[%s2581_s29 + $0xe8] sm:$0xff] }
  0x6e   : > { %1258 = vmatprep.subr.bf16.mxu0 %v2156_v45  ;;  %1331 = vmatprep.subr.bf16.mxu1 %v2158_v46  ;;  %v546_v44 = vld [vmem:[%s2581_s29 + $0x2d0] sm:$0xff]  ;;  %v539_v46 = vld [vmem:[%s2581_s29 + $0x298] sm:$0xff]  ;;  %v493_v25 = vld [vmem:[%s2581_s29 + $0x128] sm:$0xff]  ;;  %v2101_v29 = vcombine.low %v477_v17, %v485_v18 }
  0x6f   : > { %v2661_v45 = vld [vmem:[%s2848_s1 + $0x10] sm:$0xff]   ;;  %v2160_v50 = vcombine.high %v538_v43, %v546_v44  ;;  %v2159_v56 = vcombine.low %v538_v43, %v546_v44  ;;  %v2161_v57 = vcombine.low %v539_v46, %v547_v47  ;;  %v579_v1 = vld [vmem:[%s2581_s29 + $0x3d8] sm:$0xff]  ;;  %v501_v26 = vld [vmem:[%s2581_s29 + $0x168] sm:$0xff] }
  0x70   : > { %v2193_v12 = vcombine.low %v571_v63, %v579_v1  ;;  %v509_v34 = vld [vmem:[%s2581_s29 + $0x1a8] sm:$0xff]  ;;  %v2117_v37 = vcombine.low %v493_v25, %v501_v26 }
  0x71   : > { %1259 = vmatpush1.bf16.msra.mxu0 %v2155_v51  ;;  %1332 = vmatpush1.bf16.msra.mxu1 %v2157_v52  ;;  %v2162_v51 = vcombine.high %v539_v46, %v547_v47  ;;  %v554_v52 = vld [vmem:[%s2581_s29 + $0x310] sm:$0xff]  ;;  %v517_v35 = vld [vmem:[%s2581_s29 + $0x1e8] sm:$0xff] }
  0x72   : > { %1260 = vmatprep.subr.bf16.mxu0 %v2172_v53  ;;  %1333 = vmatprep.subr.bf16.mxu1 %v2174_v54  ;;  %v562_v53 = vld [vmem:[%s2581_s29 + $0x350] sm:$0xff]  ;;  %v555_v54 = vld [vmem:[%s2581_s29 + $0x318] sm:$0xff]  ;;  %v2134_v39 = vcombine.high %v509_v34, %v517_v35  ;;  %v533_v43 = vld [vmem:[%s2581_s29 + $0x268] sm:$0xff]  ;;  %v2133_v46 = vcombine.low %v509_v34, %v517_v35 }
  0x73   : > { %v2176_v58 = vcombine.high %v554_v52, %v562_v53  ;;  %v2175_v2 = vcombine.low %v554_v52, %v562_v53  ;;  %v2177_v3 = vcombine.low %v555_v54, %v563_v55  ;;  %v549_v52 = vld [vmem:[%s2581_s29 + $0x2e8] sm:$0xff] }
  0x75   : > { %1261 = vmatpush1.bf16.msra.mxu0 %v2171_v59  ;;  %1334 = vmatpush1.bf16.msra.mxu1 %v2173_v60  ;;  %v2178_v59 = vcombine.high %v555_v54, %v563_v55  ;;  %v570_v60 = vld [vmem:[%s2581_s29 + $0x390] sm:$0xff] }
  0x76   : > { %1262 = vmatprep.subr.bf16.mxu0 %v2188_v61  ;;  %1335 = vmatprep.subr.bf16.mxu1 %v2190_v62  ;;  %v578_v61 = vld [vmem:[%s2581_s29 + $0x3d0] sm:$0xff]  ;;  %v2678_v62 = vld [vmem:[%s2848_s1 + $0x18] sm:$0xff]  }
  0x77   : > { %v2191_v11 = vcombine.low %v570_v60, %v578_v61 }
  0x79   : > { %1263 = vmatpush1.bf16.msra.mxu0 %v2187_v4  ;;  %1336 = vmatpush1.bf16.msra.mxu1 %v2189_v5  ;;  %v2192_v4 = vcombine.high %v570_v60, %v578_v61  ;;  %v2194_v5 = vcombine.high %v571_v63, %v579_v1  ;;  %v565_v60 = vld [vmem:[%s2581_s29 + $0x368] sm:$0xff] }
  0x7a   : > { %1394 = vmatprep.subr.bf16.mxu0 %v2080_v6  ;;  %1467 = vmatprep.subr.bf16.mxu1 %v2082_v7  ;;  %v460_v6 = vld [vmem:[%s2581_s29 + $0x20] sm:$0xff] }
  0x7b   : > { %v468_v7 = vld [vmem:[%s2581_s29 + $0x60] sm:$0xff] }
  0x7c   : > { %1281 = vmatmul.mubr.bf16.vlgmr.msra.gmra.mrb[0].mxu0 %v2624_v10  ;;  %1354 = vmatmul.mubr.bf16.vlgmr.msra.gmra.mrb[0].mxu1 %v2624_v10  ;;  %v2083_v19 = vcombine.low %v460_v6, %v468_v7 }
  0x7d   : > { %1395 = vmatpush1.bf16.msra.mxu0 %v2079_v13  ;;  %1468 = vmatpush1.bf16.msra.mxu1 %v2081_v14  ;;  %v2084_v13 = vcombine.high %v460_v6, %v468_v7  ;;  %v2086_v14 = vcombine.high %v461_v8, %v469_v9  ;;  %v581_v6 = vld [vmem:[%s2581_s29 + $0x3e8] sm:$0xff] }
  0x7e   : > { %1396 = vmatprep.subr.bf16.mxu0 %v2096_v15  ;;  %1469 = vmatprep.subr.bf16.mxu1 %v2098_v16  ;;  %v476_v15 = vld [vmem:[%s2581_s29 + $0xa0] sm:$0xff] }
  0x7f   : > { %1290 = vmatprep.mubr.bf16.mxu0 %v2260_v0  ;;  %1363 = vmatprep.mubr.bf16.mxu1 %v2260_v0  ;;  %v484_v16 = vld [vmem:[%s2581_s29 + $0xe0] sm:$0xff] }
  0x80   : > { %v2099_v28 = vcombine.low %v476_v15, %v484_v16 }
  0x81   : > { %1397 = vmatpush1.bf16.msra.mxu0 %v2095_v21  ;;  %1470 = vmatpush1.bf16.msra.mxu1 %v2097_v22  ;;  %v2100_v21 = vcombine.high %v476_v15, %v484_v16  ;;  %v2102_v22 = vcombine.high %v477_v17, %v485_v18  ;;  %v471_v15 = vld [vmem:[%s2581_s29 + $0x78] sm:$0xff] }
  0x82   : > { %1398 = vmatprep.subr.bf16.mxu0 %v2112_v23  ;;  %1471 = vmatprep.subr.bf16.mxu1 %v2114_v24  ;;  %v492_v23 = vld [vmem:[%s2581_s29 + $0x120] sm:$0xff] }
  0x83   : > { %v500_v24 = vld [vmem:[%s2581_s29 + $0x160] sm:$0xff] }
  0x84   : > { %1291 = vmatmul.mubr.bf16.gmra.mrb[4].mxu0 %v2641_v27  ;;  %1364 = vmatmul.mubr.bf16.gmra.mrb[4].mxu1 %v2641_v27  ;;  %v2115_v36 = vcombine.low %v492_v23, %v500_v24 }
  0x85   : > { %1399 = vmatpush1.bf16.msra.mxu0 %v2111_v30  ;;  %1472 = vmatpush1.bf16.msra.mxu1 %v2113_v31  ;;  %v2116_v30 = vcombine.high %v492_v23, %v500_v24  ;;  %v2118_v31 = vcombine.high %v493_v25, %v501_v26  ;;  %v487_v23 = vld [vmem:[%s2581_s29 + $0xf8] sm:$0xff] }
  0x86   : > { %1400 = vmatprep.subr.bf16.mxu0 %v2128_v32  ;;  %1473 = vmatprep.subr.bf16.mxu1 %v2130_v33  ;;  %v508_v32 = vld [vmem:[%s2581_s29 + $0x1a0] sm:$0xff] }
  0x87   : > { %1300 = vmatprep.mubr.bf16.mxu0 %v2260_v0  ;;  %1373 = vmatprep.mubr.bf16.mxu1 %v2260_v0  ;;  %v516_v33 = vld [vmem:[%s2581_s29 + $0x1e0] sm:$0xff] }
  0x88   : > { %v2131_v44 = vcombine.low %v508_v32, %v516_v33 }
  0x89   : > { %1401 = vmatpush1.bf16.msra.mxu0 %v2127_v38  ;;  %1474 = vmatpush1.bf16.msra.mxu1 %v2129_v40  ;;  %v2132_v38 = vcombine.high %v508_v32, %v516_v33  ;;  %v524_v40 = vld [vmem:[%s2581_s29 + $0x220] sm:$0xff]  ;;  %v503_v32 = vld [vmem:[%s2581_s29 + $0x178] sm:$0xff] }
  0x8a   : > { %1402 = vmatprep.subr.bf16.mxu0 %v2144_v41  ;;  %1475 = vmatprep.subr.bf16.mxu1 %v2146_v42  ;;  %v532_v41 = vld [vmem:[%s2581_s29 + $0x260] sm:$0xff]  ;;  %v525_v42 = vld [vmem:[%s2581_s29 + $0x228] sm:$0xff] }
  0x8b   : > { %v2148_v47 = vcombine.high %v524_v40, %v532_v41  ;;  %v2147_v53 = vcombine.low %v524_v40, %v532_v41  ;;  %v2149_v54 = vcombine.low %v525_v42, %v533_v43  ;;  %v519_v40 = vld [vmem:[%s2581_s29 + $0x1f8] sm:$0xff] }
  0x8c   : > { %1301 = vmatmul.mubr.bf16.gmra.mrb[8].mxu0 %v2661_v45  ;;  %1374 = vmatmul.mubr.bf16.gmra.mrb[8].mxu1 %v2661_v45 }
  0x8d   : > { %1403 = vmatpush1.bf16.msra.mxu0 %v2143_v48  ;;  %1476 = vmatpush1.bf16.msra.mxu1 %v2145_v49  ;;  %v2150_v48 = vcombine.high %v525_v42, %v533_v43  ;;  %v540_v49 = vld [vmem:[%s2581_s29 + $0x2a0] sm:$0xff] }
  0x8e   : > { %1404 = vmatprep.subr.bf16.mxu0 %v2160_v50  ;;  %1477 = vmatprep.subr.bf16.mxu1 %v2162_v51  ;;  %v548_v50 = vld [vmem:[%s2581_s29 + $0x2e0] sm:$0xff]  ;;  %v541_v51 = vld [vmem:[%s2581_s29 + $0x2a8] sm:$0xff] }
  0x8f   : > { %1310 = vmatprep.mubr.bf16.mxu0 %v2260_v0  ;;  %1383 = vmatprep.mubr.bf16.mxu1 %v2260_v0  ;;  %v2164_v55 = vcombine.high %v540_v49, %v548_v50  ;;  %v2163_v61 = vcombine.low %v540_v49, %v548_v50  ;;  %v2165_v63 = vcombine.low %v541_v51, %v549_v52  ;;  %v535_v49 = vld [vmem:[%s2581_s29 + $0x278] sm:$0xff] }
  0x91   : > { %1405 = vmatpush1.bf16.msra.mxu0 %v2159_v56  ;;  %1478 = vmatpush1.bf16.msra.mxu1 %v2161_v57  ;;  %v2166_v56 = vcombine.high %v541_v51, %v549_v52  ;;  %v556_v57 = vld [vmem:[%s2581_s29 + $0x320] sm:$0xff] }
  0x92   : > { %1406 = vmatprep.subr.bf16.mxu0 %v2176_v58  ;;  %1479 = vmatprep.subr.bf16.mxu1 %v2178_v59  ;;  %v564_v58 = vld [vmem:[%s2581_s29 + $0x360] sm:$0xff]  ;;  %v557_v59 = vld [vmem:[%s2581_s29 + $0x328] sm:$0xff] }
  0x93   : > { %v2180_v1 = vcombine.high %v556_v57, %v564_v58  ;;  %v2179_v7 = vcombine.low %v556_v57, %v564_v58  ;;  %v2181_v8 = vcombine.low %v557_v59, %v565_v60  ;;  %v551_v57 = vld [vmem:[%s2581_s29 + $0x2f8] sm:$0xff] }
  0x94   : > { %1311 = vmatmul.mubr.bf16.gmra.mrb[12].mxu0 %v2678_v62  ;;  %1384 = vmatmul.mubr.bf16.gmra.mrb[12].mxu1 %v2678_v62 }
  0x95   : > { %1407 = vmatpush1.bf16.msra.mxu0 %v2175_v2  ;;  %1480 = vmatpush1.bf16.msra.mxu1 %v2177_v3  ;;  %v2182_v2 = vcombine.high %v557_v59, %v565_v60  ;;  %v572_v3 = vld [vmem:[%s2581_s29 + $0x3a0] sm:$0xff] }
  0x96   : > { %1408 = vmatprep.subr.bf16.mxu0 %v2192_v4  ;;  %1481 = vmatprep.subr.bf16.mxu1 %v2194_v5  ;;  %v580_v4 = vld [vmem:[%s2581_s29 + $0x3e0] sm:$0xff]  ;;  %v573_v5 = vld [vmem:[%s2581_s29 + $0x3a8] sm:$0xff] }
  0x97   : > { %1426 = vmatprep.mubr.bf16.mxu0 %v2260_v0  ;;  %1499 = vmatprep.mubr.bf16.mxu1 %v2260_v0  ;;  %v2196_v9 = vcombine.high %v572_v3, %v580_v4  ;;  %v2195_v16 = vcombine.low %v572_v3, %v580_v4  ;;  %v2197_v17 = vcombine.low %v573_v5, %v581_v6  ;;  %v567_v3 = vld [vmem:[%s2581_s29 + $0x378] sm:$0xff] }
  0x99   : > { %1409 = vmatpush1.bf16.msra.mxu0 %v2191_v11  ;;  %1482 = vmatpush1.bf16.msra.mxu1 %v2193_v12  ;;  %v2198_v11 = vcombine.high %v573_v5, %v581_v6  ;;  %v462_v12 = vld [vmem:[%s2581_s29 + $0x30] sm:$0xff] }
  0x9a   : > { %1540 = vmatprep.subr.bf16.mxu0 %v2084_v13  ;;  %1613 = vmatprep.subr.bf16.mxu1 %v2086_v14  ;;  %v470_v13 = vld [vmem:[%s2581_s29 + $0x70] sm:$0xff]  ;;  %v463_v14 = vld [vmem:[%s2581_s29 + $0x38] sm:$0xff] }
  0x9b   : > { %v2088_v18 = vcombine.high %v462_v12, %v470_v13  ;;  %v2087_v24 = vcombine.low %v462_v12, %v470_v13  ;;  %v2089_v25 = vcombine.low %v463_v14, %v471_v15  ;;  %v583_v12 = vld [vmem:[%s2581_s29 + $0x3f8] sm:$0xff] }
  0x9c   : > { %1427 = vmatmul.mubr.bf16.vlgmr.msra.gmra.mrb[16].mxu0 %v2624_v10  ;;  %1500 = vmatmul.mubr.bf16.vlgmr.msra.gmra.mrb[16].mxu1 %v2624_v10 }
  0x9d   : > { %1541 = vmatpush1.bf16.msra.mxu0 %v2083_v19  ;;  %1614 = vmatpush1.bf16.msra.mxu1 %v2085_v20  ;;  %v2090_v19 = vcombine.high %v463_v14, %v471_v15  ;;  %v478_v20 = vld [vmem:[%s2581_s29 + $0xb0] sm:$0xff] }
  0x9e   : > { %1542 = vmatprep.subr.bf16.mxu0 %v2100_v21  ;;  %1615 = vmatprep.subr.bf16.mxu1 %v2102_v22  ;;  %v486_v21 = vld [vmem:[%s2581_s29 + $0xf0] sm:$0xff]  ;;  %v479_v22 = vld [vmem:[%s2581_s29 + $0xb8] sm:$0xff] }
  0x9f   : > { %1436 = vmatprep.mubr.bf16.mxu0 %v2260_v0  ;;  %1509 = vmatprep.mubr.bf16.mxu1 %v2260_v0  ;;  %v2104_v26 = vcombine.high %v478_v20, %v486_v21  ;;  %v2103_v33 = vcombine.low %v478_v20, %v486_v21  ;;  %v2105_v34 = vcombine.low %v479_v22, %v487_v23 }
  0xa1   : > { %1543 = vmatpush1.bf16.msra.mxu0 %v2099_v28  ;;  %1616 = vmatpush1.bf16.msra.mxu1 %v2101_v29  ;;  %v2106_v28 = vcombine.high %v479_v22, %v487_v23  ;;  %v494_v29 = vld [vmem:[%s2581_s29 + $0x130] sm:$0xff] }
  0xa2   : > { %1544 = vmatprep.subr.bf16.mxu0 %v2116_v30  ;;  %1617 = vmatprep.subr.bf16.mxu1 %v2118_v31  ;;  %v502_v30 = vld [vmem:[%s2581_s29 + $0x170] sm:$0xff]  ;;  %v495_v31 = vld [vmem:[%s2581_s29 + $0x138] sm:$0xff] }
  0xa3   : > { %v2120_v35 = vcombine.high %v494_v29, %v502_v30  ;;  %v2119_v41 = vcombine.low %v494_v29, %v502_v30  ;;  %v2121_v42 = vcombine.low %v495_v31, %v503_v32 }
  0xa4   : > { %1437 = vmatmul.mubr.bf16.gmra.mrb[20].mxu0 %v2641_v27  ;;  %1510 = vmatmul.mubr.bf16.gmra.mrb[20].mxu1 %v2641_v27 }
  0xa5   : > { %1545 = vmatpush1.bf16.msra.mxu0 %v2115_v36  ;;  %1618 = vmatpush1.bf16.msra.mxu1 %v2117_v37  ;;  %v2122_v36 = vcombine.high %v495_v31, %v503_v32  ;;  %v510_v37 = vld [vmem:[%s2581_s29 + $0x1b0] sm:$0xff] }
  0xa6   : > { %1546 = vmatprep.subr.bf16.mxu0 %v2132_v38  ;;  %1619 = vmatprep.subr.bf16.mxu1 %v2134_v39  ;;  %v518_v38 = vld [vmem:[%s2581_s29 + $0x1f0] sm:$0xff]  ;;  %v511_v39 = vld [vmem:[%s2581_s29 + $0x1b8] sm:$0xff] }
  0xa7   : > { %1446 = vmatprep.mubr.bf16.mxu0 %v2260_v0  ;;  %1519 = vmatprep.mubr.bf16.mxu1 %v2260_v0  ;;  %v2136_v43 = vcombine.high %v510_v37, %v518_v38  ;;  %v2135_v50 = vcombine.low %v510_v37, %v518_v38  ;;  %v2137_v51 = vcombine.low %v511_v39, %v519_v40 }
  0xa9   : > { %1547 = vmatpush1.bf16.msra.mxu0 %v2131_v44  ;;  %1620 = vmatpush1.bf16.msra.mxu1 %v2133_v46  ;;  %v2138_v44 = vcombine.high %v511_v39, %v519_v40  ;;  %v526_v46 = vld [vmem:[%s2581_s29 + $0x230] sm:$0xff] }
  0xaa   : > { %1548 = vmatprep.subr.bf16.mxu0 %v2148_v47  ;;  %1621 = vmatprep.subr.bf16.mxu1 %v2150_v48  ;;  %v534_v47 = vld [vmem:[%s2581_s29 + $0x270] sm:$0xff]  ;;  %v527_v48 = vld [vmem:[%s2581_s29 + $0x238] sm:$0xff] }
  0xab   : > { %v2152_v52 = vcombine.high %v526_v46, %v534_v47  ;;  %v2151_v58 = vcombine.low %v526_v46, %v534_v47  ;;  %v2153_v59 = vcombine.low %v527_v48, %v535_v49 }
  0xac   : > { %1447 = vmatmul.mubr.bf16.gmra.mrb[24].mxu0 %v2661_v45  ;;  %1520 = vmatmul.mubr.bf16.gmra.mrb[24].mxu1 %v2661_v45 }
  0xad   : > { %1549 = vmatpush1.bf16.msra.mxu0 %v2147_v53  ;;  %1622 = vmatpush1.bf16.msra.mxu1 %v2149_v54  ;;  %v2154_v53 = vcombine.high %v527_v48, %v535_v49  ;;  %v542_v54 = vld [vmem:[%s2581_s29 + $0x2b0] sm:$0xff] }
  0xae   : > { %1550 = vmatprep.subr.bf16.mxu0 %v2164_v55  ;;  %1623 = vmatprep.subr.bf16.mxu1 %v2166_v56  ;;  %v550_v55 = vld [vmem:[%s2581_s29 + $0x2f0] sm:$0xff]  ;;  %v543_v56 = vld [vmem:[%s2581_s29 + $0x2b8] sm:$0xff] }
  0xaf   : > { %1456 = vmatprep.mubr.bf16.mxu0 %v2260_v0  ;;  %1529 = vmatprep.mubr.bf16.mxu1 %v2260_v0  ;;  %v2168_v60 = vcombine.high %v542_v54, %v550_v55  ;;  %v2167_v4 = vcombine.low %v542_v54, %v550_v55  ;;  %v2169_v5 = vcombine.low %v543_v56, %v551_v57 }
  0xb1   : > { %1551 = vmatpush1.bf16.msra.mxu0 %v2163_v61  ;;  %1624 = vmatpush1.bf16.msra.mxu1 %v2165_v63  ;;  %v2170_v61 = vcombine.high %v543_v56, %v551_v57  ;;  %v558_v63 = vld [vmem:[%s2581_s29 + $0x330] sm:$0xff] }
  0xb2   : > { %1552 = vmatprep.subr.bf16.mxu0 %v2180_v1  ;;  %1625 = vmatprep.subr.bf16.mxu1 %v2182_v2  ;;  %v566_v1 = vld [vmem:[%s2581_s29 + $0x370] sm:$0xff]  ;;  %v559_v2 = vld [vmem:[%s2581_s29 + $0x338] sm:$0xff] }
  0xb3   : > { %v2184_v6 = vcombine.high %v558_v63, %v566_v1  ;;  %v2183_v13 = vcombine.low %v558_v63, %v566_v1  ;;  %v2185_v14 = vcombine.low %v559_v2, %v567_v3 }
  0xb4   : > { %1457 = vmatmul.mubr.bf16.gmra.mrb[28].mxu0 %v2678_v62  ;;  %1530 = vmatmul.mubr.bf16.gmra.mrb[28].mxu1 %v2678_v62 }
  0xb5   : > { %1553 = vmatpush1.bf16.msra.mxu0 %v2179_v7  ;;  %1626 = vmatpush1.bf16.msra.mxu1 %v2181_v8  ;;  %v2186_v7 = vcombine.high %v559_v2, %v567_v3  ;;  %v574_v8 = vld [vmem:[%s2581_s29 + $0x3b0] sm:$0xff] }
  0xb6   : > { %1554 = vmatprep.subr.bf16.mxu0 %v2196_v9  ;;  %1627 = vmatprep.subr.bf16.mxu1 %v2198_v11  ;;  %v582_v9 = vld [vmem:[%s2581_s29 + $0x3f0] sm:$0xff]  ;;  %v575_v11 = vld [vmem:[%s2581_s29 + $0x3b8] sm:$0xff] }
  0xb7   : > { %1572 = vmatprep.mubr.bf16.mxu0 %v2260_v0  ;;  %1645 = vmatprep.mubr.bf16.mxu1 %v2260_v0  ;;  %v2200_v15 = vcombine.high %v574_v8, %v582_v9 }
  0xb9   : > { %1555 = vmatpush1.bf16.msra.mxu0 %v2195_v16  ;;  %1628 = vmatpush1.bf16.msra.mxu1 %v2197_v17  ;;  %v2202_v16 = vcombine.high %v575_v11, %v583_v12  ;;  %v2199_v17 = vcombine.low %v574_v8, %v582_v9 }
  0xba   : > { %1686 = vmatprep.subr.bf16.mxu0 %v2088_v18  ;;  %1759 = vmatprep.subr.bf16.mxu1 %v2090_v19  ;;  %v2201_v18 = vcombine.low %v575_v11, %v583_v12 }
  0xbc   : > { %1573 = vmatmul.mubr.bf16.vlgmr.msra.gmra.mrb[32].mxu0 %v2624_v10  ;;  %1646 = vmatmul.mubr.bf16.vlgmr.msra.gmra.mrb[32].mxu1 %v2624_v10 }
  0xbd   : > { %1687 = vmatpush1.bf16.msra.mxu0 %v2087_v24  ;;  %1760 = vmatpush1.bf16.msra.mxu1 %v2089_v25 }
  0xbe   : > { %1688 = vmatprep.subr.bf16.mxu0 %v2104_v26  ;;  %1761 = vmatprep.subr.bf16.mxu1 %v2106_v28 }
  0xbf   : > { %1582 = vmatprep.mubr.bf16.mxu0 %v2260_v0  ;;  %1655 = vmatprep.mubr.bf16.mxu1 %v2260_v0 }
  0xc1   : > { %1689 = vmatpush1.bf16.msra.mxu0 %v2103_v33  ;;  %1762 = vmatpush1.bf16.msra.mxu1 %v2105_v34 }
  0xc2   : > { %1690 = vmatprep.subr.bf16.mxu0 %v2120_v35  ;;  %1763 = vmatprep.subr.bf16.mxu1 %v2122_v36 }
  0xc4   : > { %1583 = vmatmul.mubr.bf16.gmra.mrb[36].mxu0 %v2641_v27  ;;  %1656 = vmatmul.mubr.bf16.gmra.mrb[36].mxu1 %v2641_v27 }
  0xc5   : > { %1691 = vmatpush1.bf16.msra.mxu0 %v2119_v41  ;;  %1764 = vmatpush1.bf16.msra.mxu1 %v2121_v42 }
  0xc6   : > { %1692 = vmatprep.subr.bf16.mxu0 %v2136_v43  ;;  %1765 = vmatprep.subr.bf16.mxu1 %v2138_v44 }
  0xc7   : > { %1592 = vmatprep.mubr.bf16.mxu0 %v2260_v0  ;;  %1665 = vmatprep.mubr.bf16.mxu1 %v2260_v0 }
  0xc9   : > { %1693 = vmatpush1.bf16.msra.mxu0 %v2135_v50  ;;  %1766 = vmatpush1.bf16.msra.mxu1 %v2137_v51 }
  0xca   : > { %1694 = vmatprep.subr.bf16.mxu0 %v2152_v52  ;;  %1767 = vmatprep.subr.bf16.mxu1 %v2154_v53 }
  0xcc   : > { %1593 = vmatmul.mubr.bf16.gmra.mrb[40].mxu0 %v2661_v45  ;;  %1666 = vmatmul.mubr.bf16.gmra.mrb[40].mxu1 %v2661_v45 }
  0xcd   : > { %1695 = vmatpush1.bf16.msra.mxu0 %v2151_v58  ;;  %1768 = vmatpush1.bf16.msra.mxu1 %v2153_v59 }
  0xce   : > { %1696 = vmatprep.subr.bf16.mxu0 %v2168_v60  ;;  %1769 = vmatprep.subr.bf16.mxu1 %v2170_v61 }
  0xcf   : > { %1602 = vmatprep.mubr.bf16.mxu0 %v2260_v0  ;;  %1675 = vmatprep.mubr.bf16.mxu1 %v2260_v0 }
  0xd1   : > { %1697 = vmatpush1.bf16.msra.mxu0 %v2167_v4  ;;  %1770 = vmatpush1.bf16.msra.mxu1 %v2169_v5 }
  0xd2   : > { %1698 = vmatprep.subr.bf16.mxu0 %v2184_v6  ;;  %1771 = vmatprep.subr.bf16.mxu1 %v2186_v7 }
  0xd4   : > { %1603 = vmatmul.mubr.bf16.gmra.mrb[44].mxu0 %v2678_v62  ;;  %1676 = vmatmul.mubr.bf16.gmra.mrb[44].mxu1 %v2678_v62 }
  0xd5   : > { %1699 = vmatpush1.bf16.msra.mxu0 %v2183_v13  ;;  %1772 = vmatpush1.bf16.msra.mxu1 %v2185_v14 }
  0xd6   : > { %1700 = vmatprep.subr.bf16.mxu0 %v2200_v15  ;;  %1773 = vmatprep.subr.bf16.mxu1 %v2202_v16 }
  0xd7   : > { %1718 = vmatprep.mubr.bf16.mxu0 %v2260_v0  ;;  %1791 = vmatprep.mubr.bf16.mxu1 %v2260_v0 }
  0xd9   : > { %1701 = vmatpush1.bf16.msra.mxu0 %v2199_v17  ;;  %1774 = vmatpush1.bf16.msra.mxu1 %v2201_v18 }
  0xdc   : > { %1719 = vmatmul.mubr.bf16.vlgmr.msra.gmra.mrb[48].mxu0 %v2624_v10  ;;  %1792 = vmatmul.mubr.bf16.vlgmr.msra.gmra.mrb[48].mxu1 %v2624_v10 }
  0xdd   : > { %1728 = vmatprep.mubr.bf16.mxu0 %v2260_v0  ;;  %1801 = vmatprep.mubr.bf16.mxu1 %v2260_v0 }
  0xe4   : > { %1729 = vmatmul.mubr.bf16.gmra.mrb[52].mxu0 %v2641_v27  ;;  %1802 = vmatmul.mubr.bf16.gmra.mrb[52].mxu1 %v2641_v27 }
  0xe5   : > { %1738 = vmatprep.mubr.bf16.mxu0 %v2260_v0  ;;  %1811 = vmatprep.mubr.bf16.mxu1 %v2260_v0 }
  0xea   : > { %v2798_v61 = vpop.permute.xlu0 %1947 }
  0xec   : > { %1739 = vmatmul.mubr.bf16.gmra.mrb[56].mxu0 %v2661_v45  ;;  %1812 = vmatmul.mubr.bf16.gmra.mrb[56].mxu1 %v2661_v45 }
  0xed   : > { %1748 = vmatprep.mubr.bf16.mxu0 %v2260_v0  ;;  %1821 = vmatprep.mubr.bf16.mxu1 %v2260_v0 }
  0xf4   : > { %1749 = vmatmul.mubr.bf16.gmra.mrb[60].mxu0 %v2678_v62  ;;  %1822 = vmatmul.mubr.bf16.gmra.mrb[60].mxu1 %v2678_v62 }
 0x14f   : > { %v1282_v10 = vpop.f32.mrb[0].mxu0  ;;  %v1355_v19 = vpop.f32.mrb[0].mxu1 }
 0x150   : > { %v1284_v20 = vpop.f32.mrb[1].mxu0  ;;  %v1357_v27 = vpop.f32.mrb[1].mxu1 }
 0x151   : > { %v1286_v21 = vpop.f32.mrb[2].mxu0  ;;  %v1359_v23 = vpop.f32.mrb[2].mxu1 }
 0x152   : > { %v1832_v22 = vmax.f32 %v1282_v10, %v1286_v21  ;;  %v1288_v24 = vpop.f32.mrb[3].mxu0  ;;  %v1834_v25 = vmax.f32 %v1355_v19, %v1359_v23  ;;  %v1361_v28 = vpop.f32.mrb[3].mxu1 }
 0x153   : > { %v1833_v26 = vmax.f32 %v1284_v20, %v1288_v24  ;;  %v1835_v45 = vmax.f32 %v1357_v27, %v1361_v28 }
 0x157   : > { %v1292_v29 = vpop.f32.mrb[4].mxu0  ;;  %v1365_v0 = vpop.f32.mrb[4].mxu1 }
 0x158   : > { %v1848_v30 = vmax.f32 %v1832_v22, %v1292_v29  ;;  %v1294_v31 = vpop.f32.mrb[5].mxu0  ;;  %v1850_v32 = vmax.f32 %v1834_v25, %v1365_v0  ;;  %v1367_v62 = vpop.f32.mrb[5].mxu1 }
 0x159   : > { %v1849_v33 = vmax.f32 %v1833_v26, %v1294_v31  ;;  %v1296_v34 = vpop.f32.mrb[6].mxu0  ;;  %v1851_v35 = vmax.f32 %v1835_v45, %v1367_v62  ;;  %v1369_v37 = vpop.f32.mrb[6].mxu1 }
 0x15a   : > { %v1864_v36 = vmax.f32 %v1848_v30, %v1296_v34  ;;  %v1298_v38 = vpop.f32.mrb[7].mxu0  ;;  %v1866_v39 = vmax.f32 %v1850_v32, %v1369_v37  ;;  %v1371_v41 = vpop.f32.mrb[7].mxu1 }
 0x15b   : > { %v1865_v40 = vmax.f32 %v1849_v33, %v1298_v38  ;;  %v1867_v42 = vmax.f32 %v1851_v35, %v1371_v41 }
 0x15f   : > { %v1302_v43 = vpop.f32.mrb[8].mxu0  ;;  %v1375_v46 = vpop.f32.mrb[8].mxu1 }
 0x160   : > { %v1880_v44 = vmax.f32 %v1864_v36, %v1302_v43  ;;  %v1304_v47 = vpop.f32.mrb[9].mxu0  ;;  %v1882_v48 = vmax.f32 %v1866_v39, %v1375_v46  ;;  %v1377_v50 = vpop.f32.mrb[9].mxu1 }
 0x161   : > { %v1881_v49 = vmax.f32 %v1865_v40, %v1304_v47  ;;  %v1306_v51 = vpop.f32.mrb[10].mxu0  ;;  %v1883_v52 = vmax.f32 %v1867_v42, %v1377_v50  ;;  %v1379_v54 = vpop.f32.mrb[10].mxu1 }
 0x162   : > { %v1896_v53 = vmax.f32 %v1880_v44, %v1306_v51  ;;  %v1308_v55 = vpop.f32.mrb[11].mxu0  ;;  %v1898_v56 = vmax.f32 %v1882_v48, %v1379_v54  ;;  %v1381_v58 = vpop.f32.mrb[11].mxu1 }
 0x163   : > { %v1897_v57 = vmax.f32 %v1881_v49, %v1308_v55  ;;  %v1899_v59 = vmax.f32 %v1883_v52, %v1381_v58 }
 0x167   : > { %v1312_v60 = vpop.f32.mrb[12].mxu0  ;;  %v1385_v1 = vpop.f32.mrb[12].mxu1 }
 0x168   : > { %v1912_v63 = vmax.f32 %v1896_v53, %v1312_v60  ;;  %v1314_v2 = vpop.f32.mrb[13].mxu0  ;;  %v1914_v3 = vmax.f32 %v1898_v56, %v1385_v1  ;;  %v1387_v5 = vpop.f32.mrb[13].mxu1 }
 0x169   : > { %v1913_v4 = vmax.f32 %v1897_v57, %v1314_v2  ;;  %v1316_v6 = vpop.f32.mrb[14].mxu0  ;;  %v1915_v7 = vmax.f32 %v1899_v59, %v1387_v5  ;;  %v1389_v9 = vpop.f32.mrb[14].mxu1 }
 0x16a   : > { %v1928_v8 = vmax.f32 %v1912_v63, %v1316_v6  ;;  %v1318_v11 = vpop.f32.mrb[15].mxu0  ;;  %v1930_v12 = vmax.f32 %v1914_v3, %v1389_v9  ;;  %v1391_v14 = vpop.f32.mrb[15].mxu1 }
 0x16b   : > { %v1929_v13 = vmax.f32 %v1913_v4, %v1318_v11  ;;  %v1931_v15 = vmax.f32 %v1915_v7, %v1391_v14 }
 0x16c   : > { %v1950_v16 = vadd.f32 %v2798_v61, %v1928_v8  ;;  %v1952_v18 = vadd.f32 %v2798_v61, %v1930_v12 }
 0x16d   : > { %v1951_v17 = vadd.f32 %v2798_v61, %v1929_v13  ;;  %v1953_v10 = vadd.f32 %v2798_v61, %v1931_v15 }
 0x16e   : > { %v1966_v19 = vmax.f32 %v1950_v16, 0.0  ;;  %v1968_v27 = vmax.f32 %v1952_v18, 0.0 }
 0x16f   : > { %v1967_v20 = vmax.f32 %v1951_v17, 0.0  ;;  %v1428_v21 = vpop.f32.mrb[16].mxu0  ;;  %v1969_v22 = vmax.f32 %v1953_v10, 0.0  ;;  %v1501_v23 = vpop.f32.mrb[16].mxu1 }
 0x170   : > { %1982 = vst [vmem:[%s2804_s20] sm:$0xff] %v1966_v19  ;;  %v1430_v24 = vpop.f32.mrb[17].mxu0  ;;  %1984 = vst [vmem:[%s2804_s20 + $0x10] sm:$0xff] %v1968_v27  ;;  %v1503_v25 = vpop.f32.mrb[17].mxu1 }
 0x171   : > { %1983 = vst [vmem:[%s2804_s20 + $0x8] sm:$0xff] %v1967_v20  ;;  %v1432_v26 = vpop.f32.mrb[18].mxu0  ;;  %1985 = vst [vmem:[%s2804_s20 + $0x18] sm:$0xff] %v1969_v22  ;;  %v1505_v45 = vpop.f32.mrb[18].mxu1 }
 0x172   : > { %v1836_v28 = vmax.f32 %v1428_v21, %v1432_v26  ;;  %v1434_v29 = vpop.f32.mrb[19].mxu0  ;;  %v1838_v30 = vmax.f32 %v1501_v23, %v1505_v45  ;;  %v1507_v31 = vpop.f32.mrb[19].mxu1 }
 0x173   : > { %v1837_v0 = vmax.f32 %v1430_v24, %v1434_v29  ;;  %v1839_v32 = vmax.f32 %v1503_v25, %v1507_v31 }
 0x177   : > { %v1438_v33 = vpop.f32.mrb[20].mxu0  ;;  %v1511_v34 = vpop.f32.mrb[20].mxu1 }
 0x178   : > { %v1852_v62 = vmax.f32 %v1836_v28, %v1438_v33  ;;  %v1440_v35 = vpop.f32.mrb[21].mxu0  ;;  %v1854_v36 = vmax.f32 %v1838_v30, %v1511_v34  ;;  %v1513_v38 = vpop.f32.mrb[21].mxu1 }
 0x179   : > { %v1853_v37 = vmax.f32 %v1837_v0, %v1440_v35  ;;  %v1442_v39 = vpop.f32.mrb[22].mxu0  ;;  %v1855_v40 = vmax.f32 %v1839_v32, %v1513_v38  ;;  %v1515_v42 = vpop.f32.mrb[22].mxu1 }
 0x17a   : > { %v1868_v41 = vmax.f32 %v1852_v62, %v1442_v39  ;;  %v1444_v43 = vpop.f32.mrb[23].mxu0  ;;  %v1870_v44 = vmax.f32 %v1854_v36, %v1515_v42  ;;  %v1517_v47 = vpop.f32.mrb[23].mxu1 }
 0x17b   : > { %v1869_v46 = vmax.f32 %v1853_v37, %v1444_v43  ;;  %v1871_v48 = vmax.f32 %v1855_v40, %v1517_v47 }
 0x17f   : > { %v1448_v49 = vpop.f32.mrb[24].mxu0  ;;  %v1521_v51 = vpop.f32.mrb[24].mxu1 }
 0x180   : > { %v1884_v50 = vmax.f32 %v1868_v41, %v1448_v49  ;;  %v1450_v52 = vpop.f32.mrb[25].mxu0  ;;  %v1886_v53 = vmax.f32 %v1870_v44, %v1521_v51  ;;  %v1523_v55 = vpop.f32.mrb[25].mxu1 }
 0x181   : > { %v1885_v54 = vmax.f32 %v1869_v46, %v1450_v52  ;;  %v1452_v56 = vpop.f32.mrb[26].mxu0  ;;  %v1887_v57 = vmax.f32 %v1871_v48, %v1523_v55  ;;  %v1525_v59 = vpop.f32.mrb[26].mxu1 }
 0x182   : > { %v1900_v58 = vmax.f32 %v1884_v50, %v1452_v56  ;;  %v1454_v60 = vpop.f32.mrb[27].mxu0  ;;  %v1902_v63 = vmax.f32 %v1886_v53, %v1525_v59  ;;  %v1527_v2 = vpop.f32.mrb[27].mxu1 }
 0x183   : > { %v1901_v1 = vmax.f32 %v1885_v54, %v1454_v60  ;;  %v1903_v3 = vmax.f32 %v1887_v57, %v1527_v2 }
 0x187   : > { %v1458_v4 = vpop.f32.mrb[28].mxu0  ;;  %v1531_v6 = vpop.f32.mrb[28].mxu1 }
 0x188   : > { %v1916_v5 = vmax.f32 %v1900_v58, %v1458_v4  ;;  %v1460_v7 = vpop.f32.mrb[29].mxu0  ;;  %v1918_v8 = vmax.f32 %v1902_v63, %v1531_v6  ;;  %v1533_v11 = vpop.f32.mrb[29].mxu1 }
 0x189   : > { %v1917_v9 = vmax.f32 %v1901_v1, %v1460_v7  ;;  %v1462_v12 = vpop.f32.mrb[30].mxu0  ;;  %v1919_v13 = vmax.f32 %v1903_v3, %v1533_v11  ;;  %v1535_v15 = vpop.f32.mrb[30].mxu1 }
 0x18a   : > { %v1932_v14 = vmax.f32 %v1916_v5, %v1462_v12  ;;  %v1464_v16 = vpop.f32.mrb[31].mxu0  ;;  %v1934_v17 = vmax.f32 %v1918_v8, %v1535_v15  ;;  %v1537_v10 = vpop.f32.mrb[31].mxu1 }
 0x18b   : > { %v1933_v18 = vmax.f32 %v1917_v9, %v1464_v16  ;;  %v1935_v20 = vmax.f32 %v1919_v13, %v1537_v10 }
 0x18c   : > { %v1954_v19 = vadd.f32 %v2798_v61, %v1932_v14  ;;  %v1956_v27 = vadd.f32 %v2798_v61, %v1934_v17 }
 0x18d   : > { %v1955_v21 = vadd.f32 %v2798_v61, %v1933_v18  ;;  %v1957_v23 = vadd.f32 %v2798_v61, %v1935_v20 }
 0x18e   : > { %v1970_v22 = vmax.f32 %v1954_v19, 0.0  ;;  %v1972_v24 = vmax.f32 %v1956_v27, 0.0 }
 0x18f   : > { %v1971_v25 = vmax.f32 %v1955_v21, 0.0  ;;  %v1574_v26 = vpop.f32.mrb[32].mxu0  ;;  %v1973_v28 = vmax.f32 %v1957_v23, 0.0  ;;  %v1647_v45 = vpop.f32.mrb[32].mxu1 }
 0x190   : > { %1986 = vst [vmem:[%s2804_s20 + $0x20] sm:$0xff] %v1970_v22  ;;  %v1576_v29 = vpop.f32.mrb[33].mxu0  ;;  %1988 = vst [vmem:[%s2804_s20 + $0x30] sm:$0xff] %v1972_v24  ;;  %v1649_v30 = vpop.f32.mrb[33].mxu1 }
 0x191   : > { %1987 = vst [vmem:[%s2804_s20 + $0x28] sm:$0xff] %v1971_v25  ;;  %v1578_v0 = vpop.f32.mrb[34].mxu0  ;;  %1989 = vst [vmem:[%s2804_s20 + $0x38] sm:$0xff] %v1973_v28  ;;  %v1651_v32 = vpop.f32.mrb[34].mxu1 }
 0x192   : > { %v1840_v31 = vmax.f32 %v1574_v26, %v1578_v0  ;;  %v1580_v33 = vpop.f32.mrb[35].mxu0  ;;  %v1842_v62 = vmax.f32 %v1647_v45, %v1651_v32  ;;  %v1653_v35 = vpop.f32.mrb[35].mxu1 }
 0x193   : > { %v1841_v34 = vmax.f32 %v1576_v29, %v1580_v33  ;;  %v1843_v36 = vmax.f32 %v1649_v30, %v1653_v35 }
 0x197   : > { %v1584_v37 = vpop.f32.mrb[36].mxu0  ;;  %v1657_v39 = vpop.f32.mrb[36].mxu1 }
 0x198   : > { %v1856_v38 = vmax.f32 %v1840_v31, %v1584_v37  ;;  %v1586_v40 = vpop.f32.mrb[37].mxu0  ;;  %v1858_v41 = vmax.f32 %v1842_v62, %v1657_v39  ;;  %v1659_v43 = vpop.f32.mrb[37].mxu1 }
 0x199   : > { %v1857_v42 = vmax.f32 %v1841_v34, %v1586_v40  ;;  %v1588_v44 = vpop.f32.mrb[38].mxu0  ;;  %v1859_v46 = vmax.f32 %v1843_v36, %v1659_v43  ;;  %v1661_v48 = vpop.f32.mrb[38].mxu1 }
 0x19a   : > { %v1872_v47 = vmax.f32 %v1856_v38, %v1588_v44  ;;  %v1590_v49 = vpop.f32.mrb[39].mxu0  ;;  %v1874_v50 = vmax.f32 %v1858_v41, %v1661_v48  ;;  %v1663_v52 = vpop.f32.mrb[39].mxu1 }
 0x19b   : > { %v1873_v51 = vmax.f32 %v1857_v42, %v1590_v49  ;;  %v1875_v53 = vmax.f32 %v1859_v46, %v1663_v52 }
 0x19f   : > { %v1594_v54 = vpop.f32.mrb[40].mxu0  ;;  %v1667_v56 = vpop.f32.mrb[40].mxu1 }
 0x1a0   : > { %v1888_v55 = vmax.f32 %v1872_v47, %v1594_v54  ;;  %v1596_v57 = vpop.f32.mrb[41].mxu0  ;;  %v1890_v58 = vmax.f32 %v1874_v50, %v1667_v56  ;;  %v1669_v60 = vpop.f32.mrb[41].mxu1 }
 0x1a1   : > { %v1889_v59 = vmax.f32 %v1873_v51, %v1596_v57  ;;  %v1598_v63 = vpop.f32.mrb[42].mxu0  ;;  %v1891_v1 = vmax.f32 %v1875_v53, %v1669_v60  ;;  %v1671_v3 = vpop.f32.mrb[42].mxu1 }
 0x1a2   : > { %v1904_v2 = vmax.f32 %v1888_v55, %v1598_v63  ;;  %v1600_v4 = vpop.f32.mrb[43].mxu0  ;;  %v1906_v5 = vmax.f32 %v1890_v58, %v1671_v3  ;;  %v1673_v7 = vpop.f32.mrb[43].mxu1 }
 0x1a3   : > { %v1905_v6 = vmax.f32 %v1889_v59, %v1600_v4  ;;  %v1907_v8 = vmax.f32 %v1891_v1, %v1673_v7 }
 0x1a7   : > { %v1604_v9 = vpop.f32.mrb[44].mxu0  ;;  %v1677_v12 = vpop.f32.mrb[44].mxu1 }
 0x1a8   : > { %v1920_v11 = vmax.f32 %v1904_v2, %v1604_v9  ;;  %v1606_v13 = vpop.f32.mrb[45].mxu0  ;;  %v1922_v14 = vmax.f32 %v1906_v5, %v1677_v12  ;;  %v1679_v16 = vpop.f32.mrb[45].mxu1 }
 0x1a9   : > { %v1921_v15 = vmax.f32 %v1905_v6, %v1606_v13  ;;  %v1608_v17 = vpop.f32.mrb[46].mxu0  ;;  %v1923_v18 = vmax.f32 %v1907_v8, %v1679_v16  ;;  %v1681_v19 = vpop.f32.mrb[46].mxu1 }
 0x1aa   : > { %v1936_v10 = vmax.f32 %v1920_v11, %v1608_v17  ;;  %v1610_v20 = vpop.f32.mrb[47].mxu0  ;;  %v1938_v27 = vmax.f32 %v1922_v14, %v1681_v19  ;;  %v1683_v22 = vpop.f32.mrb[47].mxu1 }
 0x1ab   : > { %v1937_v21 = vmax.f32 %v1921_v15, %v1610_v20  ;;  %v1939_v24 = vmax.f32 %v1923_v18, %v1683_v22 }
 0x1ac   : > { %v1958_v23 = vadd.f32 %v2798_v61, %v1936_v10  ;;  %v1960_v25 = vadd.f32 %v2798_v61, %v1938_v27 }
 0x1ad   : > { %v1959_v26 = vadd.f32 %v2798_v61, %v1937_v21  ;;  %v1961_v45 = vadd.f32 %v2798_v61, %v1939_v24 }
 0x1ae   : > { %v1974_v28 = vmax.f32 %v1958_v23, 0.0  ;;  %v1976_v29 = vmax.f32 %v1960_v25, 0.0 }
 0x1af   : > { %v1975_v30 = vmax.f32 %v1959_v26, 0.0  ;;  %v1720_v0 = vpop.f32.mrb[48].mxu0  ;;  %v1977_v31 = vmax.f32 %v1961_v45, 0.0  ;;  %v1793_v32 = vpop.f32.mrb[48].mxu1 }
 0x1b0   : > { %1990 = vst [vmem:[%s2804_s20 + $0x40] sm:$0xff] %v1974_v28  ;;  %v1722_v33 = vpop.f32.mrb[49].mxu0  ;;  %1992 = vst [vmem:[%s2804_s20 + $0x50] sm:$0xff] %v1976_v29  ;;  %v1795_v62 = vpop.f32.mrb[49].mxu1 }
 0x1b1   : > { %1991 = vst [vmem:[%s2804_s20 + $0x48] sm:$0xff] %v1975_v30  ;;  %v1724_v34 = vpop.f32.mrb[50].mxu0  ;;  %1993 = vst [vmem:[%s2804_s20 + $0x58] sm:$0xff] %v1977_v31  ;;  %v1797_v36 = vpop.f32.mrb[50].mxu1 }
 0x1b2   : > { %v1844_v35 = vmax.f32 %v1720_v0, %v1724_v34  ;;  %v1726_v37 = vpop.f32.mrb[51].mxu0  ;;  %v1846_v38 = vmax.f32 %v1793_v32, %v1797_v36  ;;  %v1799_v40 = vpop.f32.mrb[51].mxu1 }
 0x1b3   : > { %v1845_v39 = vmax.f32 %v1722_v33, %v1726_v37  ;;  %v1847_v41 = vmax.f32 %v1795_v62, %v1799_v40 }
 0x1b7   : > { %v1730_v42 = vpop.f32.mrb[52].mxu0  ;;  %v1803_v44 = vpop.f32.mrb[52].mxu1 }
 0x1b8   : > { %v1860_v43 = vmax.f32 %v1844_v35, %v1730_v42  ;;  %v1732_v46 = vpop.f32.mrb[53].mxu0  ;;  %v1862_v47 = vmax.f32 %v1846_v38, %v1803_v44  ;;  %v1805_v49 = vpop.f32.mrb[53].mxu1 }
 0x1b9   : > { %v1861_v48 = vmax.f32 %v1845_v39, %v1732_v46  ;;  %v1734_v50 = vpop.f32.mrb[54].mxu0  ;;  %v1863_v51 = vmax.f32 %v1847_v41, %v1805_v49  ;;  %v1807_v53 = vpop.f32.mrb[54].mxu1 }
 0x1ba   : > { %v1876_v52 = vmax.f32 %v1860_v43, %v1734_v50  ;;  %v1736_v54 = vpop.f32.mrb[55].mxu0  ;;  %v1878_v55 = vmax.f32 %v1862_v47, %v1807_v53  ;;  %v1809_v57 = vpop.f32.mrb[55].mxu1 }
 0x1bb   : > { %v1877_v56 = vmax.f32 %v1861_v48, %v1736_v54  ;;  %v1879_v58 = vmax.f32 %v1863_v51, %v1809_v57 }
 0x1bf   : > { %v1740_v59 = vpop.f32.mrb[56].mxu0  ;;  %v1813_v63 = vpop.f32.mrb[56].mxu1 }
 0x1c0   : > { %v1892_v60 = vmax.f32 %v1876_v52, %v1740_v59  ;;  %v1742_v1 = vpop.f32.mrb[57].mxu0  ;;  %v1894_v2 = vmax.f32 %v1878_v55, %v1813_v63  ;;  %v1815_v4 = vpop.f32.mrb[57].mxu1 }
 0x1c1   : > { %v1893_v3 = vmax.f32 %v1877_v56, %v1742_v1  ;;  %v1744_v5 = vpop.f32.mrb[58].mxu0  ;;  %v1895_v6 = vmax.f32 %v1879_v58, %v1815_v4  ;;  %v1817_v8 = vpop.f32.mrb[58].mxu1 }
 0x1c2   : > { %v1908_v7 = vmax.f32 %v1892_v60, %v1744_v5  ;;  %v1746_v9 = vpop.f32.mrb[59].mxu0  ;;  %v1910_v11 = vmax.f32 %v1894_v2, %v1817_v8  ;;  %v1819_v13 = vpop.f32.mrb[59].mxu1 }
 0x1c3   : > { %v1909_v12 = vmax.f32 %v1893_v3, %v1746_v9  ;;  %v1911_v14 = vmax.f32 %v1895_v6, %v1819_v13 }
 0x1c7   : > { %v1750_v15 = vpop.f32.mrb[60].mxu0  ;;  %v1823_v17 = vpop.f32.mrb[60].mxu1 }
 0x1c8   : > { %v1924_v16 = vmax.f32 %v1908_v7, %v1750_v15  ;;  %v1752_v18 = vpop.f32.mrb[61].mxu0  ;;  %v1926_v10 = vmax.f32 %v1910_v11, %v1823_v17  ;;  %v1825_v20 = vpop.f32.mrb[61].mxu1 }
 0x1c9   : > { %v1925_v19 = vmax.f32 %v1909_v12, %v1752_v18  ;;  %v1754_v27 = vpop.f32.mrb[62].mxu0  ;;  %v1927_v21 = vmax.f32 %v1911_v14, %v1825_v20  ;;  %v1827_v23 = vpop.f32.mrb[62].mxu1 }
 0x1ca   : > { %v1940_v22 = vmax.f32 %v1924_v16, %v1754_v27  ;;  %v1756_v24 = vpop.f32.mrb[63].mxu0  ;;  %v1942_v25 = vmax.f32 %v1926_v10, %v1827_v23  ;;  %v1829_v28 = vpop.f32.mrb[63].mxu1 }
 0x1cb   : > { %v1941_v26 = vmax.f32 %v1925_v19, %v1756_v24  ;;  %v1943_v29 = vmax.f32 %v1927_v21, %v1829_v28 }
 0x1cc   : > { %v1962_v45 = vadd.f32 %v2798_v61, %v1940_v22  ;;  %v1964_v30 = vadd.f32 %v2798_v61, %v1942_v25 }
 0x1cd   : > { %v1963_v0 = vadd.f32 %v2798_v61, %v1941_v26  ;;  %v1965_v32 = vadd.f32 %v2798_v61, %v1943_v29 }
 0x1ce   : > { %v1978_v31 = vmax.f32 %v1962_v45, 0.0  ;;  %v1980_v33 = vmax.f32 %v1964_v30, 0.0 }
 0x1cf   : > { %v1979_v62 = vmax.f32 %v1963_v0, 0.0  ;;  %v1981_v34 = vmax.f32 %v1965_v32, 0.0 }
 0x1d0   : > { %1994 = vst [vmem:[%s2804_s20 + $0x60] sm:$0xff] %v1978_v31  ;;  %1996 = vst [vmem:[%s2804_s20 + $0x70] sm:$0xff] %v1980_v33 }
 0x1d1   : > { %1995 = vst [vmem:[%s2804_s20 + $0x68] sm:$0xff] %v1979_v62  ;;  %1997 = vst [vmem:[%s2804_s20 + $0x78] sm:$0xff] %v1981_v34 }
 0x1d2 PF: > { %p10_p9 = scmp.ge.s32.totalorder %s2298_s16, 7   ;;  %s2851_s12 = smov %s2254_s13 }
 0x1d3   : > { %s2852_s13 = smov %s2307_s19  ;;  %s2853_s14 = smov %s2298_s16 }
 0x1d4   :  { %12 = sbr.rel (!%p10_p9) target bundleno = 2 (0x2), region = 90 }

// kernel: cnn_forward.5
= control target key start
LH: loop header
LB: loop body
LE: loop exit
PB: predicated region body
PF: predicated region fallthrough
CT: control target
= control target key end

     0   :  { %v2284_v55 = vmov 0   ;;  %s3022_s0 = inlined_call_operand.vmem [shape: bf16[256,1536], index: 0, kind: input, shape index: {}]   ;;  %s3023_s1 = inlined_call_operand.vmem [shape: bf16[64,256], index: 1, kind: input, shape index: {}]   ;;  %s3024_s2 = inlined_call_operand.vmem [shape: f32[8,128], index: 2, kind: input, shape index: {}]   ;;  %s3025_s3 = inlined_call_operand.vmem [shape: f32[8,1536], index: 3, kind: output, shape index: {}]  }
   0x1   :  { %v1984_v0 = vld [vmem:[%s3022_s0 + $0x4] ss:$48 sps:$4 sm:$0xff]   ;;  %v1986_v1 = vld [vmem:[%s3022_s0 + $0xc] ss:$48 sps:$4 sm:$0xff]   ;;  %v1988_v2 = vld [vmem:[%s3022_s0] ss:$48 sps:$4 sm:$0xff]   ;;  %1983 = vset.pattern.permute.xlu0 %v2284_v55 }
   0x2   :  { %1214 = vmatprep.subr.bf16.mxu0 %v1984_v0  ;;  %v1989_v3 = vld [vmem:[%s3022_s0 + $0x8] ss:$48 sps:$4 sm:$0xff]   ;;  %1287 = vmatprep.subr.bf16.mxu1 %v1986_v1  ;;  %v1990_v4 = vld [vmem:[%s3022_s0 + $0x64] ss:$48 sps:$4 sm:$0xff]   ;;  %v1992_v5 = vld [vmem:[%s3022_s0 + $0x6c] ss:$48 sps:$4 sm:$0xff]  }
   0x3   :  { %1215 = vmatpush1.bf16.msra.mxu0 %v1988_v2  ;;  %1288 = vmatpush1.bf16.msra.mxu1 %v1989_v3  ;;  %v1994_v6 = vld [vmem:[%s3022_s0 + $0x60] ss:$48 sps:$4 sm:$0xff]   ;;  %v1995_v7 = vld [vmem:[%s3022_s0 + $0x68] ss:$48 sps:$4 sm:$0xff]   ;;  %v1996_v8 = vld [vmem:[%s3022_s0 + $0xc4] ss:$48 sps:$4 sm:$0xff]  }
   0x4   :  { %1216 = vmatprep.subr.bf16.mxu0 %v1990_v4  ;;  %1289 = vmatprep.subr.bf16.mxu1 %v1992_v5  ;;  %v1998_v9 = vld [vmem:[%s3022_s0 + $0xcc] ss:$48 sps:$4 sm:$0xff]   ;;  %v2000_v10 = vld [vmem:[%s3022_s0 + $0xc0] ss:$48 sps:$4 sm:$0xff]   ;;  %v2001_v11 = vld [vmem:[%s3022_s0 + $0xc8] ss:$48 sps:$4 sm:$0xff]  }
   0x5   :  { %v2002_v12 = vld [vmem:[%s3022_s0 + $0x124] ss:$48 sps:$4 sm:$0xff]   ;;  %v2004_v13 = vld [vmem:[%s3022_s0 + $0x12c] ss:$48 sps:$4 sm:$0xff]   ;;  %v2006_v14 = vld [vmem:[%s3022_s0 + $0x120] ss:$48 sps:$4 sm:$0xff]  }
   0x6   :  { %v2007_v15 = vld [vmem:[%s3022_s0 + $0x128] ss:$48 sps:$4 sm:$0xff]   ;;  %v2008_v16 = vld [vmem:[%s3022_s0 + $0x184] ss:$48 sps:$4 sm:$0xff]   ;;  %v2010_v17 = vld [vmem:[%s3022_s0 + $0x18c] ss:$48 sps:$4 sm:$0xff]  }
   0x7   :  { %1217 = vmatpush1.bf16.msra.mxu0 %v1994_v6  ;;  %1290 = vmatpush1.bf16.msra.mxu1 %v1995_v7  ;;  %v2012_v18 = vld [vmem:[%s3022_s0 + $0x180] ss:$48 sps:$4 sm:$0xff]   ;;  %v2013_v19 = vld [vmem:[%s3022_s0 + $0x188] ss:$48 sps:$4 sm:$0xff]   ;;  %v2014_v20 = vld [vmem:[%s3022_s0 + $0x1e4] ss:$48 sps:$4 sm:$0xff]  }
   0x8   :  { %1218 = vmatprep.subr.bf16.mxu0 %v1996_v8  ;;  %1291 = vmatprep.subr.bf16.mxu1 %v1998_v9  ;;  %v2016_v21 = vld [vmem:[%s3022_s0 + $0x1ec] ss:$48 sps:$4 sm:$0xff]   ;;  %v2018_v22 = vld [vmem:[%s3022_s0 + $0x1e0] ss:$48 sps:$4 sm:$0xff]   ;;  %v2019_v23 = vld [vmem:[%s3022_s0 + $0x1e8] ss:$48 sps:$4 sm:$0xff]  }
   0x9   :  { %v2020_v24 = vld [vmem:[%s3022_s0 + $0x244] ss:$48 sps:$4 sm:$0xff]   ;;  %v2022_v25 = vld [vmem:[%s3022_s0 + $0x24c] ss:$48 sps:$4 sm:$0xff]   ;;  %v2024_v26 = vld [vmem:[%s3022_s0 + $0x240] ss:$48 sps:$4 sm:$0xff]  }
   0xa   :  { %v2025_v27 = vld [vmem:[%s3022_s0 + $0x248] ss:$48 sps:$4 sm:$0xff]   ;;  %v2026_v28 = vld [vmem:[%s3022_s0 + $0x2a4] ss:$48 sps:$4 sm:$0xff]   ;;  %v2028_v29 = vld [vmem:[%s3022_s0 + $0x2ac] ss:$48 sps:$4 sm:$0xff]  }
   0xb   :  { %1219 = vmatpush1.bf16.msra.mxu0 %v2000_v10  ;;  %1292 = vmatpush1.bf16.msra.mxu1 %v2001_v11  ;;  %v2030_v30 = vld [vmem:[%s3022_s0 + $0x2a0] ss:$48 sps:$4 sm:$0xff]   ;;  %v2031_v31 = vld [vmem:[%s3022_s0 + $0x2a8] ss:$48 sps:$4 sm:$0xff]   ;;  %v2032_v32 = vld [vmem:[%s3022_s0 + $0x304] ss:$48 sps:$4 sm:$0xff]  }
   0xc   :  { %1220 = vmatprep.subr.bf16.mxu0 %v2002_v12  ;;  %1293 = vmatprep.subr.bf16.mxu1 %v2004_v13  ;;  %v2034_v33 = vld [vmem:[%s3022_s0 + $0x30c] ss:$48 sps:$4 sm:$0xff]   ;;  %v2036_v34 = vld [vmem:[%s3022_s0 + $0x300] ss:$48 sps:$4 sm:$0xff]   ;;  %v2037_v35 = vld [vmem:[%s3022_s0 + $0x308] ss:$48 sps:$4 sm:$0xff]  }
   0xd   :  { %v2038_v36 = vld [vmem:[%s3022_s0 + $0x364] ss:$48 sps:$4 sm:$0xff]   ;;  %v2040_v37 = vld [vmem:[%s3022_s0 + $0x36c] ss:$48 sps:$4 sm:$0xff]   ;;  %v2042_v38 = vld [vmem:[%s3022_s0 + $0x360] ss:$48 sps:$4 sm:$0xff]  }
   0xe   :  { %v2043_v39 = vld [vmem:[%s3022_s0 + $0x368] ss:$48 sps:$4 sm:$0xff]   ;;  %v2044_v40 = vld [vmem:[%s3022_s0 + $0x3c4] ss:$48 sps:$4 sm:$0xff]   ;;  %v2046_v41 = vld [vmem:[%s3022_s0 + $0x3cc] ss:$48 sps:$4 sm:$0xff]  }
   0xf   :  { %1221 = vmatpush1.bf16.msra.mxu0 %v2006_v14  ;;  %1294 = vmatpush1.bf16.msra.mxu1 %v2007_v15  ;;  %v2048_v42 = vld [vmem:[%s3022_s0 + $0x3c0] ss:$48 sps:$4 sm:$0xff]   ;;  %v2049_v43 = vld [vmem:[%s3022_s0 + $0x3c8] ss:$48 sps:$4 sm:$0xff]   ;;  %v2050_v44 = vld [vmem:[%s3022_s0 + $0x424] ss:$48 sps:$4 sm:$0xff]  }
  0x10   :  { %1222 = vmatprep.subr.bf16.mxu0 %v2008_v16  ;;  %1295 = vmatprep.subr.bf16.mxu1 %v2010_v17  ;;  %v2052_v45 = vld [vmem:[%s3022_s0 + $0x42c] ss:$48 sps:$4 sm:$0xff]   ;;  %v2054_v46 = vld [vmem:[%s3022_s0 + $0x420] ss:$48 sps:$4 sm:$0xff]   ;;  %v2055_v47 = vld [vmem:[%s3022_s0 + $0x428] ss:$48 sps:$4 sm:$0xff]  }
  0x11   :  { %v2452_v48 = vld [vmem:[%s3023_s1 + $0x4] ss:$8 sps:$4 sm:$0xff]   ;;  %v2060_v51 = vld [vmem:[%s3022_s0 + $0x480] ss:$48 sps:$4 sm:$0xff]   ;;  %v2061_v52 = vld [vmem:[%s3022_s0 + $0x488] ss:$48 sps:$4 sm:$0xff]  }
  0x12   :  { %v2056_v49 = vld [vmem:[%s3022_s0 + $0x484] ss:$48 sps:$4 sm:$0xff]   ;;  %v2058_v50 = vld [vmem:[%s3022_s0 + $0x48c] ss:$48 sps:$4 sm:$0xff]   ;;  %1246 = vmatprep.mubr.bf16.mxu0 %v2452_v48  ;;  %1319 = vmatprep.mubr.bf16.mxu1 %v2452_v48  ;;  %v2066_v56 = vld [vmem:[%s3022_s0 + $0x4e0] ss:$48 sps:$4 sm:$0xff]  }
  0x13   :  { %1223 = vmatpush1.bf16.msra.mxu0 %v2012_v18  ;;  %1296 = vmatpush1.bf16.msra.mxu1 %v2013_v19  ;;  %v2062_v53 = vld [vmem:[%s3022_s0 + $0x4e4] ss:$48 sps:$4 sm:$0xff]   ;;  %v2064_v54 = vld [vmem:[%s3022_s0 + $0x4ec] ss:$48 sps:$4 sm:$0xff]   ;;  %v2067_v57 = vld [vmem:[%s3022_s0 + $0x4e8] ss:$48 sps:$4 sm:$0xff]  }
  0x14   :  { %1224 = vmatprep.subr.bf16.mxu0 %v2014_v20  ;;  %1297 = vmatprep.subr.bf16.mxu1 %v2016_v21  ;;  %v2068_v58 = vld [vmem:[%s3022_s0 + $0x544] ss:$48 sps:$4 sm:$0xff]   ;;  %v2070_v59 = vld [vmem:[%s3022_s0 + $0x54c] ss:$48 sps:$4 sm:$0xff]   ;;  %v2072_v60 = vld [vmem:[%s3022_s0 + $0x540] ss:$48 sps:$4 sm:$0xff]  }
  0x15   :  { %v2073_v61 = vld [vmem:[%s3022_s0 + $0x548] ss:$48 sps:$4 sm:$0xff]   ;;  %v2074_v62 = vld [vmem:[%s3022_s0 + $0x5a4] ss:$48 sps:$4 sm:$0xff]   ;;  %v2076_v63 = vld [vmem:[%s3022_s0 + $0x5ac] ss:$48 sps:$4 sm:$0xff]  }
  0x16   :  { %v2078_v0 = vld [vmem:[%s3022_s0 + $0x5a0] ss:$48 sps:$4 sm:$0xff]   ;;  %v2079_v1 = vld [vmem:[%s3022_s0 + $0x5a8] ss:$48 sps:$4 sm:$0xff]   ;;  %v2085_v2 = vld [vmem:[%s3022_s0 + $0x14] ss:$48 sps:$4 sm:$0xff]  }
  0x17   :  { %1225 = vmatpush1.bf16.msra.mxu0 %v2018_v22  ;;  %1298 = vmatpush1.bf16.msra.mxu1 %v2019_v23  ;;  %v2088_v3 = vld [vmem:[%s3022_s0 + $0x1c] ss:$48 sps:$4 sm:$0xff]   ;;  %v2513_v4 = vld [vmem:[%s3023_s1] ss:$8 sps:$4 sm:$0xff]   ;;  %v2091_v7 = vld [vmem:[%s3022_s0 + $0x74] ss:$48 sps:$4 sm:$0xff]  }
  0x18   :  { %1226 = vmatprep.subr.bf16.mxu0 %v2020_v24  ;;  %1299 = vmatprep.subr.bf16.mxu1 %v2022_v25  ;;  %v2083_v5 = vld [vmem:[%s3022_s0 + $0x10] ss:$48 sps:$4 sm:$0xff]   ;;  %v2086_v6 = vld [vmem:[%s3022_s0 + $0x18] ss:$48 sps:$4 sm:$0xff]   ;;  %v2094_v8 = vld [vmem:[%s3022_s0 + $0x7c] ss:$48 sps:$4 sm:$0xff]  }
  0x19   :  { %v2530_v9 = vld [vmem:[%s3023_s1 + $0x14] ss:$8 sps:$4 sm:$0xff]   ;;  %v2089_v10 = vld [vmem:[%s3022_s0 + $0x70] ss:$48 sps:$4 sm:$0xff]   ;;  %v2092_v11 = vld [vmem:[%s3022_s0 + $0x78] ss:$48 sps:$4 sm:$0xff]  }
  0x1a   :  { %v2100_v12 = vld [vmem:[%s3022_s0 + $0xd4] ss:$48 sps:$4 sm:$0xff]   ;;  %v2103_v13 = vld [vmem:[%s3022_s0 + $0xdc] ss:$48 sps:$4 sm:$0xff]   ;;  %v2551_v14 = vld [vmem:[%s3023_s1 + $0x10] ss:$8 sps:$4 sm:$0xff]  }
  0x1b   :  { %1227 = vmatpush1.bf16.msra.mxu0 %v2024_v26  ;;  %1300 = vmatpush1.bf16.msra.mxu1 %v2025_v27  ;;  %v2098_v15 = vld [vmem:[%s3022_s0 + $0xd0] ss:$48 sps:$4 sm:$0xff]   ;;  %v2101_v16 = vld [vmem:[%s3022_s0 + $0xd8] ss:$48 sps:$4 sm:$0xff]   ;;  %v2106_v17 = vld [vmem:[%s3022_s0 + $0x134] ss:$48 sps:$4 sm:$0xff]  }
  0x1c   :  { %1228 = vmatprep.subr.bf16.mxu0 %v2026_v28  ;;  %1301 = vmatprep.subr.bf16.mxu1 %v2028_v29  ;;  %v2109_v18 = vld [vmem:[%s3022_s0 + $0x13c] ss:$48 sps:$4 sm:$0xff]   ;;  %v2104_v20 = vld [vmem:[%s3022_s0 + $0x130] ss:$48 sps:$4 sm:$0xff]   ;;  %v2107_v21 = vld [vmem:[%s3022_s0 + $0x138] ss:$48 sps:$4 sm:$0xff]  }
  0x1d   :  { %v2568_v19 = vld [vmem:[%s3023_s1 + $0x24] ss:$8 sps:$4 sm:$0xff]   ;;  %v2589_v24 = vld [vmem:[%s3023_s1 + $0x20] ss:$8 sps:$4 sm:$0xff]   ;;  %v2606_v29 = vld [vmem:[%s3023_s1 + $0x34] ss:$8 sps:$4 sm:$0xff]  }
  0x1e   :  { %v2115_v22 = vld [vmem:[%s3022_s0 + $0x194] ss:$48 sps:$4 sm:$0xff]   ;;  %v2118_v23 = vld [vmem:[%s3022_s0 + $0x19c] ss:$48 sps:$4 sm:$0xff]   ;;  %v2113_v25 = vld [vmem:[%s3022_s0 + $0x190] ss:$48 sps:$4 sm:$0xff]  }
  0x1f   :  { %1229 = vmatpush1.bf16.msra.mxu0 %v2030_v30  ;;  %1302 = vmatpush1.bf16.msra.mxu1 %v2031_v31  ;;  %v2116_v26 = vld [vmem:[%s3022_s0 + $0x198] ss:$48 sps:$4 sm:$0xff]   ;;  %v2121_v27 = vld [vmem:[%s3022_s0 + $0x1f4] ss:$48 sps:$4 sm:$0xff]   ;;  %v2124_v28 = vld [vmem:[%s3022_s0 + $0x1fc] ss:$48 sps:$4 sm:$0xff]  }
  0x20   :  { %1230 = vmatprep.subr.bf16.mxu0 %v2032_v32  ;;  %1303 = vmatprep.subr.bf16.mxu1 %v2034_v33  ;;  %v2119_v30 = vld [vmem:[%s3022_s0 + $0x1f0] ss:$48 sps:$4 sm:$0xff]   ;;  %v2122_v31 = vld [vmem:[%s3022_s0 + $0x1f8] ss:$48 sps:$4 sm:$0xff]   ;;  %v2130_v32 = vld [vmem:[%s3022_s0 + $0x254] ss:$48 sps:$4 sm:$0xff]  }
  0x21   :  { %v2133_v33 = vld [vmem:[%s3022_s0 + $0x25c] ss:$48 sps:$4 sm:$0xff]  }
  0x22   :  { %v2163_v55 = vld [vmem:[%s3022_s0 + $0x43c] ss:$48 sps:$4 sm:$0xff]  }
  0x23   :  { %1231 = vmatpush1.bf16.msra.mxu0 %v2036_v34  ;;  %1304 = vmatpush1.bf16.msra.mxu1 %v2037_v35  ;;  %v2627_v34 = vld [vmem:[%s3023_s1 + $0x30] ss:$8 sps:$4 sm:$0xff]  }
  0x24   :  { %1232 = vmatprep.subr.bf16.mxu0 %v2038_v36  ;;  %1305 = vmatprep.subr.bf16.mxu1 %v2040_v37  ;;  %v2128_v35 = vld [vmem:[%s3022_s0 + $0x250] ss:$48 sps:$4 sm:$0xff]   ;;  %v2131_v36 = vld [vmem:[%s3022_s0 + $0x258] ss:$48 sps:$4 sm:$0xff]   ;;  %v2136_v37 = vld [vmem:[%s3022_s0 + $0x2b4] ss:$48 sps:$4 sm:$0xff]  }
  0x27   :  { %1233 = vmatpush1.bf16.msra.mxu0 %v2042_v38  ;;  %1306 = vmatpush1.bf16.msra.mxu1 %v2043_v39  ;;  %v2139_v38 = vld [vmem:[%s3022_s0 + $0x2bc] ss:$48 sps:$4 sm:$0xff]   ;;  %v2134_v39 = vld [vmem:[%s3022_s0 + $0x2b0] ss:$48 sps:$4 sm:$0xff]  }
  0x28   :  { %1234 = vmatprep.subr.bf16.mxu0 %v2044_v40  ;;  %1307 = vmatprep.subr.bf16.mxu1 %v2046_v41  ;;  %v2137_v40 = vld [vmem:[%s3022_s0 + $0x2b8] ss:$48 sps:$4 sm:$0xff]   ;;  %v2142_v41 = vld [vmem:[%s3022_s0 + $0x314] ss:$48 sps:$4 sm:$0xff]  }
  0x2b   :  { %1235 = vmatpush1.bf16.msra.mxu0 %v2048_v42  ;;  %1308 = vmatpush1.bf16.msra.mxu1 %v2049_v43  ;;  %v2145_v42 = vld [vmem:[%s3022_s0 + $0x31c] ss:$48 sps:$4 sm:$0xff]   ;;  %v2140_v43 = vld [vmem:[%s3022_s0 + $0x310] ss:$48 sps:$4 sm:$0xff]  }
  0x2c   :  { %1236 = vmatprep.subr.bf16.mxu0 %v2050_v44  ;;  %1309 = vmatprep.subr.bf16.mxu1 %v2052_v45  ;;  %v2143_v44 = vld [vmem:[%s3022_s0 + $0x318] ss:$48 sps:$4 sm:$0xff]   ;;  %v2148_v45 = vld [vmem:[%s3022_s0 + $0x374] ss:$48 sps:$4 sm:$0xff]  }
  0x2f   :  { %1237 = vmatpush1.bf16.msra.mxu0 %v2054_v46  ;;  %1310 = vmatpush1.bf16.msra.mxu1 %v2055_v47  ;;  %v2151_v46 = vld [vmem:[%s3022_s0 + $0x37c] ss:$48 sps:$4 sm:$0xff]   ;;  %v2146_v47 = vld [vmem:[%s3022_s0 + $0x370] ss:$48 sps:$4 sm:$0xff]  }
  0x30   :  { %1238 = vmatprep.subr.bf16.mxu0 %v2056_v49  ;;  %1311 = vmatprep.subr.bf16.mxu1 %v2058_v50  ;;  %v2149_v49 = vld [vmem:[%s3022_s0 + $0x378] ss:$48 sps:$4 sm:$0xff]   ;;  %v2154_v50 = vld [vmem:[%s3022_s0 + $0x3d4] ss:$48 sps:$4 sm:$0xff]  }
  0x33   :  { %1239 = vmatpush1.bf16.msra.mxu0 %v2060_v51  ;;  %1312 = vmatpush1.bf16.msra.mxu1 %v2061_v52  ;;  %v2157_v51 = vld [vmem:[%s3022_s0 + $0x3dc] ss:$48 sps:$4 sm:$0xff]   ;;  %v2152_v52 = vld [vmem:[%s3022_s0 + $0x3d0] ss:$48 sps:$4 sm:$0xff]  }
  0x34   :  { %1240 = vmatprep.subr.bf16.mxu0 %v2062_v53  ;;  %1313 = vmatprep.subr.bf16.mxu1 %v2064_v54  ;;  %v2155_v53 = vld [vmem:[%s3022_s0 + $0x3d8] ss:$48 sps:$4 sm:$0xff]   ;;  %v2160_v54 = vld [vmem:[%s3022_s0 + $0x434] ss:$48 sps:$4 sm:$0xff]  }
  0x37   :  { %1241 = vmatpush1.bf16.msra.mxu0 %v2066_v56  ;;  %1314 = vmatpush1.bf16.msra.mxu1 %v2067_v57  ;;  %v2158_v56 = vld [vmem:[%s3022_s0 + $0x430] ss:$48 sps:$4 sm:$0xff]   ;;  %v2161_v57 = vld [vmem:[%s3022_s0 + $0x438] ss:$48 sps:$4 sm:$0xff]  }
  0x38   :  { %1242 = vmatprep.subr.bf16.mxu0 %v2068_v58  ;;  %1315 = vmatprep.subr.bf16.mxu1 %v2070_v59  ;;  %v2166_v58 = vld [vmem:[%s3022_s0 + $0x494] ss:$48 sps:$4 sm:$0xff]   ;;  %v2169_v59 = vld [vmem:[%s3022_s0 + $0x49c] ss:$48 sps:$4 sm:$0xff]  }
  0x3b   :  { %1243 = vmatpush1.bf16.msra.mxu0 %v2072_v60  ;;  %1316 = vmatpush1.bf16.msra.mxu1 %v2073_v61  ;;  %v2164_v60 = vld [vmem:[%s3022_s0 + $0x490] ss:$48 sps:$4 sm:$0xff]   ;;  %v2167_v61 = vld [vmem:[%s3022_s0 + $0x498] ss:$48 sps:$4 sm:$0xff]  }
  0x3c   :  { %1244 = vmatprep.subr.bf16.mxu0 %v2074_v62  ;;  %1317 = vmatprep.subr.bf16.mxu1 %v2076_v63  ;;  %v2172_v62 = vld [vmem:[%s3022_s0 + $0x4f4] ss:$48 sps:$4 sm:$0xff]   ;;  %v2175_v63 = vld [vmem:[%s3022_s0 + $0x4fc] ss:$48 sps:$4 sm:$0xff]  }
  0x3f   :  { %1245 = vmatpush1.bf16.msra.mxu0 %v2078_v0  ;;  %1318 = vmatpush1.bf16.msra.mxu1 %v2079_v1  ;;  %v2170_v0 = vld [vmem:[%s3022_s0 + $0x4f0] ss:$48 sps:$4 sm:$0xff]   ;;  %v2173_v1 = vld [vmem:[%s3022_s0 + $0x4f8] ss:$48 sps:$4 sm:$0xff]  }
  0x40   :  { %1360 = vmatprep.subr.bf16.mxu0 %v2085_v2  ;;  %1433 = vmatprep.subr.bf16.mxu1 %v2088_v3  ;;  %v2178_v2 = vld [vmem:[%s3022_s0 + $0x554] ss:$48 sps:$4 sm:$0xff]   ;;  %v2181_v3 = vld [vmem:[%s3022_s0 + $0x55c] ss:$48 sps:$4 sm:$0xff]  }
  0x42   :  { %1247 = vmatmul.mubr.bf16.vlgmr.msra.gmra.mrb[0].mxu0 %v2513_v4  ;;  %1320 = vmatmul.mubr.bf16.vlgmr.msra.gmra.mrb[0].mxu1 %v2513_v4 }
  0x43   :  { %1361 = vmatpush1.bf16.msra.mxu0 %v2083_v5  ;;  %1434 = vmatpush1.bf16.msra.mxu1 %v2086_v6  ;;  %v2176_v5 = vld [vmem:[%s3022_s0 + $0x550] ss:$48 sps:$4 sm:$0xff]   ;;  %v2179_v6 = vld [vmem:[%s3022_s0 + $0x558] ss:$48 sps:$4 sm:$0xff]  }
  0x44   :  { %1362 = vmatprep.subr.bf16.mxu0 %v2091_v7  ;;  %1435 = vmatprep.subr.bf16.mxu1 %v2094_v8  ;;  %v2184_v7 = vld [vmem:[%s3022_s0 + $0x5b4] ss:$48 sps:$4 sm:$0xff]   ;;  %v2187_v8 = vld [vmem:[%s3022_s0 + $0x5bc] ss:$48 sps:$4 sm:$0xff]  }
  0x45   :  { %1256 = vmatprep.mubr.bf16.mxu0 %v2530_v9  ;;  %1329 = vmatprep.mubr.bf16.mxu1 %v2530_v9 }
  0x47   :  { %1363 = vmatpush1.bf16.msra.mxu0 %v2089_v10  ;;  %1436 = vmatpush1.bf16.msra.mxu1 %v2092_v11  ;;  %v1736_v10 = vld [vmem:[%s3024_s2] sm:$0xff] }
  0x48   :  { %1364 = vmatprep.subr.bf16.mxu0 %v2100_v12  ;;  %1437 = vmatprep.subr.bf16.mxu1 %v2103_v13  ;;  %v2182_v11 = vld [vmem:[%s3022_s0 + $0x5b0] ss:$48 sps:$4 sm:$0xff]   ;;  %v2185_v12 = vld [vmem:[%s3022_s0 + $0x5b8] ss:$48 sps:$4 sm:$0xff]   ;;  %v2190_v13 = vld [vmem:[%s3022_s0 + $0x24] ss:$48 sps:$4 sm:$0xff]  }
  0x49   :  { %1739 = vperm.xlu0 %1983, %v1736_v10   ;;  %v2266_v10 = vld [vmem:[%s3022_s0 + $0x500] ss:$48 sps:$4 sm:$0xff]  }
  0x4a   :  { %1257 = vmatmul.mubr.bf16.gmra.mrb[4].mxu0 %v2551_v14  ;;  %1330 = vmatmul.mubr.bf16.gmra.mrb[4].mxu1 %v2551_v14 }
  0x4b   :  { %1365 = vmatpush1.bf16.msra.mxu0 %v2098_v15  ;;  %1438 = vmatpush1.bf16.msra.mxu1 %v2101_v16  ;;  %v2193_v15 = vld [vmem:[%s3022_s0 + $0x2c] ss:$48 sps:$4 sm:$0xff]   ;;  %v2188_v16 = vld [vmem:[%s3022_s0 + $0x20] ss:$48 sps:$4 sm:$0xff]  }
  0x4c   :  { %1366 = vmatprep.subr.bf16.mxu0 %v2106_v17  ;;  %1439 = vmatprep.subr.bf16.mxu1 %v2109_v18  ;;  %v2191_v17 = vld [vmem:[%s3022_s0 + $0x28] ss:$48 sps:$4 sm:$0xff]   ;;  %v2196_v18 = vld [vmem:[%s3022_s0 + $0x84] ss:$48 sps:$4 sm:$0xff]  }
  0x4d   :  { %1266 = vmatprep.mubr.bf16.mxu0 %v2568_v19  ;;  %1339 = vmatprep.mubr.bf16.mxu1 %v2568_v19 }
  0x4f   :  { %1367 = vmatpush1.bf16.msra.mxu0 %v2104_v20  ;;  %1440 = vmatpush1.bf16.msra.mxu1 %v2107_v21  ;;  %v2199_v20 = vld [vmem:[%s3022_s0 + $0x8c] ss:$48 sps:$4 sm:$0xff]   ;;  %v2194_v21 = vld [vmem:[%s3022_s0 + $0x80] ss:$48 sps:$4 sm:$0xff]  }
  0x50   :  { %1368 = vmatprep.subr.bf16.mxu0 %v2115_v22  ;;  %1441 = vmatprep.subr.bf16.mxu1 %v2118_v23  ;;  %v2197_v22 = vld [vmem:[%s3022_s0 + $0x88] ss:$48 sps:$4 sm:$0xff]   ;;  %v2202_v23 = vld [vmem:[%s3022_s0 + $0xe4] ss:$48 sps:$4 sm:$0xff]  }
  0x52   :  { %1267 = vmatmul.mubr.bf16.gmra.mrb[8].mxu0 %v2589_v24  ;;  %1340 = vmatmul.mubr.bf16.gmra.mrb[8].mxu1 %v2589_v24 }
  0x53   :  { %1369 = vmatpush1.bf16.msra.mxu0 %v2113_v25  ;;  %1442 = vmatpush1.bf16.msra.mxu1 %v2116_v26  ;;  %v2205_v25 = vld [vmem:[%s3022_s0 + $0xec] ss:$48 sps:$4 sm:$0xff]   ;;  %v2200_v26 = vld [vmem:[%s3022_s0 + $0xe0] ss:$48 sps:$4 sm:$0xff]  }
  0x54   :  { %1370 = vmatprep.subr.bf16.mxu0 %v2121_v27  ;;  %1443 = vmatprep.subr.bf16.mxu1 %v2124_v28  ;;  %v2203_v27 = vld [vmem:[%s3022_s0 + $0xe8] ss:$48 sps:$4 sm:$0xff]   ;;  %v2208_v28 = vld [vmem:[%s3022_s0 + $0x144] ss:$48 sps:$4 sm:$0xff]  }
  0x55   :  { %1276 = vmatprep.mubr.bf16.mxu0 %v2606_v29  ;;  %1349 = vmatprep.mubr.bf16.mxu1 %v2606_v29 }
  0x57   :  { %1371 = vmatpush1.bf16.msra.mxu0 %v2119_v30  ;;  %1444 = vmatpush1.bf16.msra.mxu1 %v2122_v31  ;;  %v2211_v30 = vld [vmem:[%s3022_s0 + $0x14c] ss:$48 sps:$4 sm:$0xff]   ;;  %v2206_v31 = vld [vmem:[%s3022_s0 + $0x140] ss:$48 sps:$4 sm:$0xff]  }
  0x58   :  { %1372 = vmatprep.subr.bf16.mxu0 %v2130_v32  ;;  %1445 = vmatprep.subr.bf16.mxu1 %v2133_v33  ;;  %v2209_v32 = vld [vmem:[%s3022_s0 + $0x148] ss:$48 sps:$4 sm:$0xff]   ;;  %v2214_v33 = vld [vmem:[%s3022_s0 + $0x1a4] ss:$48 sps:$4 sm:$0xff]  }
  0x5a   :  { %1277 = vmatmul.mubr.bf16.gmra.mrb[12].mxu0 %v2627_v34  ;;  %1350 = vmatmul.mubr.bf16.gmra.mrb[12].mxu1 %v2627_v34 }
  0x5b   :  { %1373 = vmatpush1.bf16.msra.mxu0 %v2128_v35  ;;  %1446 = vmatpush1.bf16.msra.mxu1 %v2131_v36  ;;  %v2217_v35 = vld [vmem:[%s3022_s0 + $0x1ac] ss:$48 sps:$4 sm:$0xff]   ;;  %v2212_v36 = vld [vmem:[%s3022_s0 + $0x1a0] ss:$48 sps:$4 sm:$0xff]  }
  0x5c   :  { %1374 = vmatprep.subr.bf16.mxu0 %v2136_v37  ;;  %1447 = vmatprep.subr.bf16.mxu1 %v2139_v38  ;;  %v2215_v37 = vld [vmem:[%s3022_s0 + $0x1a8] ss:$48 sps:$4 sm:$0xff]   ;;  %v2220_v38 = vld [vmem:[%s3022_s0 + $0x204] ss:$48 sps:$4 sm:$0xff]  }
  0x5d   :  { %1392 = vmatprep.mubr.bf16.mxu0 %v2452_v48  ;;  %1465 = vmatprep.mubr.bf16.mxu1 %v2452_v48 }
  0x5f   :  { %1375 = vmatpush1.bf16.msra.mxu0 %v2134_v39  ;;  %1448 = vmatpush1.bf16.msra.mxu1 %v2137_v40  ;;  %v2223_v39 = vld [vmem:[%s3022_s0 + $0x20c] ss:$48 sps:$4 sm:$0xff]   ;;  %v2218_v40 = vld [vmem:[%s3022_s0 + $0x200] ss:$48 sps:$4 sm:$0xff]  }
  0x60   :  { %1376 = vmatprep.subr.bf16.mxu0 %v2142_v41  ;;  %1449 = vmatprep.subr.bf16.mxu1 %v2145_v42  ;;  %v2221_v41 = vld [vmem:[%s3022_s0 + $0x208] ss:$48 sps:$4 sm:$0xff]   ;;  %v2226_v42 = vld [vmem:[%s3022_s0 + $0x264] ss:$48 sps:$4 sm:$0xff]  }
  0x63   :  { %1377 = vmatpush1.bf16.msra.mxu0 %v2140_v43  ;;  %1450 = vmatpush1.bf16.msra.mxu1 %v2143_v44  ;;  %v2229_v43 = vld [vmem:[%s3022_s0 + $0x26c] ss:$48 sps:$4 sm:$0xff]   ;;  %v2224_v44 = vld [vmem:[%s3022_s0 + $0x260] ss:$48 sps:$4 sm:$0xff]  }
  0x64   :  { %1378 = vmatprep.subr.bf16.mxu0 %v2148_v45  ;;  %1451 = vmatprep.subr.bf16.mxu1 %v2151_v46  ;;  %v2227_v45 = vld [vmem:[%s3022_s0 + $0x268] ss:$48 sps:$4 sm:$0xff]   ;;  %v2232_v46 = vld [vmem:[%s3022_s0 + $0x2c4] ss:$48 sps:$4 sm:$0xff]  }
  0x67   :  { %1379 = vmatpush1.bf16.msra.mxu0 %v2146_v47  ;;  %1452 = vmatpush1.bf16.msra.mxu1 %v2149_v49  ;;  %v2235_v47 = vld [vmem:[%s3022_s0 + $0x2cc] ss:$48 sps:$4 sm:$0xff]   ;;  %v2230_v49 = vld [vmem:[%s3022_s0 + $0x2c0] ss:$48 sps:$4 sm:$0xff]  }
  0x68   :  { %1380 = vmatprep.subr.bf16.mxu0 %v2154_v50  ;;  %1453 = vmatprep.subr.bf16.mxu1 %v2157_v51  ;;  %v2233_v50 = vld [vmem:[%s3022_s0 + $0x2c8] ss:$48 sps:$4 sm:$0xff]   ;;  %v2238_v51 = vld [vmem:[%s3022_s0 + $0x324] ss:$48 sps:$4 sm:$0xff]  }
  0x6b   :  { %1381 = vmatpush1.bf16.msra.mxu0 %v2152_v52  ;;  %1454 = vmatpush1.bf16.msra.mxu1 %v2155_v53  ;;  %v2241_v52 = vld [vmem:[%s3022_s0 + $0x32c] ss:$48 sps:$4 sm:$0xff]   ;;  %v2236_v53 = vld [vmem:[%s3022_s0 + $0x320] ss:$48 sps:$4 sm:$0xff]  }
  0x6c   :  { %1382 = vmatprep.subr.bf16.mxu0 %v2160_v54  ;;  %1455 = vmatprep.subr.bf16.mxu1 %v2163_v55  ;;  %v2239_v54 = vld [vmem:[%s3022_s0 + $0x328] ss:$48 sps:$4 sm:$0xff]   ;;  %v2244_v55 = vld [vmem:[%s3022_s0 + $0x384] ss:$48 sps:$4 sm:$0xff]  }
  0x6f   :  { %1383 = vmatpush1.bf16.msra.mxu0 %v2158_v56  ;;  %1456 = vmatpush1.bf16.msra.mxu1 %v2161_v57  ;;  %v2242_v56 = vld [vmem:[%s3022_s0 + $0x380] ss:$48 sps:$4 sm:$0xff]   ;;  %v2245_v57 = vld [vmem:[%s3022_s0 + $0x388] ss:$48 sps:$4 sm:$0xff]  }
  0x70   :  { %1384 = vmatprep.subr.bf16.mxu0 %v2166_v58  ;;  %1457 = vmatprep.subr.bf16.mxu1 %v2169_v59  ;;  %v2250_v58 = vld [vmem:[%s3022_s0 + $0x3e4] ss:$48 sps:$4 sm:$0xff]   ;;  %v2253_v59 = vld [vmem:[%s3022_s0 + $0x3ec] ss:$48 sps:$4 sm:$0xff]  }
  0x73   :  { %1385 = vmatpush1.bf16.msra.mxu0 %v2164_v60  ;;  %1458 = vmatpush1.bf16.msra.mxu1 %v2167_v61  ;;  %v2248_v60 = vld [vmem:[%s3022_s0 + $0x3e0] ss:$48 sps:$4 sm:$0xff]   ;;  %v2251_v61 = vld [vmem:[%s3022_s0 + $0x3e8] ss:$48 sps:$4 sm:$0xff]  }
  0x74   :  { %1386 = vmatprep.subr.bf16.mxu0 %v2172_v62  ;;  %1459 = vmatprep.subr.bf16.mxu1 %v2175_v63  ;;  %v2256_v62 = vld [vmem:[%s3022_s0 + $0x444] ss:$48 sps:$4 sm:$0xff]   ;;  %v2259_v63 = vld [vmem:[%s3022_s0 + $0x44c] ss:$48 sps:$4 sm:$0xff]  }
  0x77   :  { %1387 = vmatpush1.bf16.msra.mxu0 %v2170_v0  ;;  %1460 = vmatpush1.bf16.msra.mxu1 %v2173_v1  ;;  %v2254_v0 = vld [vmem:[%s3022_s0 + $0x440] ss:$48 sps:$4 sm:$0xff]   ;;  %v2257_v1 = vld [vmem:[%s3022_s0 + $0x448] ss:$48 sps:$4 sm:$0xff]  }
  0x78   :  { %1388 = vmatprep.subr.bf16.mxu0 %v2178_v2  ;;  %1461 = vmatprep.subr.bf16.mxu1 %v2181_v3  ;;  %v2262_v2 = vld [vmem:[%s3022_s0 + $0x4a4] ss:$48 sps:$4 sm:$0xff]   ;;  %v2265_v3 = vld [vmem:[%s3022_s0 + $0x4ac] ss:$48 sps:$4 sm:$0xff]  }
  0x7b   :  { %1389 = vmatpush1.bf16.msra.mxu0 %v2176_v5  ;;  %1462 = vmatpush1.bf16.msra.mxu1 %v2179_v6  ;;  %v2260_v5 = vld [vmem:[%s3022_s0 + $0x4a0] ss:$48 sps:$4 sm:$0xff]   ;;  %v2263_v6 = vld [vmem:[%s3022_s0 + $0x4a8] ss:$48 sps:$4 sm:$0xff]  }
  0x7c   :  { %1390 = vmatprep.subr.bf16.mxu0 %v2184_v7  ;;  %1463 = vmatprep.subr.bf16.mxu1 %v2187_v8  ;;  %v2268_v7 = vld [vmem:[%s3022_s0 + $0x504] ss:$48 sps:$4 sm:$0xff]   ;;  %v2271_v8 = vld [vmem:[%s3022_s0 + $0x50c] ss:$48 sps:$4 sm:$0xff]  }
  0x7f   :  { %1391 = vmatpush1.bf16.msra.mxu0 %v2182_v11  ;;  %1464 = vmatpush1.bf16.msra.mxu1 %v2185_v12  ;;  %v2269_v11 = vld [vmem:[%s3022_s0 + $0x508] ss:$48 sps:$4 sm:$0xff]   ;;  %v2274_v12 = vld [vmem:[%s3022_s0 + $0x564] ss:$48 sps:$4 sm:$0xff]  }
  0x80   :  { %1506 = vmatprep.subr.bf16.mxu0 %v2190_v13  ;;  %1579 = vmatprep.subr.bf16.mxu1 %v2193_v15  ;;  %v2277_v13 = vld [vmem:[%s3022_s0 + $0x56c] ss:$48 sps:$4 sm:$0xff]   ;;  %v2272_v15 = vld [vmem:[%s3022_s0 + $0x560] ss:$48 sps:$4 sm:$0xff]  }
  0x82   :  { %1393 = vmatmul.mubr.bf16.vlgmr.msra.gmra.mrb[16].mxu0 %v2513_v4  ;;  %1466 = vmatmul.mubr.bf16.vlgmr.msra.gmra.mrb[16].mxu1 %v2513_v4 }
  0x83   :  { %1507 = vmatpush1.bf16.msra.mxu0 %v2188_v16  ;;  %1580 = vmatpush1.bf16.msra.mxu1 %v2191_v17  ;;  %v2275_v16 = vld [vmem:[%s3022_s0 + $0x568] ss:$48 sps:$4 sm:$0xff]   ;;  %v2280_v17 = vld [vmem:[%s3022_s0 + $0x5c4] ss:$48 sps:$4 sm:$0xff]  }
  0x84   :  { %1508 = vmatprep.subr.bf16.mxu0 %v2196_v18  ;;  %1581 = vmatprep.subr.bf16.mxu1 %v2199_v20  ;;  %v2283_v18 = vld [vmem:[%s3022_s0 + $0x5cc] ss:$48 sps:$4 sm:$0xff]   ;;  %v2278_v20 = vld [vmem:[%s3022_s0 + $0x5c0] ss:$48 sps:$4 sm:$0xff]  }
  0x85   :  { %1402 = vmatprep.mubr.bf16.mxu0 %v2530_v9  ;;  %1475 = vmatprep.mubr.bf16.mxu1 %v2530_v9 }
  0x87   :  { %1509 = vmatpush1.bf16.msra.mxu0 %v2194_v21  ;;  %1582 = vmatpush1.bf16.msra.mxu1 %v2197_v22  ;;  %v2281_v21 = vld [vmem:[%s3022_s0 + $0x5c8] ss:$48 sps:$4 sm:$0xff]  }
  0x88   :  { %1510 = vmatprep.subr.bf16.mxu0 %v2202_v23  ;;  %1583 = vmatprep.subr.bf16.mxu1 %v2205_v25 }
  0x8a   :  { %1403 = vmatmul.mubr.bf16.gmra.mrb[20].mxu0 %v2551_v14  ;;  %1476 = vmatmul.mubr.bf16.gmra.mrb[20].mxu1 %v2551_v14 }
  0x8b   :  { %1511 = vmatpush1.bf16.msra.mxu0 %v2200_v26  ;;  %1584 = vmatpush1.bf16.msra.mxu1 %v2203_v27 }
  0x8c   :  { %1512 = vmatprep.subr.bf16.mxu0 %v2208_v28  ;;  %1585 = vmatprep.subr.bf16.mxu1 %v2211_v30 }
  0x8d   :  { %1412 = vmatprep.mubr.bf16.mxu0 %v2568_v19  ;;  %1485 = vmatprep.mubr.bf16.mxu1 %v2568_v19 }
  0x8f   :  { %1513 = vmatpush1.bf16.msra.mxu0 %v2206_v31  ;;  %1586 = vmatpush1.bf16.msra.mxu1 %v2209_v32 }
  0x90   :  { %1514 = vmatprep.subr.bf16.mxu0 %v2214_v33  ;;  %1587 = vmatprep.subr.bf16.mxu1 %v2217_v35 }
  0x92   :  { %1413 = vmatmul.mubr.bf16.gmra.mrb[24].mxu0 %v2589_v24  ;;  %1486 = vmatmul.mubr.bf16.gmra.mrb[24].mxu1 %v2589_v24 }
  0x93   :  { %1515 = vmatpush1.bf16.msra.mxu0 %v2212_v36  ;;  %1588 = vmatpush1.bf16.msra.mxu1 %v2215_v37 }
  0x94   :  { %1516 = vmatprep.subr.bf16.mxu0 %v2220_v38  ;;  %1589 = vmatprep.subr.bf16.mxu1 %v2223_v39 }
  0x95   :  { %1422 = vmatprep.mubr.bf16.mxu0 %v2606_v29  ;;  %1495 = vmatprep.mubr.bf16.mxu1 %v2606_v29 }
  0x97   :  { %1517 = vmatpush1.bf16.msra.mxu0 %v2218_v40  ;;  %1590 = vmatpush1.bf16.msra.mxu1 %v2221_v41 }
  0x98   :  { %1518 = vmatprep.subr.bf16.mxu0 %v2226_v42  ;;  %1591 = vmatprep.subr.bf16.mxu1 %v2229_v43 }
  0x9a   :  { %1423 = vmatmul.mubr.bf16.gmra.mrb[28].mxu0 %v2627_v34  ;;  %1496 = vmatmul.mubr.bf16.gmra.mrb[28].mxu1 %v2627_v34 }
  0x9b   :  { %1519 = vmatpush1.bf16.msra.mxu0 %v2224_v44  ;;  %1592 = vmatpush1.bf16.msra.mxu1 %v2227_v45 }
  0x9c   :  { %1520 = vmatprep.subr.bf16.mxu0 %v2232_v46  ;;  %1593 = vmatprep.subr.bf16.mxu1 %v2235_v47 }
  0x9d   :  { %1538 = vmatprep.mubr.bf16.mxu0 %v2452_v48  ;;  %1611 = vmatprep.mubr.bf16.mxu1 %v2452_v48  ;;  %v2247_v48 = vld [vmem:[%s3022_s0 + $0x38c] ss:$48 sps:$4 sm:$0xff]  }
  0x9f   :  { %1521 = vmatpush1.bf16.msra.mxu0 %v2230_v49  ;;  %1594 = vmatpush1.bf16.msra.mxu1 %v2233_v50 }
  0xa0   :  { %1522 = vmatprep.subr.bf16.mxu0 %v2238_v51  ;;  %1595 = vmatprep.subr.bf16.mxu1 %v2241_v52 }
  0xa3   :  { %1523 = vmatpush1.bf16.msra.mxu0 %v2236_v53  ;;  %1596 = vmatpush1.bf16.msra.mxu1 %v2239_v54 }
  0xa4   :  { %1524 = vmatprep.subr.bf16.mxu0 %v2244_v55  ;;  %1597 = vmatprep.subr.bf16.mxu1 %v2247_v48 }
  0xa7   :  { %1525 = vmatpush1.bf16.msra.mxu0 %v2242_v56  ;;  %1598 = vmatpush1.bf16.msra.mxu1 %v2245_v57 }
  0xa8   :  { %1526 = vmatprep.subr.bf16.mxu0 %v2250_v58  ;;  %1599 = vmatprep.subr.bf16.mxu1 %v2253_v59 }
  0xab   :  { %1527 = vmatpush1.bf16.msra.mxu0 %v2248_v60  ;;  %1600 = vmatpush1.bf16.msra.mxu1 %v2251_v61 }
  0xac   :  { %1528 = vmatprep.subr.bf16.mxu0 %v2256_v62  ;;  %1601 = vmatprep.subr.bf16.mxu1 %v2259_v63 }
  0xaf   :  { %1529 = vmatpush1.bf16.msra.mxu0 %v2254_v0  ;;  %1602 = vmatpush1.bf16.msra.mxu1 %v2257_v1 }
  0xb0   :  { %1530 = vmatprep.subr.bf16.mxu0 %v2262_v2  ;;  %1603 = vmatprep.subr.bf16.mxu1 %v2265_v3 }
  0xb3   :  { %1531 = vmatpush1.bf16.msra.mxu0 %v2260_v5  ;;  %1604 = vmatpush1.bf16.msra.mxu1 %v2263_v6 }
  0xb4   :  { %1532 = vmatprep.subr.bf16.mxu0 %v2268_v7  ;;  %1605 = vmatprep.subr.bf16.mxu1 %v2271_v8 }
  0xb7   :  { %1533 = vmatpush1.bf16.msra.mxu0 %v2266_v10  ;;  %1606 = vmatpush1.bf16.msra.mxu1 %v2269_v11 }
  0xb8   :  { %1534 = vmatprep.subr.bf16.mxu0 %v2274_v12  ;;  %1607 = vmatprep.subr.bf16.mxu1 %v2277_v13 }
  0xbb   :  { %1535 = vmatpush1.bf16.msra.mxu0 %v2272_v15  ;;  %1608 = vmatpush1.bf16.msra.mxu1 %v2275_v16 }
  0xbc   :  { %1536 = vmatprep.subr.bf16.mxu0 %v2280_v17  ;;  %1609 = vmatprep.subr.bf16.mxu1 %v2283_v18 }
  0xbf   :  { %1537 = vmatpush1.bf16.msra.mxu0 %v2278_v20  ;;  %1610 = vmatpush1.bf16.msra.mxu1 %v2281_v21 }
  0xc2   :  { %1539 = vmatmul.mubr.bf16.vlgmr.msra.gmra.mrb[32].mxu0 %v2513_v4  ;;  %1612 = vmatmul.mubr.bf16.vlgmr.msra.gmra.mrb[32].mxu1 %v2513_v4 }
  0xc3   :  { %1548 = vmatprep.mubr.bf16.mxu0 %v2530_v9  ;;  %1621 = vmatprep.mubr.bf16.mxu1 %v2530_v9 }
  0xc8   :  { %v2972_v62 = vpop.permute.xlu0 %1739 }
  0xca   :  { %1549 = vmatmul.mubr.bf16.gmra.mrb[36].mxu0 %v2551_v14  ;;  %1622 = vmatmul.mubr.bf16.gmra.mrb[36].mxu1 %v2551_v14 }
  0xcb   :  { %1558 = vmatprep.mubr.bf16.mxu0 %v2568_v19  ;;  %1631 = vmatprep.mubr.bf16.mxu1 %v2568_v19 }
  0xd2   :  { %1559 = vmatmul.mubr.bf16.gmra.mrb[40].mxu0 %v2589_v24  ;;  %1632 = vmatmul.mubr.bf16.gmra.mrb[40].mxu1 %v2589_v24 }
  0xd3   :  { %1568 = vmatprep.mubr.bf16.mxu0 %v2606_v29  ;;  %1641 = vmatprep.mubr.bf16.mxu1 %v2606_v29 }
  0xda   :  { %1569 = vmatmul.mubr.bf16.gmra.mrb[44].mxu0 %v2627_v34  ;;  %1642 = vmatmul.mubr.bf16.gmra.mrb[44].mxu1 %v2627_v34 }
 0x115   :  { %v1248_v4 = vpop.f32.mrb[0].mxu0  ;;  %v1321_v9 = vpop.f32.mrb[0].mxu1 }
 0x116   :  { %v1250_v22 = vpop.f32.mrb[1].mxu0  ;;  %v1323_v14 = vpop.f32.mrb[1].mxu1 }
 0x117   :  { %v1252_v23 = vpop.f32.mrb[2].mxu0  ;;  %v1325_v25 = vpop.f32.mrb[2].mxu1 }
 0x118   :  { %v1652_v26 = vmax.f32 %v1248_v4, %v1252_v23  ;;  %v1654_v19 = vmax.f32 %v1321_v9, %v1325_v25  ;;  %v1254_v27 = vpop.f32.mrb[3].mxu0  ;;  %v1327_v28 = vpop.f32.mrb[3].mxu1 }
 0x119   :  { %v1653_v30 = vmax.f32 %v1250_v22, %v1254_v27  ;;  %v1655_v24 = vmax.f32 %v1323_v14, %v1327_v28 }
 0x11d   :  { %v1258_v31 = vpop.f32.mrb[4].mxu0  ;;  %v1331_v32 = vpop.f32.mrb[4].mxu1 }
 0x11e   :  { %v1664_v33 = vmax.f32 %v1652_v26, %v1258_v31  ;;  %v1666_v29 = vmax.f32 %v1654_v19, %v1331_v32  ;;  %v1260_v35 = vpop.f32.mrb[5].mxu0  ;;  %v1333_v36 = vpop.f32.mrb[5].mxu1 }
 0x11f   :  { %v1665_v37 = vmax.f32 %v1653_v30, %v1260_v35  ;;  %v1667_v34 = vmax.f32 %v1655_v24, %v1333_v36  ;;  %v1262_v38 = vpop.f32.mrb[6].mxu0  ;;  %v1335_v39 = vpop.f32.mrb[6].mxu1 }
 0x120   :  { %v1676_v40 = vmax.f32 %v1664_v33, %v1262_v38  ;;  %v1678_v41 = vmax.f32 %v1666_v29, %v1335_v39  ;;  %v1264_v42 = vpop.f32.mrb[7].mxu0  ;;  %v1337_v43 = vpop.f32.mrb[7].mxu1 }
 0x121   :  { %v1677_v44 = vmax.f32 %v1665_v37, %v1264_v42  ;;  %v1679_v45 = vmax.f32 %v1667_v34, %v1337_v43 }
 0x125   :  { %v1268_v46 = vpop.f32.mrb[8].mxu0  ;;  %v1341_v47 = vpop.f32.mrb[8].mxu1 }
 0x126   :  { %v1688_v49 = vmax.f32 %v1676_v40, %v1268_v46  ;;  %v1690_v50 = vmax.f32 %v1678_v41, %v1341_v47  ;;  %v1270_v51 = vpop.f32.mrb[9].mxu0  ;;  %v1343_v52 = vpop.f32.mrb[9].mxu1 }
 0x127   :  { %v1689_v53 = vmax.f32 %v1677_v44, %v1270_v51  ;;  %v1691_v54 = vmax.f32 %v1679_v45, %v1343_v52  ;;  %v1272_v55 = vpop.f32.mrb[10].mxu0  ;;  %v1345_v48 = vpop.f32.mrb[10].mxu1 }
 0x128   :  { %v1700_v56 = vmax.f32 %v1688_v49, %v1272_v55  ;;  %v1702_v57 = vmax.f32 %v1690_v50, %v1345_v48  ;;  %v1274_v58 = vpop.f32.mrb[11].mxu0  ;;  %v1347_v59 = vpop.f32.mrb[11].mxu1 }
 0x129   :  { %v1701_v60 = vmax.f32 %v1689_v53, %v1274_v58  ;;  %v1703_v61 = vmax.f32 %v1691_v54, %v1347_v59 }
 0x12d   :  { %v1278_v63 = vpop.f32.mrb[12].mxu0  ;;  %v1351_v0 = vpop.f32.mrb[12].mxu1 }
 0x12e   :  { %v1712_v1 = vmax.f32 %v1700_v56, %v1278_v63  ;;  %v1714_v2 = vmax.f32 %v1702_v57, %v1351_v0  ;;  %v1280_v3 = vpop.f32.mrb[13].mxu0  ;;  %v1353_v5 = vpop.f32.mrb[13].mxu1 }
 0x12f   :  { %v1713_v6 = vmax.f32 %v1701_v60, %v1280_v3  ;;  %v1715_v7 = vmax.f32 %v1703_v61, %v1353_v5  ;;  %v1282_v8 = vpop.f32.mrb[14].mxu0  ;;  %v1355_v10 = vpop.f32.mrb[14].mxu1 }
 0x130   :  { %v1724_v11 = vmax.f32 %v1712_v1, %v1282_v8  ;;  %v1726_v12 = vmax.f32 %v1714_v2, %v1355_v10  ;;  %v1284_v13 = vpop.f32.mrb[15].mxu0  ;;  %v1357_v15 = vpop.f32.mrb[15].mxu1 }
 0x131   :  { %v1725_v16 = vmax.f32 %v1713_v6, %v1284_v13  ;;  %v1727_v17 = vmax.f32 %v1715_v7, %v1357_v15 }
 0x132   :  { %v1742_v18 = vadd.f32 %v2972_v62, %v1724_v11  ;;  %v1744_v20 = vadd.f32 %v2972_v62, %v1726_v12 }
 0x133   :  { %v1743_v21 = vadd.f32 %v2972_v62, %v1725_v16  ;;  %v1745_v4 = vadd.f32 %v2972_v62, %v1727_v17 }
 0x134   :  { %v1754_v9 = vmax.f32 %v1742_v18, 0.0  ;;  %v1756_v22 = vmax.f32 %v1744_v20, 0.0 }
 0x135   :  { %v1755_v14 = vmax.f32 %v1743_v21, 0.0  ;;  %v1757_v23 = vmax.f32 %v1745_v4, 0.0 }
 0x136   :  { %1766 = vst [vmem:[%s3025_s3] sm:$0xff] %v1754_v9  ;;  %1768 = vst [vmem:[%s3025_s3 + $0x10] sm:$0xff] %v1756_v22 }
 0x137   :  { %1767 = vst [vmem:[%s3025_s3 + $0x8] sm:$0xff] %v1755_v14  ;;  %1769 = vst [vmem:[%s3025_s3 + $0x18] sm:$0xff] %v1757_v23 }
 0x155   :  { %v1394_v25 = vpop.f32.mrb[16].mxu0  ;;  %v1467_v26 = vpop.f32.mrb[16].mxu1 }
 0x156   :  { %v1396_v19 = vpop.f32.mrb[17].mxu0  ;;  %v1469_v27 = vpop.f32.mrb[17].mxu1 }
 0x157   :  { %v1398_v28 = vpop.f32.mrb[18].mxu0  ;;  %v1471_v30 = vpop.f32.mrb[18].mxu1 }
 0x158   :  { %v1656_v24 = vmax.f32 %v1394_v25, %v1398_v28  ;;  %v1658_v31 = vmax.f32 %v1467_v26, %v1471_v30  ;;  %v1400_v32 = vpop.f32.mrb[19].mxu0  ;;  %v1473_v33 = vpop.f32.mrb[19].mxu1 }
 0x159   :  { %v1657_v29 = vmax.f32 %v1396_v19, %v1400_v32  ;;  %v1659_v35 = vmax.f32 %v1469_v27, %v1473_v33 }
 0x15d   :  { %v1404_v36 = vpop.f32.mrb[20].mxu0  ;;  %v1477_v37 = vpop.f32.mrb[20].mxu1 }
 0x15e   :  { %v1668_v34 = vmax.f32 %v1656_v24, %v1404_v36  ;;  %v1670_v38 = vmax.f32 %v1658_v31, %v1477_v37  ;;  %v1406_v39 = vpop.f32.mrb[21].mxu0  ;;  %v1479_v40 = vpop.f32.mrb[21].mxu1 }
 0x15f   :  { %v1669_v41 = vmax.f32 %v1657_v29, %v1406_v39  ;;  %v1671_v42 = vmax.f32 %v1659_v35, %v1479_v40  ;;  %v1408_v43 = vpop.f32.mrb[22].mxu0  ;;  %v1481_v44 = vpop.f32.mrb[22].mxu1 }
 0x160   :  { %v1680_v45 = vmax.f32 %v1668_v34, %v1408_v43  ;;  %v1682_v46 = vmax.f32 %v1670_v38, %v1481_v44  ;;  %v1410_v47 = vpop.f32.mrb[23].mxu0  ;;  %v1483_v49 = vpop.f32.mrb[23].mxu1 }
 0x161   :  { %v1681_v50 = vmax.f32 %v1669_v41, %v1410_v47  ;;  %v1683_v51 = vmax.f32 %v1671_v42, %v1483_v49 }
 0x165   :  { %v1414_v52 = vpop.f32.mrb[24].mxu0  ;;  %v1487_v53 = vpop.f32.mrb[24].mxu1 }
 0x166   :  { %v1692_v54 = vmax.f32 %v1680_v45, %v1414_v52  ;;  %v1694_v55 = vmax.f32 %v1682_v46, %v1487_v53  ;;  %v1416_v48 = vpop.f32.mrb[25].mxu0  ;;  %v1489_v56 = vpop.f32.mrb[25].mxu1 }
 0x167   :  { %v1693_v57 = vmax.f32 %v1681_v50, %v1416_v48  ;;  %v1695_v58 = vmax.f32 %v1683_v51, %v1489_v56  ;;  %v1418_v59 = vpop.f32.mrb[26].mxu0  ;;  %v1491_v60 = vpop.f32.mrb[26].mxu1 }
 0x168   :  { %v1704_v61 = vmax.f32 %v1692_v54, %v1418_v59  ;;  %v1706_v63 = vmax.f32 %v1694_v55, %v1491_v60  ;;  %v1420_v0 = vpop.f32.mrb[27].mxu0  ;;  %v1493_v1 = vpop.f32.mrb[27].mxu1 }
 0x169   :  { %v1705_v2 = vmax.f32 %v1693_v57, %v1420_v0  ;;  %v1707_v3 = vmax.f32 %v1695_v58, %v1493_v1 }
 0x16d   :  { %v1424_v5 = vpop.f32.mrb[28].mxu0  ;;  %v1497_v6 = vpop.f32.mrb[28].mxu1 }
 0x16e   :  { %v1716_v7 = vmax.f32 %v1704_v61, %v1424_v5  ;;  %v1718_v8 = vmax.f32 %v1706_v63, %v1497_v6  ;;  %v1426_v10 = vpop.f32.mrb[29].mxu0  ;;  %v1499_v11 = vpop.f32.mrb[29].mxu1 }
 0x16f   :  { %v1717_v12 = vmax.f32 %v1705_v2, %v1426_v10  ;;  %v1719_v13 = vmax.f32 %v1707_v3, %v1499_v11  ;;  %v1428_v15 = vpop.f32.mrb[30].mxu0  ;;  %v1501_v16 = vpop.f32.mrb[30].mxu1 }
 0x170   :  { %v1728_v17 = vmax.f32 %v1716_v7, %v1428_v15  ;;  %v1730_v18 = vmax.f32 %v1718_v8, %v1501_v16  ;;  %v1430_v20 = vpop.f32.mrb[31].mxu0  ;;  %v1503_v21 = vpop.f32.mrb[31].mxu1 }
 0x171   :  { %v1729_v4 = vmax.f32 %v1717_v12, %v1430_v20  ;;  %v1731_v9 = vmax.f32 %v1719_v13, %v1503_v21 }
 0x172   :  { %v1746_v22 = vadd.f32 %v2972_v62, %v1728_v17  ;;  %v1748_v14 = vadd.f32 %v2972_v62, %v1730_v18 }
 0x173   :  { %v1747_v23 = vadd.f32 %v2972_v62, %v1729_v4  ;;  %v1749_v25 = vadd.f32 %v2972_v62, %v1731_v9 }
 0x174   :  { %v1758_v26 = vmax.f32 %v1746_v22, 0.0  ;;  %v1760_v19 = vmax.f32 %v1748_v14, 0.0 }
 0x175   :  { %v1759_v27 = vmax.f32 %v1747_v23, 0.0  ;;  %v1761_v28 = vmax.f32 %v1749_v25, 0.0 }
 0x176   :  { %1770 = vst [vmem:[%s3025_s3 + $0x20] sm:$0xff] %v1758_v26  ;;  %1772 = vst [vmem:[%s3025_s3 + $0x30] sm:$0xff] %v1760_v19 }
 0x177   :  { %1771 = vst [vmem:[%s3025_s3 + $0x28] sm:$0xff] %v1759_v27  ;;  %1773 = vst [vmem:[%s3025_s3 + $0x38] sm:$0xff] %v1761_v28 }
 0x195   :  { %v1540_v30 = vpop.f32.mrb[32].mxu0  ;;  %v1613_v24 = vpop.f32.mrb[32].mxu1 }
 0x196   :  { %v1542_v31 = vpop.f32.mrb[33].mxu0  ;;  %v1615_v32 = vpop.f32.mrb[33].mxu1 }
 0x197   :  { %v1544_v33 = vpop.f32.mrb[34].mxu0  ;;  %v1617_v29 = vpop.f32.mrb[34].mxu1 }
 0x198   :  { %v1660_v35 = vmax.f32 %v1540_v30, %v1544_v33  ;;  %v1662_v36 = vmax.f32 %v1613_v24, %v1617_v29  ;;  %v1546_v37 = vpop.f32.mrb[35].mxu0  ;;  %v1619_v34 = vpop.f32.mrb[35].mxu1 }
 0x199   :  { %v1661_v38 = vmax.f32 %v1542_v31, %v1546_v37  ;;  %v1663_v39 = vmax.f32 %v1615_v32, %v1619_v34 }
 0x19d   :  { %v1550_v40 = vpop.f32.mrb[36].mxu0  ;;  %v1623_v41 = vpop.f32.mrb[36].mxu1 }
 0x19e   :  { %v1672_v42 = vmax.f32 %v1660_v35, %v1550_v40  ;;  %v1674_v43 = vmax.f32 %v1662_v36, %v1623_v41  ;;  %v1552_v44 = vpop.f32.mrb[37].mxu0  ;;  %v1625_v45 = vpop.f32.mrb[37].mxu1 }
 0x19f   :  { %v1673_v46 = vmax.f32 %v1661_v38, %v1552_v44  ;;  %v1675_v47 = vmax.f32 %v1663_v39, %v1625_v45  ;;  %v1554_v49 = vpop.f32.mrb[38].mxu0  ;;  %v1627_v50 = vpop.f32.mrb[38].mxu1 }
 0x1a0   :  { %v1684_v51 = vmax.f32 %v1672_v42, %v1554_v49  ;;  %v1686_v52 = vmax.f32 %v1674_v43, %v1627_v50  ;;  %v1556_v53 = vpop.f32.mrb[39].mxu0  ;;  %v1629_v54 = vpop.f32.mrb[39].mxu1 }
 0x1a1   :  { %v1685_v55 = vmax.f32 %v1673_v46, %v1556_v53  ;;  %v1687_v48 = vmax.f32 %v1675_v47, %v1629_v54 }
 0x1a5   :  { %v1560_v56 = vpop.f32.mrb[40].mxu0  ;;  %v1633_v57 = vpop.f32.mrb[40].mxu1 }
 0x1a6   :  { %v1696_v58 = vmax.f32 %v1684_v51, %v1560_v56  ;;  %v1698_v59 = vmax.f32 %v1686_v52, %v1633_v57  ;;  %v1562_v60 = vpop.f32.mrb[41].mxu0  ;;  %v1635_v61 = vpop.f32.mrb[41].mxu1 }
 0x1a7   :  { %v1697_v63 = vmax.f32 %v1685_v55, %v1562_v60  ;;  %v1699_v0 = vmax.f32 %v1687_v48, %v1635_v61  ;;  %v1564_v1 = vpop.f32.mrb[42].mxu0  ;;  %v1637_v2 = vpop.f32.mrb[42].mxu1 }
 0x1a8   :  { %v1708_v3 = vmax.f32 %v1696_v58, %v1564_v1  ;;  %v1710_v5 = vmax.f32 %v1698_v59, %v1637_v2  ;;  %v1566_v6 = vpop.f32.mrb[43].mxu0  ;;  %v1639_v7 = vpop.f32.mrb[43].mxu1 }
 0x1a9   :  { %v1709_v8 = vmax.f32 %v1697_v63, %v1566_v6  ;;  %v1711_v10 = vmax.f32 %v1699_v0, %v1639_v7 }
 0x1ad   :  { %v1570_v11 = vpop.f32.mrb[44].mxu0  ;;  %v1643_v12 = vpop.f32.mrb[44].mxu1 }
 0x1ae   :  { %v1720_v13 = vmax.f32 %v1708_v3, %v1570_v11  ;;  %v1722_v15 = vmax.f32 %v1710_v5, %v1643_v12  ;;  %v1572_v16 = vpop.f32.mrb[45].mxu0  ;;  %v1645_v17 = vpop.f32.mrb[45].mxu1 }
 0x1af   :  { %v1721_v18 = vmax.f32 %v1709_v8, %v1572_v16  ;;  %v1723_v20 = vmax.f32 %v1711_v10, %v1645_v17  ;;  %v1574_v21 = vpop.f32.mrb[46].mxu0  ;;  %v1647_v4 = vpop.f32.mrb[46].mxu1 }
 0x1b0   :  { %v1732_v9 = vmax.f32 %v1720_v13, %v1574_v21  ;;  %v1734_v22 = vmax.f32 %v1722_v15, %v1647_v4  ;;  %v1576_v14 = vpop.f32.mrb[47].mxu0  ;;  %v1649_v23 = vpop.f32.mrb[47].mxu1 }
 0x1b1   :  { %v1733_v25 = vmax.f32 %v1721_v18, %v1576_v14  ;;  %v1735_v26 = vmax.f32 %v1723_v20, %v1649_v23 }
 0x1b2   :  { %v1750_v19 = vadd.f32 %v2972_v62, %v1732_v9  ;;  %v1752_v27 = vadd.f32 %v2972_v62, %v1734_v22 }
 0x1b3   :  { %v1751_v28 = vadd.f32 %v2972_v62, %v1733_v25  ;;  %v1753_v30 = vadd.f32 %v2972_v62, %v1735_v26 }
 0x1b4   :  { %v1762_v24 = vmax.f32 %v1750_v19, 0.0  ;;  %v1764_v31 = vmax.f32 %v1752_v27, 0.0 }
 0x1b5   :  { %v1763_v32 = vmax.f32 %v1751_v28, 0.0  ;;  %v1765_v33 = vmax.f32 %v1753_v30, 0.0 }
 0x1b6   :  { %1774 = vst [vmem:[%s3025_s3 + $0x40] sm:$0xff] %v1762_v24  ;;  %1776 = vst [vmem:[%s3025_s3 + $0x50] sm:$0xff] %v1764_v31 }
 0x1b7   :  { %1775 = vst [vmem:[%s3025_s3 + $0x48] sm:$0xff] %v1763_v32  ;;  %1777 = vst [vmem:[%s3025_s3 + $0x58] sm:$0xff] %v1765_v33 }

// kernel: cnn_forward.6
= control target key start
LH: loop header
LB: loop body
LE: loop exit
PB: predicated region body
PF: predicated region fallthrough
CT: control target
= control target key end

     0   :  { %s2895_s0 = inlined_call_operand.vmem [shape: bf16[512,512], index: 0, kind: input, shape index: {}]   ;;  %s2896_s1 = inlined_call_operand.vmem [shape: bf16[128,512], index: 1, kind: input, shape index: {}]   ;;  %s2897_s2 = inlined_call_operand.vmem [shape: f32[16,128], index: 2, kind: input, shape index: {}]   ;;  %s2898_s3 = inlined_call_operand.vmem [shape: f32[128,512], index: 3, kind: input, shape index: {}]   ;;  %s2899_s4 = inlined_call_operand.vmem [shape: f32[16,512], index: 4, kind: output, shape index: {}]  }
   0x1   :  { %v1879_v0 = vld [vmem:[%s2895_s0 + $0x4] ss:$16 sps:$4 sm:$0xff]   ;;  %v1881_v1 = vld [vmem:[%s2895_s0 + $0xc] ss:$16 sps:$4 sm:$0xff]   ;;  %v1883_v2 = vld [vmem:[%s2895_s0] ss:$16 sps:$4 sm:$0xff]  }
   0x2   :  { %1041 = vmatprep.subr.bf16.mxu0 %v1879_v0  ;;  %v1884_v3 = vld [vmem:[%s2895_s0 + $0x8] ss:$16 sps:$4 sm:$0xff]   ;;  %1267 = vmatprep.subr.bf16.mxu1 %v1881_v1  ;;  %v1885_v4 = vld [vmem:[%s2895_s0 + $0x24] ss:$16 sps:$4 sm:$0xff]   ;;  %v1887_v5 = vld [vmem:[%s2895_s0 + $0x2c] ss:$16 sps:$4 sm:$0xff]  }
   0x3   :  { %1042 = vmatpush1.bf16.msra.mxu0 %v1883_v2  ;;  %1268 = vmatpush1.bf16.msra.mxu1 %v1884_v3  ;;  %v1889_v6 = vld [vmem:[%s2895_s0 + $0x20] ss:$16 sps:$4 sm:$0xff]   ;;  %v1890_v7 = vld [vmem:[%s2895_s0 + $0x28] ss:$16 sps:$4 sm:$0xff]   ;;  %v1891_v8 = vld [vmem:[%s2895_s0 + $0x44] ss:$16 sps:$4 sm:$0xff]  }
   0x4   :  { %1043 = vmatprep.subr.bf16.mxu0 %v1885_v4  ;;  %1269 = vmatprep.subr.bf16.mxu1 %v1887_v5  ;;  %v1893_v9 = vld [vmem:[%s2895_s0 + $0x4c] ss:$16 sps:$4 sm:$0xff]   ;;  %v1895_v10 = vld [vmem:[%s2895_s0 + $0x40] ss:$16 sps:$4 sm:$0xff]   ;;  %v1896_v11 = vld [vmem:[%s2895_s0 + $0x48] ss:$16 sps:$4 sm:$0xff]  }
   0x5   :  { %v1897_v12 = vld [vmem:[%s2895_s0 + $0x64] ss:$16 sps:$4 sm:$0xff]   ;;  %v1899_v13 = vld [vmem:[%s2895_s0 + $0x6c] ss:$16 sps:$4 sm:$0xff]   ;;  %v1901_v14 = vld [vmem:[%s2895_s0 + $0x60] ss:$16 sps:$4 sm:$0xff]  }
   0x6   :  { %v1902_v15 = vld [vmem:[%s2895_s0 + $0x68] ss:$16 sps:$4 sm:$0xff]   ;;  %v1903_v16 = vld [vmem:[%s2895_s0 + $0x84] ss:$16 sps:$4 sm:$0xff]   ;;  %v1905_v17 = vld [vmem:[%s2895_s0 + $0x8c] ss:$16 sps:$4 sm:$0xff]  }
   0x7   :  { %1044 = vmatpush1.bf16.msra.mxu0 %v1889_v6  ;;  %1270 = vmatpush1.bf16.msra.mxu1 %v1890_v7  ;;  %v1907_v18 = vld [vmem:[%s2895_s0 + $0x80] ss:$16 sps:$4 sm:$0xff]   ;;  %v1908_v19 = vld [vmem:[%s2895_s0 + $0x88] ss:$16 sps:$4 sm:$0xff]   ;;  %v1909_v20 = vld [vmem:[%s2895_s0 + $0xa4] ss:$16 sps:$4 sm:$0xff]  }
   0x8   :  { %1045 = vmatprep.subr.bf16.mxu0 %v1891_v8  ;;  %1271 = vmatprep.subr.bf16.mxu1 %v1893_v9  ;;  %v1911_v21 = vld [vmem:[%s2895_s0 + $0xac] ss:$16 sps:$4 sm:$0xff]   ;;  %v1913_v22 = vld [vmem:[%s2895_s0 + $0xa0] ss:$16 sps:$4 sm:$0xff]   ;;  %v1914_v23 = vld [vmem:[%s2895_s0 + $0xa8] ss:$16 sps:$4 sm:$0xff]  }
   0x9   :  { %v1915_v24 = vld [vmem:[%s2895_s0 + $0xc4] ss:$16 sps:$4 sm:$0xff]   ;;  %v1917_v25 = vld [vmem:[%s2895_s0 + $0xcc] ss:$16 sps:$4 sm:$0xff]   ;;  %v1919_v26 = vld [vmem:[%s2895_s0 + $0xc0] ss:$16 sps:$4 sm:$0xff]  }
   0xa   :  { %v1920_v27 = vld [vmem:[%s2895_s0 + $0xc8] ss:$16 sps:$4 sm:$0xff]   ;;  %v1921_v28 = vld [vmem:[%s2895_s0 + $0xe4] ss:$16 sps:$4 sm:$0xff]   ;;  %v1923_v29 = vld [vmem:[%s2895_s0 + $0xec] ss:$16 sps:$4 sm:$0xff]  }
   0xb   :  { %1046 = vmatpush1.bf16.msra.mxu0 %v1895_v10  ;;  %1272 = vmatpush1.bf16.msra.mxu1 %v1896_v11  ;;  %v1925_v30 = vld [vmem:[%s2895_s0 + $0xe0] ss:$16 sps:$4 sm:$0xff]   ;;  %v1926_v31 = vld [vmem:[%s2895_s0 + $0xe8] ss:$16 sps:$4 sm:$0xff]   ;;  %v1927_v32 = vld [vmem:[%s2895_s0 + $0x104] ss:$16 sps:$4 sm:$0xff]  }
   0xc   :  { %1047 = vmatprep.subr.bf16.mxu0 %v1897_v12  ;;  %1273 = vmatprep.subr.bf16.mxu1 %v1899_v13  ;;  %v1929_v33 = vld [vmem:[%s2895_s0 + $0x10c] ss:$16 sps:$4 sm:$0xff]   ;;  %v1931_v34 = vld [vmem:[%s2895_s0 + $0x100] ss:$16 sps:$4 sm:$0xff]   ;;  %v1932_v35 = vld [vmem:[%s2895_s0 + $0x108] ss:$16 sps:$4 sm:$0xff]  }
   0xd   :  { %v1933_v36 = vld [vmem:[%s2895_s0 + $0x124] ss:$16 sps:$4 sm:$0xff]   ;;  %v1935_v37 = vld [vmem:[%s2895_s0 + $0x12c] ss:$16 sps:$4 sm:$0xff]   ;;  %v1937_v38 = vld [vmem:[%s2895_s0 + $0x120] ss:$16 sps:$4 sm:$0xff]  }
   0xe   :  { %v1938_v39 = vld [vmem:[%s2895_s0 + $0x128] ss:$16 sps:$4 sm:$0xff]   ;;  %v1939_v40 = vld [vmem:[%s2895_s0 + $0x144] ss:$16 sps:$4 sm:$0xff]   ;;  %v1941_v41 = vld [vmem:[%s2895_s0 + $0x14c] ss:$16 sps:$4 sm:$0xff]  }
   0xf   :  { %1048 = vmatpush1.bf16.msra.mxu0 %v1901_v14  ;;  %1274 = vmatpush1.bf16.msra.mxu1 %v1902_v15  ;;  %v1943_v42 = vld [vmem:[%s2895_s0 + $0x140] ss:$16 sps:$4 sm:$0xff]   ;;  %v1944_v43 = vld [vmem:[%s2895_s0 + $0x148] ss:$16 sps:$4 sm:$0xff]   ;;  %v1945_v44 = vld [vmem:[%s2895_s0 + $0x164] ss:$16 sps:$4 sm:$0xff]  }
  0x10   :  { %1049 = vmatprep.subr.bf16.mxu0 %v1903_v16  ;;  %1275 = vmatprep.subr.bf16.mxu1 %v1905_v17  ;;  %v1947_v45 = vld [vmem:[%s2895_s0 + $0x16c] ss:$16 sps:$4 sm:$0xff]   ;;  %v1949_v46 = vld [vmem:[%s2895_s0 + $0x160] ss:$16 sps:$4 sm:$0xff]   ;;  %v1950_v47 = vld [vmem:[%s2895_s0 + $0x168] ss:$16 sps:$4 sm:$0xff]  }
  0x11   :  { %v1977_v48 = vld [vmem:[%s2896_s1 + $0x4] ss:$16 sps:$4 sm:$0xff]   ;;  %v1953_v50 = vld [vmem:[%s2895_s0 + $0x18c] ss:$16 sps:$4 sm:$0xff]   ;;  %v1955_v51 = vld [vmem:[%s2895_s0 + $0x180] ss:$16 sps:$4 sm:$0xff]  }
  0x12   :  { %v1951_v49 = vld [vmem:[%s2895_s0 + $0x184] ss:$16 sps:$4 sm:$0xff]   ;;  %1073 = vmatprep.mubr.bf16.mxu0 %v1977_v48  ;;  %1299 = vmatprep.mubr.bf16.mxu1 %v1977_v48  ;;  %v1956_v52 = vld [vmem:[%s2895_s0 + $0x188] ss:$16 sps:$4 sm:$0xff]   ;;  %v1959_v54 = vld [vmem:[%s2895_s0 + $0x1ac] ss:$16 sps:$4 sm:$0xff]  }
  0x13   :  { %1050 = vmatpush1.bf16.msra.mxu0 %v1907_v18  ;;  %1276 = vmatpush1.bf16.msra.mxu1 %v1908_v19  ;;  %v1957_v53 = vld [vmem:[%s2895_s0 + $0x1a4] ss:$16 sps:$4 sm:$0xff]   ;;  %v1961_v55 = vld [vmem:[%s2895_s0 + $0x1a0] ss:$16 sps:$4 sm:$0xff]   ;;  %v1962_v56 = vld [vmem:[%s2895_s0 + $0x1a8] ss:$16 sps:$4 sm:$0xff]  }
  0x14   :  { %1051 = vmatprep.subr.bf16.mxu0 %v1909_v20  ;;  %1277 = vmatprep.subr.bf16.mxu1 %v1911_v21  ;;  %v1963_v57 = vld [vmem:[%s2895_s0 + $0x1c4] ss:$16 sps:$4 sm:$0xff]   ;;  %v1965_v58 = vld [vmem:[%s2895_s0 + $0x1cc] ss:$16 sps:$4 sm:$0xff]   ;;  %v1967_v59 = vld [vmem:[%s2895_s0 + $0x1c0] ss:$16 sps:$4 sm:$0xff]  }
  0x15   :  { %v1968_v60 = vld [vmem:[%s2895_s0 + $0x1c8] ss:$16 sps:$4 sm:$0xff]   ;;  %v1969_v61 = vld [vmem:[%s2895_s0 + $0x1e4] ss:$16 sps:$4 sm:$0xff]   ;;  %v1971_v62 = vld [vmem:[%s2895_s0 + $0x1ec] ss:$16 sps:$4 sm:$0xff]  }
  0x16   :  { %v1973_v63 = vld [vmem:[%s2895_s0 + $0x1e0] ss:$16 sps:$4 sm:$0xff]   ;;  %v1974_v0 = vld [vmem:[%s2895_s0 + $0x1e8] ss:$16 sps:$4 sm:$0xff]   ;;  %v1980_v1 = vld [vmem:[%s2895_s0 + $0x204] ss:$16 sps:$4 sm:$0xff]  }
  0x17   :  { %1052 = vmatpush1.bf16.msra.mxu0 %v1913_v22  ;;  %1278 = vmatpush1.bf16.msra.mxu1 %v1914_v23  ;;  %v1983_v2 = vld [vmem:[%s2895_s0 + $0x20c] ss:$16 sps:$4 sm:$0xff]   ;;  %v1975_v3 = vld [vmem:[%s2896_s1] ss:$16 sps:$4 sm:$0xff]   ;;  %v2119_v4 = vmov 0  }
  0x18   :  { %1053 = vmatprep.subr.bf16.mxu0 %v1915_v24  ;;  %1279 = vmatprep.subr.bf16.mxu1 %v1917_v25  ;;  %v1978_v5 = vld [vmem:[%s2895_s0 + $0x200] ss:$16 sps:$4 sm:$0xff]   ;;  %v1981_v6 = vld [vmem:[%s2895_s0 + $0x208] ss:$16 sps:$4 sm:$0xff]   ;;  %v1986_v7 = vld [vmem:[%s2895_s0 + $0x224] ss:$16 sps:$4 sm:$0xff]  }
  0x19   :  { %1878 = vset.pattern.permute.xlu0 %v2119_v4  ;;  %v1989_v8 = vld [vmem:[%s2895_s0 + $0x22c] ss:$16 sps:$4 sm:$0xff]   ;;  %v1990_v9 = vld [vmem:[%s2896_s1 + $0x24] ss:$16 sps:$4 sm:$0xff]   ;;  %v1984_v10 = vld [vmem:[%s2895_s0 + $0x220] ss:$16 sps:$4 sm:$0xff]  }
  0x1a   :  { %v1987_v11 = vld [vmem:[%s2895_s0 + $0x228] ss:$16 sps:$4 sm:$0xff]   ;;  %v1995_v12 = vld [vmem:[%s2895_s0 + $0x244] ss:$16 sps:$4 sm:$0xff]   ;;  %v1998_v13 = vld [vmem:[%s2895_s0 + $0x24c] ss:$16 sps:$4 sm:$0xff]  }
  0x1b   :  { %1054 = vmatpush1.bf16.msra.mxu0 %v1919_v26  ;;  %1280 = vmatpush1.bf16.msra.mxu1 %v1920_v27  ;;  %v1992_v14 = vld [vmem:[%s2896_s1 + $0x20] ss:$16 sps:$4 sm:$0xff]   ;;  %v1996_v16 = vld [vmem:[%s2895_s0 + $0x248] ss:$16 sps:$4 sm:$0xff]   ;;  %v2001_v17 = vld [vmem:[%s2895_s0 + $0x264] ss:$16 sps:$4 sm:$0xff]  }
  0x1c   :  { %1055 = vmatprep.subr.bf16.mxu0 %v1921_v28  ;;  %1281 = vmatprep.subr.bf16.mxu1 %v1923_v29  ;;  %v1993_v15 = vld [vmem:[%s2895_s0 + $0x240] ss:$16 sps:$4 sm:$0xff]   ;;  %v2004_v18 = vld [vmem:[%s2895_s0 + $0x26c] ss:$16 sps:$4 sm:$0xff]   ;;  %v2005_v19 = vld [vmem:[%s2896_s1 + $0x44] ss:$16 sps:$4 sm:$0xff]  }
  0x1d   :  { %v1999_v20 = vld [vmem:[%s2895_s0 + $0x260] ss:$16 sps:$4 sm:$0xff]   ;;  %v2002_v21 = vld [vmem:[%s2895_s0 + $0x268] ss:$16 sps:$4 sm:$0xff]   ;;  %v2010_v22 = vld [vmem:[%s2895_s0 + $0x284] ss:$16 sps:$4 sm:$0xff]  }
  0x1e   :  { %v2013_v23 = vld [vmem:[%s2895_s0 + $0x28c] ss:$16 sps:$4 sm:$0xff]   ;;  %v2007_v24 = vld [vmem:[%s2896_s1 + $0x40] ss:$16 sps:$4 sm:$0xff]   ;;  %v2011_v26 = vld [vmem:[%s2895_s0 + $0x288] ss:$16 sps:$4 sm:$0xff]  }
  0x1f   :  { %1056 = vmatpush1.bf16.msra.mxu0 %v1925_v30  ;;  %1282 = vmatpush1.bf16.msra.mxu1 %v1926_v31  ;;  %v2008_v25 = vld [vmem:[%s2895_s0 + $0x280] ss:$16 sps:$4 sm:$0xff]   ;;  %v2016_v27 = vld [vmem:[%s2895_s0 + $0x2a4] ss:$16 sps:$4 sm:$0xff]   ;;  %v2019_v28 = vld [vmem:[%s2895_s0 + $0x2ac] ss:$16 sps:$4 sm:$0xff]  }
  0x20   :  { %1057 = vmatprep.subr.bf16.mxu0 %v1927_v32  ;;  %1283 = vmatprep.subr.bf16.mxu1 %v1929_v33  ;;  %v2020_v29 = vld [vmem:[%s2896_s1 + $0x64] ss:$16 sps:$4 sm:$0xff]   ;;  %v2014_v30 = vld [vmem:[%s2895_s0 + $0x2a0] ss:$16 sps:$4 sm:$0xff]   ;;  %v2017_v31 = vld [vmem:[%s2895_s0 + $0x2a8] ss:$16 sps:$4 sm:$0xff]  }
  0x21   :  { %v2025_v32 = vld [vmem:[%s2895_s0 + $0x2c4] ss:$16 sps:$4 sm:$0xff]   ;;  %v2028_v33 = vld [vmem:[%s2895_s0 + $0x2cc] ss:$16 sps:$4 sm:$0xff]  }
  0x22   :  { %v2049_v48 = vld [vmem:[%s2895_s0 + $0x32c] ss:$16 sps:$4 sm:$0xff]   ;;  %v2076_v4 = vld [vmem:[%s2895_s0 + $0x3a4] ss:$16 sps:$4 sm:$0xff]  }
  0x23   :  { %1058 = vmatpush1.bf16.msra.mxu0 %v1931_v34  ;;  %1284 = vmatpush1.bf16.msra.mxu1 %v1932_v35  ;;  %v2022_v34 = vld [vmem:[%s2896_s1 + $0x60] ss:$16 sps:$4 sm:$0xff]  }
  0x24   :  { %1059 = vmatprep.subr.bf16.mxu0 %v1933_v36  ;;  %1285 = vmatprep.subr.bf16.mxu1 %v1935_v37  ;;  %v2023_v35 = vld [vmem:[%s2895_s0 + $0x2c0] ss:$16 sps:$4 sm:$0xff]   ;;  %v2026_v36 = vld [vmem:[%s2895_s0 + $0x2c8] ss:$16 sps:$4 sm:$0xff]   ;;  %v2031_v37 = vld [vmem:[%s2895_s0 + $0x2e4] ss:$16 sps:$4 sm:$0xff]  }
  0x27   :  { %1060 = vmatpush1.bf16.msra.mxu0 %v1937_v38  ;;  %1286 = vmatpush1.bf16.msra.mxu1 %v1938_v39  ;;  %v2034_v38 = vld [vmem:[%s2895_s0 + $0x2ec] ss:$16 sps:$4 sm:$0xff]   ;;  %v2035_v39 = vld [vmem:[%s2896_s1 + $0x84] ss:$16 sps:$4 sm:$0xff]  }
  0x28   :  { %1061 = vmatprep.subr.bf16.mxu0 %v1939_v40  ;;  %1287 = vmatprep.subr.bf16.mxu1 %v1941_v41  ;;  %v2029_v40 = vld [vmem:[%s2895_s0 + $0x2e0] ss:$16 sps:$4 sm:$0xff]   ;;  %v2032_v41 = vld [vmem:[%s2895_s0 + $0x2e8] ss:$16 sps:$4 sm:$0xff]  }
  0x2b   :  { %1062 = vmatpush1.bf16.msra.mxu0 %v1943_v42  ;;  %1288 = vmatpush1.bf16.msra.mxu1 %v1944_v43  ;;  %v2040_v42 = vld [vmem:[%s2895_s0 + $0x304] ss:$16 sps:$4 sm:$0xff]   ;;  %v2043_v43 = vld [vmem:[%s2895_s0 + $0x30c] ss:$16 sps:$4 sm:$0xff]  }
  0x2c   :  { %1063 = vmatprep.subr.bf16.mxu0 %v1945_v44  ;;  %1289 = vmatprep.subr.bf16.mxu1 %v1947_v45  ;;  %v2037_v44 = vld [vmem:[%s2896_s1 + $0x80] ss:$16 sps:$4 sm:$0xff]  }
  0x2d   :  { %v2038_v45 = vld [vmem:[%s2895_s0 + $0x300] ss:$16 sps:$4 sm:$0xff]  }
  0x2f   :  { %1064 = vmatpush1.bf16.msra.mxu0 %v1949_v46  ;;  %1290 = vmatpush1.bf16.msra.mxu1 %v1950_v47  ;;  %v2041_v46 = vld [vmem:[%s2895_s0 + $0x308] ss:$16 sps:$4 sm:$0xff]   ;;  %v2046_v47 = vld [vmem:[%s2895_s0 + $0x324] ss:$16 sps:$4 sm:$0xff]  }
  0x30   :  { %1065 = vmatprep.subr.bf16.mxu0 %v1951_v49  ;;  %1291 = vmatprep.subr.bf16.mxu1 %v1953_v50  ;;  %v2050_v49 = vld [vmem:[%s2896_s1 + $0xa4] ss:$16 sps:$4 sm:$0xff]   ;;  %v2044_v50 = vld [vmem:[%s2895_s0 + $0x320] ss:$16 sps:$4 sm:$0xff]  }
  0x33   :  { %1066 = vmatpush1.bf16.msra.mxu0 %v1955_v51  ;;  %1292 = vmatpush1.bf16.msra.mxu1 %v1956_v52  ;;  %v2047_v51 = vld [vmem:[%s2895_s0 + $0x328] ss:$16 sps:$4 sm:$0xff]   ;;  %v2055_v52 = vld [vmem:[%s2895_s0 + $0x344] ss:$16 sps:$4 sm:$0xff]  }
  0x34   :  { %1067 = vmatprep.subr.bf16.mxu0 %v1957_v53  ;;  %1293 = vmatprep.subr.bf16.mxu1 %v1959_v54  ;;  %v2058_v53 = vld [vmem:[%s2895_s0 + $0x34c] ss:$16 sps:$4 sm:$0xff]   ;;  %v2052_v54 = vld [vmem:[%s2896_s1 + $0xa0] ss:$16 sps:$4 sm:$0xff]  }
  0x37   :  { %1068 = vmatpush1.bf16.msra.mxu0 %v1961_v55  ;;  %1294 = vmatpush1.bf16.msra.mxu1 %v1962_v56  ;;  %v2053_v55 = vld [vmem:[%s2895_s0 + $0x340] ss:$16 sps:$4 sm:$0xff]   ;;  %v2056_v56 = vld [vmem:[%s2895_s0 + $0x348] ss:$16 sps:$4 sm:$0xff]  }
  0x38   :  { %1069 = vmatprep.subr.bf16.mxu0 %v1963_v57  ;;  %1295 = vmatprep.subr.bf16.mxu1 %v1965_v58  ;;  %v2061_v57 = vld [vmem:[%s2895_s0 + $0x364] ss:$16 sps:$4 sm:$0xff]   ;;  %v2064_v58 = vld [vmem:[%s2895_s0 + $0x36c] ss:$16 sps:$4 sm:$0xff]  }
  0x3b   :  { %1070 = vmatpush1.bf16.msra.mxu0 %v1967_v59  ;;  %1296 = vmatpush1.bf16.msra.mxu1 %v1968_v60  ;;  %v2065_v59 = vld [vmem:[%s2896_s1 + $0xc4] ss:$16 sps:$4 sm:$0xff]   ;;  %v2059_v60 = vld [vmem:[%s2895_s0 + $0x360] ss:$16 sps:$4 sm:$0xff]  }
  0x3c   :  { %1071 = vmatprep.subr.bf16.mxu0 %v1969_v61  ;;  %1297 = vmatprep.subr.bf16.mxu1 %v1971_v62  ;;  %v2062_v61 = vld [vmem:[%s2895_s0 + $0x368] ss:$16 sps:$4 sm:$0xff]   ;;  %v1549_v62 = vld [vmem:[%s2897_s2] sm:$0xff] }
  0x3d   :  { %1553 = vperm.xlu0 %1878, %v1549_v62   ;;  %v191_v62 = vld [vmem:[%s2898_s3 + $0x70] sm:$0xff] }
  0x3f   :  { %1072 = vmatpush1.bf16.msra.mxu0 %v1973_v63  ;;  %1298 = vmatpush1.bf16.msra.mxu1 %v1974_v0  ;;  %v2070_v63 = vld [vmem:[%s2895_s0 + $0x384] ss:$16 sps:$4 sm:$0xff]   ;;  %v2073_v0 = vld [vmem:[%s2895_s0 + $0x38c] ss:$16 sps:$4 sm:$0xff]  }
  0x40   :  { %1154 = vmatprep.subr.bf16.mxu0 %v1980_v1  ;;  %1380 = vmatprep.subr.bf16.mxu1 %v1983_v2  ;;  %v2067_v1 = vld [vmem:[%s2896_s1 + $0xc0] ss:$16 sps:$4 sm:$0xff]  }
  0x41   :  { %v2068_v2 = vld [vmem:[%s2895_s0 + $0x380] ss:$16 sps:$4 sm:$0xff]  }
  0x42   :  { %1074 = vmatmul.mubr.bf16.vlgmr.msra.gmra.mrb[0].mxu0 %v1975_v3  ;;  %1300 = vmatmul.mubr.bf16.vlgmr.msra.gmra.mrb[0].mxu1 %v1975_v3  ;;  %v2071_v3 = vld [vmem:[%s2895_s0 + $0x388] ss:$16 sps:$4 sm:$0xff]  }
  0x43   :  { %1155 = vmatpush1.bf16.msra.mxu0 %v1978_v5  ;;  %1381 = vmatpush1.bf16.msra.mxu1 %v1981_v6  ;;  %v2079_v5 = vld [vmem:[%s2895_s0 + $0x3ac] ss:$16 sps:$4 sm:$0xff]   ;;  %v2080_v6 = vld [vmem:[%s2896_s1 + $0xe4] ss:$16 sps:$4 sm:$0xff]  }
  0x44   :  { %1156 = vmatprep.subr.bf16.mxu0 %v1986_v7  ;;  %1382 = vmatprep.subr.bf16.mxu1 %v1989_v8  ;;  %v2074_v7 = vld [vmem:[%s2895_s0 + $0x3a0] ss:$16 sps:$4 sm:$0xff]   ;;  %v2077_v8 = vld [vmem:[%s2895_s0 + $0x3a8] ss:$16 sps:$4 sm:$0xff]  }
  0x45   :  { %1083 = vmatprep.mubr.bf16.mxu0 %v1990_v9  ;;  %1309 = vmatprep.mubr.bf16.mxu1 %v1990_v9  ;;  %v1550_v9 = vld [vmem:[%s2897_s2 + $0x8] sm:$0xff] }
  0x46   :  { %1558 = vperm.xlu0 %1878, %v1550_v9  }
  0x47   :  { %1157 = vmatpush1.bf16.msra.mxu0 %v1984_v10  ;;  %1383 = vmatpush1.bf16.msra.mxu1 %v1987_v11  ;;  %v2085_v10 = vld [vmem:[%s2895_s0 + $0x3c4] ss:$16 sps:$4 sm:$0xff]   ;;  %v2088_v11 = vld [vmem:[%s2895_s0 + $0x3cc] ss:$16 sps:$4 sm:$0xff]  }
  0x48   :  { %1158 = vmatprep.subr.bf16.mxu0 %v1995_v12  ;;  %1384 = vmatprep.subr.bf16.mxu1 %v1998_v13  ;;  %v2082_v12 = vld [vmem:[%s2896_s1 + $0xe0] ss:$16 sps:$4 sm:$0xff]  }
  0x49   :  { %v2083_v13 = vld [vmem:[%s2895_s0 + $0x3c0] ss:$16 sps:$4 sm:$0xff]  }
  0x4a   :  { %1084 = vmatmul.mubr.bf16.gmra.mrb[4].mxu0 %v1992_v14  ;;  %1310 = vmatmul.mubr.bf16.gmra.mrb[4].mxu1 %v1992_v14  ;;  %v2086_v14 = vld [vmem:[%s2895_s0 + $0x3c8] ss:$16 sps:$4 sm:$0xff]  }
  0x4b   :  { %1159 = vmatpush1.bf16.msra.mxu0 %v1993_v15  ;;  %1385 = vmatpush1.bf16.msra.mxu1 %v1996_v16  ;;  %v2091_v15 = vld [vmem:[%s2895_s0 + $0x3e4] ss:$16 sps:$4 sm:$0xff]   ;;  %v2094_v16 = vld [vmem:[%s2895_s0 + $0x3ec] ss:$16 sps:$4 sm:$0xff]  }
  0x4c   :  { %1160 = vmatprep.subr.bf16.mxu0 %v2001_v17  ;;  %1386 = vmatprep.subr.bf16.mxu1 %v2004_v18  ;;  %v2097_v17 = vld [vmem:[%s2896_s1 + $0xc] ss:$16 sps:$4 sm:$0xff]   ;;  %v2089_v18 = vld [vmem:[%s2895_s0 + $0x3e0] ss:$16 sps:$4 sm:$0xff]  }
  0x4d   :  { %1093 = vmatprep.mubr.bf16.mxu0 %v2005_v19  ;;  %1319 = vmatprep.mubr.bf16.mxu1 %v2005_v19  ;;  %v2092_v19 = vld [vmem:[%s2895_s0 + $0x3e8] ss:$16 sps:$4 sm:$0xff]  }
  0x4f   :  { %1161 = vmatpush1.bf16.msra.mxu0 %v1999_v20  ;;  %1387 = vmatpush1.bf16.msra.mxu1 %v2002_v21  ;;  %v2095_v20 = vld [vmem:[%s2896_s1 + $0x8] ss:$16 sps:$4 sm:$0xff]   ;;  %v2098_v21 = vld [vmem:[%s2896_s1 + $0x2c] ss:$16 sps:$4 sm:$0xff]  }
  0x50   :  { %1162 = vmatprep.subr.bf16.mxu0 %v2010_v22  ;;  %1388 = vmatprep.subr.bf16.mxu1 %v2013_v23  ;;  %v2100_v22 = vld [vmem:[%s2896_s1 + $0x28] ss:$16 sps:$4 sm:$0xff]   ;;  %v2101_v23 = vld [vmem:[%s2896_s1 + $0x4c] ss:$16 sps:$4 sm:$0xff]  }
  0x52   :  { %1094 = vmatmul.mubr.bf16.gmra.mrb[8].mxu0 %v2007_v24  ;;  %1320 = vmatmul.mubr.bf16.gmra.mrb[8].mxu1 %v2007_v24  ;;  %v2103_v24 = vld [vmem:[%s2896_s1 + $0x48] ss:$16 sps:$4 sm:$0xff]  }
  0x53   :  { %1163 = vmatpush1.bf16.msra.mxu0 %v2008_v25  ;;  %1389 = vmatpush1.bf16.msra.mxu1 %v2011_v26  ;;  %v2104_v25 = vld [vmem:[%s2896_s1 + $0x6c] ss:$16 sps:$4 sm:$0xff]   ;;  %v2106_v26 = vld [vmem:[%s2896_s1 + $0x68] ss:$16 sps:$4 sm:$0xff]  }
  0x54   :  { %1164 = vmatprep.subr.bf16.mxu0 %v2016_v27  ;;  %1390 = vmatprep.subr.bf16.mxu1 %v2019_v28  ;;  %v2107_v27 = vld [vmem:[%s2896_s1 + $0x8c] ss:$16 sps:$4 sm:$0xff]   ;;  %v2109_v28 = vld [vmem:[%s2896_s1 + $0x88] ss:$16 sps:$4 sm:$0xff]  }
  0x55   :  { %1103 = vmatprep.mubr.bf16.mxu0 %v2020_v29  ;;  %1329 = vmatprep.mubr.bf16.mxu1 %v2020_v29  ;;  %v2110_v29 = vld [vmem:[%s2896_s1 + $0xac] ss:$16 sps:$4 sm:$0xff]  }
  0x57   :  { %1165 = vmatpush1.bf16.msra.mxu0 %v2014_v30  ;;  %1391 = vmatpush1.bf16.msra.mxu1 %v2017_v31  ;;  %v2112_v30 = vld [vmem:[%s2896_s1 + $0xa8] ss:$16 sps:$4 sm:$0xff]   ;;  %v2113_v31 = vld [vmem:[%s2896_s1 + $0xcc] ss:$16 sps:$4 sm:$0xff]  }
  0x58   :  { %1166 = vmatprep.subr.bf16.mxu0 %v2025_v32  ;;  %1392 = vmatprep.subr.bf16.mxu1 %v2028_v33  ;;  %v2115_v32 = vld [vmem:[%s2896_s1 + $0xc8] ss:$16 sps:$4 sm:$0xff]   ;;  %v2116_v33 = vld [vmem:[%s2896_s1 + $0xec] ss:$16 sps:$4 sm:$0xff]  }
  0x5a   :  { %1104 = vmatmul.mubr.bf16.gmra.mrb[12].mxu0 %v2022_v34  ;;  %1330 = vmatmul.mubr.bf16.gmra.mrb[12].mxu1 %v2022_v34  ;;  %v2118_v34 = vld [vmem:[%s2896_s1 + $0xe8] ss:$16 sps:$4 sm:$0xff]  }
  0x5b   :  { %1167 = vmatpush1.bf16.msra.mxu0 %v2023_v35  ;;  %1393 = vmatpush1.bf16.msra.mxu1 %v2026_v36 }
  0x5c   :  { %1168 = vmatprep.subr.bf16.mxu0 %v2031_v37  ;;  %1394 = vmatprep.subr.bf16.mxu1 %v2034_v38 }
  0x5d   :  { %1113 = vmatprep.mubr.bf16.mxu0 %v2035_v39  ;;  %1339 = vmatprep.mubr.bf16.mxu1 %v2035_v39 }
  0x5f   :  { %1169 = vmatpush1.bf16.msra.mxu0 %v2029_v40  ;;  %1395 = vmatpush1.bf16.msra.mxu1 %v2032_v41 }
  0x60   :  { %1170 = vmatprep.subr.bf16.mxu0 %v2040_v42  ;;  %1396 = vmatprep.subr.bf16.mxu1 %v2043_v43  ;;  %v177_v43 = vld [vmem:[%s2898_s3] sm:$0xff] }
  0x62   :  { %1114 = vmatmul.mubr.bf16.gmra.mrb[16].mxu0 %v2037_v44  ;;  %1340 = vmatmul.mubr.bf16.gmra.mrb[16].mxu1 %v2037_v44  ;;  %v179_v44 = vld [vmem:[%s2898_s3 + $0x10] sm:$0xff] }
  0x63   :  { %1171 = vmatpush1.bf16.msra.mxu0 %v2038_v45  ;;  %1397 = vmatpush1.bf16.msra.mxu1 %v2041_v46  ;;  %v178_v45 = vld [vmem:[%s2898_s3 + $0x8] sm:$0xff]  ;;  %v180_v46 = vld [vmem:[%s2898_s3 + $0x18] sm:$0xff] }
  0x64   :  { %1172 = vmatprep.subr.bf16.mxu0 %v2046_v47  ;;  %1398 = vmatprep.subr.bf16.mxu1 %v2049_v48  ;;  %v181_v47 = vld [vmem:[%s2898_s3 + $0x20] sm:$0xff]  ;;  %v183_v48 = vld [vmem:[%s2898_s3 + $0x30] sm:$0xff] }
  0x65   :  { %1123 = vmatprep.mubr.bf16.mxu0 %v2050_v49  ;;  %1349 = vmatprep.mubr.bf16.mxu1 %v2050_v49  ;;  %v182_v49 = vld [vmem:[%s2898_s3 + $0x28] sm:$0xff] }
  0x67   :  { %1173 = vmatpush1.bf16.msra.mxu0 %v2044_v50  ;;  %1399 = vmatpush1.bf16.msra.mxu1 %v2047_v51  ;;  %v185_v50 = vld [vmem:[%s2898_s3 + $0x40] sm:$0xff]  ;;  %v187_v51 = vld [vmem:[%s2898_s3 + $0x50] sm:$0xff] }
  0x68   :  { %1174 = vmatprep.subr.bf16.mxu0 %v2055_v52  ;;  %1400 = vmatprep.subr.bf16.mxu1 %v2058_v53  ;;  %v184_v52 = vld [vmem:[%s2898_s3 + $0x38] sm:$0xff]  ;;  %v186_v53 = vld [vmem:[%s2898_s3 + $0x48] sm:$0xff] }
  0x6a   :  { %1124 = vmatmul.mubr.bf16.gmra.mrb[20].mxu0 %v2052_v54  ;;  %1350 = vmatmul.mubr.bf16.gmra.mrb[20].mxu1 %v2052_v54  ;;  %v188_v54 = vld [vmem:[%s2898_s3 + $0x58] sm:$0xff] }
  0x6b   :  { %1175 = vmatpush1.bf16.msra.mxu0 %v2053_v55  ;;  %1401 = vmatpush1.bf16.msra.mxu1 %v2056_v56 }
  0x6c   :  { %1176 = vmatprep.subr.bf16.mxu0 %v2061_v57  ;;  %1402 = vmatprep.subr.bf16.mxu1 %v2064_v58 }
  0x6d   :  { %1133 = vmatprep.mubr.bf16.mxu0 %v2065_v59  ;;  %1359 = vmatprep.mubr.bf16.mxu1 %v2065_v59 }
  0x6f   :  { %1177 = vmatpush1.bf16.msra.mxu0 %v2059_v60  ;;  %1403 = vmatpush1.bf16.msra.mxu1 %v2062_v61  ;;  %v189_v61 = vld [vmem:[%s2898_s3 + $0x60] sm:$0xff] }
  0x70   :  { %1178 = vmatprep.subr.bf16.mxu0 %v2070_v63  ;;  %1404 = vmatprep.subr.bf16.mxu1 %v2073_v0 }
  0x72   :  { %1134 = vmatmul.mubr.bf16.gmra.mrb[24].mxu0 %v2067_v1  ;;  %1360 = vmatmul.mubr.bf16.gmra.mrb[24].mxu1 %v2067_v1 }
  0x73   :  { %1179 = vmatpush1.bf16.msra.mxu0 %v2068_v2  ;;  %1405 = vmatpush1.bf16.msra.mxu1 %v2071_v3 }
  0x74   :  { %1180 = vmatprep.subr.bf16.mxu0 %v2076_v4  ;;  %1406 = vmatprep.subr.bf16.mxu1 %v2079_v5  ;;  %v190_v5 = vld [vmem:[%s2898_s3 + $0x68] sm:$0xff] }
  0x75   :  { %1143 = vmatprep.mubr.bf16.mxu0 %v2080_v6  ;;  %1369 = vmatprep.mubr.bf16.mxu1 %v2080_v6  ;;  %v192_v6 = vld [vmem:[%s2898_s3 + $0x78] sm:$0xff] }
  0x77   :  { %1181 = vmatpush1.bf16.msra.mxu0 %v2074_v7  ;;  %1407 = vmatpush1.bf16.msra.mxu1 %v2077_v8 }
  0x78   :  { %1182 = vmatprep.subr.bf16.mxu0 %v2085_v10  ;;  %1408 = vmatprep.subr.bf16.mxu1 %v2088_v11 }
  0x7a   :  { %1144 = vmatmul.mubr.bf16.gmra.mrb[28].mxu0 %v2082_v12  ;;  %1370 = vmatmul.mubr.bf16.gmra.mrb[28].mxu1 %v2082_v12 }
  0x7b   :  { %1183 = vmatpush1.bf16.msra.mxu0 %v2083_v13  ;;  %1409 = vmatpush1.bf16.msra.mxu1 %v2086_v14 }
  0x7c   :  { %1184 = vmatprep.subr.bf16.mxu0 %v2091_v15  ;;  %1410 = vmatprep.subr.bf16.mxu1 %v2094_v16 }
  0x7d   :  { %1186 = vmatprep.mubr.bf16.mxu0 %v2097_v17  ;;  %1412 = vmatprep.mubr.bf16.mxu1 %v2097_v17 }
  0x7f   :  { %1185 = vmatpush1.bf16.msra.mxu0 %v2089_v18  ;;  %1411 = vmatpush1.bf16.msra.mxu1 %v2092_v19 }
  0x82   :  { %1187 = vmatmul.mubr.bf16.vlgmr.msra.gmra.mrb[0].mxu0 %v2095_v20  ;;  %1413 = vmatmul.mubr.bf16.vlgmr.msra.gmra.mrb[0].mxu1 %v2095_v20 }
  0x83   :  { %1196 = vmatprep.mubr.bf16.mxu0 %v2098_v21  ;;  %1422 = vmatprep.mubr.bf16.mxu1 %v2098_v21 }
  0x8a   :  { %1197 = vmatmul.mubr.bf16.gmra.mrb[4].mxu0 %v2100_v22  ;;  %1423 = vmatmul.mubr.bf16.gmra.mrb[4].mxu1 %v2100_v22 }
  0x8b   :  { %1206 = vmatprep.mubr.bf16.mxu0 %v2101_v23  ;;  %1432 = vmatprep.mubr.bf16.mxu1 %v2101_v23 }
  0x92   :  { %1207 = vmatmul.mubr.bf16.gmra.mrb[8].mxu0 %v2103_v24  ;;  %1433 = vmatmul.mubr.bf16.gmra.mrb[8].mxu1 %v2103_v24 }
  0x93   :  { %1216 = vmatprep.mubr.bf16.mxu0 %v2104_v25  ;;  %1442 = vmatprep.mubr.bf16.mxu1 %v2104_v25 }
  0x9a   :  { %1217 = vmatmul.mubr.bf16.gmra.mrb[12].mxu0 %v2106_v26  ;;  %1443 = vmatmul.mubr.bf16.gmra.mrb[12].mxu1 %v2106_v26 }
  0x9b   :  { %1226 = vmatprep.mubr.bf16.mxu0 %v2107_v27  ;;  %1452 = vmatprep.mubr.bf16.mxu1 %v2107_v27  ;;  %v193_v27 = vld [vmem:[%s2898_s3 + $0x80] sm:$0xff] }
  0xa2   :  { %1227 = vmatmul.mubr.bf16.gmra.mrb[16].mxu0 %v2109_v28  ;;  %1453 = vmatmul.mubr.bf16.gmra.mrb[16].mxu1 %v2109_v28  ;;  %v195_v28 = vld [vmem:[%s2898_s3 + $0x90] sm:$0xff] }
  0xa3   :  { %1236 = vmatprep.mubr.bf16.mxu0 %v2110_v29  ;;  %1462 = vmatprep.mubr.bf16.mxu1 %v2110_v29  ;;  %v194_v29 = vld [vmem:[%s2898_s3 + $0x88] sm:$0xff] }
  0xaa   :  { %1237 = vmatmul.mubr.bf16.gmra.mrb[20].mxu0 %v2112_v30  ;;  %1463 = vmatmul.mubr.bf16.gmra.mrb[20].mxu1 %v2112_v30  ;;  %v196_v30 = vld [vmem:[%s2898_s3 + $0x98] sm:$0xff] }
  0xab   :  { %1246 = vmatprep.mubr.bf16.mxu0 %v2113_v31  ;;  %1472 = vmatprep.mubr.bf16.mxu1 %v2113_v31 }
  0xb2   :  { %1247 = vmatmul.mubr.bf16.gmra.mrb[24].mxu0 %v2115_v32  ;;  %1473 = vmatmul.mubr.bf16.gmra.mrb[24].mxu1 %v2115_v32 }
  0xb3   :  { %1256 = vmatprep.mubr.bf16.mxu0 %v2116_v33  ;;  %1482 = vmatprep.mubr.bf16.mxu1 %v2116_v33  ;;  %v197_v33 = vld [vmem:[%s2898_s3 + $0xa0] sm:$0xff] }
  0xba   :  { %1257 = vmatmul.mubr.bf16.gmra.mrb[28].mxu0 %v2118_v34  ;;  %1483 = vmatmul.mubr.bf16.gmra.mrb[28].mxu1 %v2118_v34  ;;  %v199_v34 = vld [vmem:[%s2898_s3 + $0xb0] sm:$0xff] }
 0x155   :  { %v1188_v35 = vpop.f32.mrb[0].mxu0  ;;  %v1414_v36 = vpop.f32.mrb[0].mxu1 }
 0x156   :  { %v1190_v37 = vpop.f32.mrb[1].mxu0  ;;  %v1416_v38 = vpop.f32.mrb[1].mxu1  ;;  %v1749_v55 = vadd.f32 %v1188_v35, %v177_v43  ;;  %v1781_v56 = vadd.f32 %v1414_v36, %v179_v44 }
 0x157   :  { %v1192_v39 = vpop.f32.mrb[2].mxu0  ;;  %v1418_v40 = vpop.f32.mrb[2].mxu1  ;;  %v1750_v57 = vadd.f32 %v1190_v37, %v178_v45  ;;  %v1782_v58 = vadd.f32 %v1416_v38, %v180_v46 }
 0x158   :  { %v1194_v41 = vpop.f32.mrb[3].mxu0  ;;  %v1420_v42 = vpop.f32.mrb[3].mxu1  ;;  %v1751_v63 = vadd.f32 %v1192_v39, %v181_v47  ;;  %v1783_v0 = vadd.f32 %v1418_v40, %v183_v48  ;;  %v198_v39 = vld [vmem:[%s2898_s3 + $0xa8] sm:$0xff]  ;;  %v200_v40 = vld [vmem:[%s2898_s3 + $0xb8] sm:$0xff] }
 0x159   :  { %v1752_v7 = vadd.f32 %v1194_v41, %v182_v49  ;;  %v1784_v8 = vadd.f32 %v1420_v42, %v184_v52 }
 0x15d   :  { %v1198_v59 = vpop.f32.mrb[4].mxu0  ;;  %v1424_v60 = vpop.f32.mrb[4].mxu1 }
 0x15e   :  { %v1753_v1 = vadd.f32 %v1198_v59, %v185_v50  ;;  %v1785_v2 = vadd.f32 %v1424_v60, %v187_v51  ;;  %v1200_v3 = vpop.f32.mrb[5].mxu0  ;;  %v1426_v4 = vpop.f32.mrb[5].mxu1  ;;  %v201_v59 = vld [vmem:[%s2898_s3 + $0xc0] sm:$0xff]  ;;  %v203_v60 = vld [vmem:[%s2898_s3 + $0xd0] sm:$0xff] }
 0x15f   :  { %v1754_v9 = vadd.f32 %v1200_v3, %v186_v53  ;;  %v1786_v10 = vadd.f32 %v1426_v4, %v188_v54  ;;  %v1202_v11 = vpop.f32.mrb[6].mxu0  ;;  %v1428_v12 = vpop.f32.mrb[6].mxu1 }
 0x160   :  { %v1493_v13 = vmax.f32 %v1749_v55, %v1753_v1  ;;  %v1495_v14 = vmax.f32 %v1781_v56, %v1785_v2  ;;  %v1755_v15 = vadd.f32 %v1202_v11, %v189_v61  ;;  %v1787_v16 = vadd.f32 %v1428_v12, %v191_v62  ;;  %v1204_v17 = vpop.f32.mrb[7].mxu0  ;;  %v1430_v18 = vpop.f32.mrb[7].mxu1  ;;  %v202_v61 = vld [vmem:[%s2898_s3 + $0xc8] sm:$0xff]  ;;  %v204_v62 = vld [vmem:[%s2898_s3 + $0xd8] sm:$0xff]  ;;  %v205_v1 = vld [vmem:[%s2898_s3 + $0xe0] sm:$0xff] }
 0x161   :  { %v1494_v19 = vmax.f32 %v1750_v57, %v1754_v9  ;;  %v1496_v20 = vmax.f32 %v1782_v58, %v1786_v10  ;;  %v1756_v21 = vadd.f32 %v1204_v17, %v190_v5  ;;  %v1788_v22 = vadd.f32 %v1430_v18, %v192_v6  ;;  %v207_v2 = vld [vmem:[%s2898_s3 + $0xf0] sm:$0xff] }
 0x162   :  { %v1497_v23 = vmax.f32 %v1751_v63, %v1755_v15  ;;  %v1499_v24 = vmax.f32 %v1783_v0, %v1787_v16 }
 0x163   :  { %v1498_v25 = vmax.f32 %v1752_v7, %v1756_v21  ;;  %v1500_v26 = vmax.f32 %v1784_v8, %v1788_v22  ;;  %v206_v7 = vld [vmem:[%s2898_s3 + $0xe8] sm:$0xff]  ;;  %v208_v8 = vld [vmem:[%s2898_s3 + $0xf8] sm:$0xff] }
 0x165   :  { %v1208_v31 = vpop.f32.mrb[8].mxu0  ;;  %v1434_v32 = vpop.f32.mrb[8].mxu1 }
 0x166   :  { %v1757_v35 = vadd.f32 %v1208_v31, %v193_v27  ;;  %v1789_v36 = vadd.f32 %v1434_v32, %v195_v28  ;;  %v1210_v37 = vpop.f32.mrb[9].mxu0  ;;  %v1436_v38 = vpop.f32.mrb[9].mxu1  ;;  %v209_v27 = vld [vmem:[%s2898_s3 + $0x100] sm:$0xff]  ;;  %v211_v28 = vld [vmem:[%s2898_s3 + $0x110] sm:$0xff] }
 0x167   :  { %v1758_v41 = vadd.f32 %v1210_v37, %v194_v29  ;;  %v1790_v42 = vadd.f32 %v1436_v38, %v196_v30  ;;  %v1212_v43 = vpop.f32.mrb[10].mxu0  ;;  %v1438_v44 = vpop.f32.mrb[10].mxu1  ;;  %v210_v29 = vld [vmem:[%s2898_s3 + $0x108] sm:$0xff]  ;;  %v212_v30 = vld [vmem:[%s2898_s3 + $0x118] sm:$0xff] }
 0x168   :  { %v2703_v45 = vmax.f32 %v1493_v13, %v1757_v35  ;;  %v2705_v46 = vmax.f32 %v1495_v14, %v1789_v36  ;;  %v1759_v47 = vadd.f32 %v1212_v43, %v197_v33  ;;  %v1791_v48 = vadd.f32 %v1438_v44, %v199_v34  ;;  %v1214_v49 = vpop.f32.mrb[11].mxu0  ;;  %v1440_v50 = vpop.f32.mrb[11].mxu1  ;;  %v213_v33 = vld [vmem:[%s2898_s3 + $0x120] sm:$0xff]  ;;  %v215_v34 = vld [vmem:[%s2898_s3 + $0x130] sm:$0xff] }
 0x169   :  { %v2707_v51 = vmax.f32 %v1494_v19, %v1758_v41  ;;  %v2709_v52 = vmax.f32 %v1496_v20, %v1790_v42  ;;  %v1760_v53 = vadd.f32 %v1214_v49, %v198_v39  ;;  %v1792_v54 = vadd.f32 %v1440_v50, %v200_v40  ;;  %v214_v39 = vld [vmem:[%s2898_s3 + $0x128] sm:$0xff]  ;;  %v216_v40 = vld [vmem:[%s2898_s3 + $0x138] sm:$0xff] }
 0x16a   :  { %v2711_v55 = vmax.f32 %v1497_v23, %v1759_v47  ;;  %v2713_v56 = vmax.f32 %v1499_v24, %v1791_v48 }
 0x16b   :  { %v2715_v57 = vmax.f32 %v1498_v25, %v1760_v53  ;;  %v2717_v58 = vmax.f32 %v1500_v26, %v1792_v54 }
 0x16d   :  { %v1218_v63 = vpop.f32.mrb[12].mxu0  ;;  %v1444_v0 = vpop.f32.mrb[12].mxu1 }
 0x16e   :  { %v1761_v3 = vadd.f32 %v1218_v63, %v201_v59  ;;  %v1793_v4 = vadd.f32 %v1444_v0, %v203_v60  ;;  %v1220_v5 = vpop.f32.mrb[13].mxu0  ;;  %v1446_v6 = vpop.f32.mrb[13].mxu1  ;;  %v217_v59 = vld [vmem:[%s2898_s3 + $0x140] sm:$0xff]  ;;  %v219_v60 = vld [vmem:[%s2898_s3 + $0x150] sm:$0xff] }
 0x16f   :  { %v1762_v9 = vadd.f32 %v1220_v5, %v202_v61  ;;  %v1794_v10 = vadd.f32 %v1446_v6, %v204_v62  ;;  %v1222_v11 = vpop.f32.mrb[14].mxu0  ;;  %v1448_v12 = vpop.f32.mrb[14].mxu1  ;;  %v218_v61 = vld [vmem:[%s2898_s3 + $0x148] sm:$0xff]  ;;  %v220_v62 = vld [vmem:[%s2898_s3 + $0x158] sm:$0xff] }
 0x170   :  { %v1509_v13 = vmax.f32 %v2703_v45, %v1761_v3  ;;  %v1511_v14 = vmax.f32 %v2705_v46, %v1793_v4  ;;  %v1763_v15 = vadd.f32 %v1222_v11, %v205_v1  ;;  %v1795_v16 = vadd.f32 %v1448_v12, %v207_v2  ;;  %v1224_v17 = vpop.f32.mrb[15].mxu0  ;;  %v1450_v18 = vpop.f32.mrb[15].mxu1  ;;  %v221_v1 = vld [vmem:[%s2898_s3 + $0x160] sm:$0xff]  ;;  %v223_v2 = vld [vmem:[%s2898_s3 + $0x170] sm:$0xff] }
 0x171   :  { %v1510_v19 = vmax.f32 %v2707_v51, %v1762_v9  ;;  %v1512_v20 = vmax.f32 %v2709_v52, %v1794_v10  ;;  %v1764_v21 = vadd.f32 %v1224_v17, %v206_v7  ;;  %v1796_v22 = vadd.f32 %v1450_v18, %v208_v8  ;;  %v222_v7 = vld [vmem:[%s2898_s3 + $0x168] sm:$0xff]  ;;  %v224_v8 = vld [vmem:[%s2898_s3 + $0x178] sm:$0xff] }
 0x172   :  { %v1513_v23 = vmax.f32 %v2711_v55, %v1763_v15  ;;  %v1515_v24 = vmax.f32 %v2713_v56, %v1795_v16 }
 0x173   :  { %v1514_v25 = vmax.f32 %v2715_v57, %v1764_v21  ;;  %v1516_v26 = vmax.f32 %v2717_v58, %v1796_v22 }
 0x175   :  { %v1228_v31 = vpop.f32.mrb[16].mxu0  ;;  %v1454_v32 = vpop.f32.mrb[16].mxu1 }
 0x176   :  { %v1765_v35 = vadd.f32 %v1228_v31, %v209_v27  ;;  %v1797_v36 = vadd.f32 %v1454_v32, %v211_v28  ;;  %v1230_v37 = vpop.f32.mrb[17].mxu0  ;;  %v1456_v38 = vpop.f32.mrb[17].mxu1  ;;  %v225_v27 = vld [vmem:[%s2898_s3 + $0x180] sm:$0xff]  ;;  %v227_v28 = vld [vmem:[%s2898_s3 + $0x190] sm:$0xff] }
 0x177   :  { %v1766_v41 = vadd.f32 %v1230_v37, %v210_v29  ;;  %v1798_v42 = vadd.f32 %v1456_v38, %v212_v30  ;;  %v1232_v43 = vpop.f32.mrb[18].mxu0  ;;  %v1458_v44 = vpop.f32.mrb[18].mxu1  ;;  %v226_v29 = vld [vmem:[%s2898_s3 + $0x188] sm:$0xff]  ;;  %v228_v30 = vld [vmem:[%s2898_s3 + $0x198] sm:$0xff] }
 0x178   :  { %v2775_v45 = vmax.f32 %v1509_v13, %v1765_v35  ;;  %v2777_v46 = vmax.f32 %v1511_v14, %v1797_v36  ;;  %v1767_v47 = vadd.f32 %v1232_v43, %v213_v33  ;;  %v1799_v48 = vadd.f32 %v1458_v44, %v215_v34  ;;  %v1234_v49 = vpop.f32.mrb[19].mxu0  ;;  %v1460_v50 = vpop.f32.mrb[19].mxu1  ;;  %v229_v33 = vld [vmem:[%s2898_s3 + $0x1a0] sm:$0xff]  ;;  %v231_v34 = vld [vmem:[%s2898_s3 + $0x1b0] sm:$0xff] }
 0x179   :  { %v2779_v51 = vmax.f32 %v1510_v19, %v1766_v41  ;;  %v2781_v52 = vmax.f32 %v1512_v20, %v1798_v42  ;;  %v1768_v53 = vadd.f32 %v1234_v49, %v214_v39  ;;  %v1800_v54 = vadd.f32 %v1460_v50, %v216_v40  ;;  %v230_v39 = vld [vmem:[%s2898_s3 + $0x1a8] sm:$0xff]  ;;  %v232_v40 = vld [vmem:[%s2898_s3 + $0x1b8] sm:$0xff] }
 0x17a   :  { %v2783_v55 = vmax.f32 %v1513_v23, %v1767_v47  ;;  %v2785_v56 = vmax.f32 %v1515_v24, %v1799_v48 }
 0x17b   :  { %v2787_v57 = vmax.f32 %v1514_v25, %v1768_v53  ;;  %v2789_v58 = vmax.f32 %v1516_v26, %v1800_v54 }
 0x17d   :  { %v1238_v63 = vpop.f32.mrb[20].mxu0  ;;  %v1464_v0 = vpop.f32.mrb[20].mxu1 }
 0x17e   :  { %v1769_v3 = vadd.f32 %v1238_v63, %v217_v59  ;;  %v1801_v4 = vadd.f32 %v1464_v0, %v219_v60  ;;  %v1240_v5 = vpop.f32.mrb[21].mxu0  ;;  %v1466_v6 = vpop.f32.mrb[21].mxu1  ;;  %v233_v59 = vld [vmem:[%s2898_s3 + $0x1c0] sm:$0xff]  ;;  %v235_v60 = vld [vmem:[%s2898_s3 + $0x1d0] sm:$0xff]  ;;  %v236_v63 = vld [vmem:[%s2898_s3 + $0x1d8] sm:$0xff] }
 0x17f   :  { %v1770_v9 = vadd.f32 %v1240_v5, %v218_v61  ;;  %v1802_v10 = vadd.f32 %v1466_v6, %v220_v62  ;;  %v1242_v11 = vpop.f32.mrb[22].mxu0  ;;  %v1468_v12 = vpop.f32.mrb[22].mxu1  ;;  %v234_v62 = vld [vmem:[%s2898_s3 + $0x1c8] sm:$0xff] }
 0x180   :  { %v1525_v13 = vmax.f32 %v2775_v45, %v1769_v3  ;;  %v1527_v14 = vmax.f32 %v2777_v46, %v1801_v4  ;;  %v1771_v15 = vadd.f32 %v1242_v11, %v221_v1  ;;  %v1803_v16 = vadd.f32 %v1468_v12, %v223_v2  ;;  %v1244_v17 = vpop.f32.mrb[23].mxu0  ;;  %v1470_v18 = vpop.f32.mrb[23].mxu1  ;;  %v237_v2 = vld [vmem:[%s2898_s3 + $0x1e0] sm:$0xff]  ;;  %v239_v3 = vld [vmem:[%s2898_s3 + $0x1f0] sm:$0xff] }
 0x181   :  { %v1526_v19 = vmax.f32 %v2779_v51, %v1770_v9  ;;  %v1528_v20 = vmax.f32 %v2781_v52, %v1802_v10  ;;  %v1772_v21 = vadd.f32 %v1244_v17, %v222_v7  ;;  %v1804_v22 = vadd.f32 %v1470_v18, %v224_v8  ;;  %v1554_v61 = vpop.permute.xlu0 %1553  ;;  %v238_v8 = vld [vmem:[%s2898_s3 + $0x1e8] sm:$0xff]  ;;  %v240_v9 = vld [vmem:[%s2898_s3 + $0x1f8] sm:$0xff] }
 0x182   :  { %v1529_v23 = vmax.f32 %v2783_v55, %v1771_v15  ;;  %v1531_v24 = vmax.f32 %v2785_v56, %v1803_v16 }
 0x183   :  { %v1530_v25 = vmax.f32 %v2787_v57, %v1772_v21  ;;  %v1532_v26 = vmax.f32 %v2789_v58, %v1804_v22 }
 0x185   :  { %v1248_v31 = vpop.f32.mrb[24].mxu0  ;;  %v1474_v32 = vpop.f32.mrb[24].mxu1 }
 0x186   :  { %v1773_v35 = vadd.f32 %v1248_v31, %v225_v27  ;;  %v1805_v36 = vadd.f32 %v1474_v32, %v227_v28  ;;  %v1250_v37 = vpop.f32.mrb[25].mxu0  ;;  %v1476_v38 = vpop.f32.mrb[25].mxu1 }
 0x187   :  { %v1774_v41 = vadd.f32 %v1250_v37, %v226_v29  ;;  %v1806_v42 = vadd.f32 %v1476_v38, %v228_v30  ;;  %v1252_v43 = vpop.f32.mrb[26].mxu0  ;;  %v1478_v44 = vpop.f32.mrb[26].mxu1 }
 0x188   :  { %v1533_v45 = vmax.f32 %v1525_v13, %v1773_v35  ;;  %v1535_v46 = vmax.f32 %v1527_v14, %v1805_v36  ;;  %v1775_v47 = vadd.f32 %v1252_v43, %v229_v33  ;;  %v1807_v48 = vadd.f32 %v1478_v44, %v231_v34  ;;  %v1254_v49 = vpop.f32.mrb[27].mxu0  ;;  %v1480_v50 = vpop.f32.mrb[27].mxu1 }
 0x189   :  { %v1534_v51 = vmax.f32 %v1526_v19, %v1774_v41  ;;  %v1536_v52 = vmax.f32 %v1528_v20, %v1806_v42  ;;  %v1776_v53 = vadd.f32 %v1254_v49, %v230_v39  ;;  %v1808_v54 = vadd.f32 %v1480_v50, %v232_v40  ;;  %v1559_v32 = vpop.permute.xlu0 %1558 }
 0x18a   :  { %v1537_v55 = vmax.f32 %v1529_v23, %v1775_v47  ;;  %v1539_v56 = vmax.f32 %v1531_v24, %v1807_v48 }
 0x18b   :  { %v1538_v57 = vmax.f32 %v1530_v25, %v1776_v53  ;;  %v1540_v58 = vmax.f32 %v1532_v26, %v1808_v54 }
 0x18d   :  { %v1258_v0 = vpop.f32.mrb[28].mxu0  ;;  %v1484_v1 = vpop.f32.mrb[28].mxu1 }
 0x18e   :  { %v1777_v4 = vadd.f32 %v1258_v0, %v233_v59  ;;  %v1809_v5 = vadd.f32 %v1484_v1, %v235_v60  ;;  %v1260_v6 = vpop.f32.mrb[29].mxu0  ;;  %v1486_v7 = vpop.f32.mrb[29].mxu1 }
 0x18f   :  { %v1778_v10 = vadd.f32 %v1260_v6, %v234_v62  ;;  %v1810_v11 = vadd.f32 %v1486_v7, %v236_v63  ;;  %v1262_v12 = vpop.f32.mrb[30].mxu0  ;;  %v1488_v13 = vpop.f32.mrb[30].mxu1 }
 0x190   :  { %v1541_v14 = vmax.f32 %v1533_v45, %v1777_v4  ;;  %v1543_v15 = vmax.f32 %v1535_v46, %v1809_v5  ;;  %v1779_v16 = vadd.f32 %v1262_v12, %v237_v2  ;;  %v1811_v17 = vadd.f32 %v1488_v13, %v239_v3  ;;  %v1264_v18 = vpop.f32.mrb[31].mxu0  ;;  %v1490_v19 = vpop.f32.mrb[31].mxu1 }
 0x191   :  { %v1542_v20 = vmax.f32 %v1534_v51, %v1778_v10  ;;  %v1544_v21 = vmax.f32 %v1536_v52, %v1810_v11  ;;  %v1780_v22 = vadd.f32 %v1264_v18, %v238_v8  ;;  %v1812_v23 = vadd.f32 %v1490_v19, %v240_v9 }
 0x192   :  { %v1561_v24 = vadd.f32 %v1554_v61, %v1541_v14  ;;  %v1563_v25 = vadd.f32 %v1554_v61, %v1543_v15  ;;  %v1545_v26 = vmax.f32 %v1537_v55, %v1779_v16  ;;  %v1547_v27 = vmax.f32 %v1539_v56, %v1811_v17 }
 0x193   :  { %v1562_v28 = vadd.f32 %v1554_v61, %v1542_v20  ;;  %v1564_v29 = vadd.f32 %v1554_v61, %v1544_v21  ;;  %v1546_v30 = vmax.f32 %v1538_v57, %v1780_v22  ;;  %v1548_v31 = vmax.f32 %v1540_v58, %v1812_v23 }
 0x194   :  { %v1569_v33 = vmax.f32 %v1561_v24, 0.0  ;;  %v1571_v34 = vmax.f32 %v1563_v25, 0.0  ;;  %v1565_v35 = vadd.f32 %v1559_v32, %v1545_v26  ;;  %v1567_v36 = vadd.f32 %v1559_v32, %v1547_v27 }
 0x195   :  { %v1570_v37 = vmax.f32 %v1562_v28, 0.0  ;;  %v1572_v38 = vmax.f32 %v1564_v29, 0.0  ;;  %v1566_v39 = vadd.f32 %v1559_v32, %v1546_v30  ;;  %v1568_v40 = vadd.f32 %v1559_v32, %v1548_v31 }
 0x196   :  { %1577 = vst [vmem:[%s2899_s4] sm:$0xff] %v1569_v33  ;;  %1579 = vst [vmem:[%s2899_s4 + $0x10] sm:$0xff] %v1571_v34  ;;  %v1573_v41 = vmax.f32 %v1565_v35, 0.0  ;;  %v1575_v42 = vmax.f32 %v1567_v36, 0.0 }
 0x197   :  { %1578 = vst [vmem:[%s2899_s4 + $0x8] sm:$0xff] %v1570_v37  ;;  %1580 = vst [vmem:[%s2899_s4 + $0x18] sm:$0xff] %v1572_v38  ;;  %v1574_v43 = vmax.f32 %v1566_v39, 0.0  ;;  %v1576_v44 = vmax.f32 %v1568_v40, 0.0 }
 0x198   :  { %1581 = vst [vmem:[%s2899_s4 + $0x20] sm:$0xff] %v1573_v41  ;;  %1583 = vst [vmem:[%s2899_s4 + $0x30] sm:$0xff] %v1575_v42 }
 0x199   :  { %1582 = vst [vmem:[%s2899_s4 + $0x28] sm:$0xff] %v1574_v43  ;;  %1584 = vst [vmem:[%s2899_s4 + $0x38] sm:$0xff] %v1576_v44 }

// kernel: cnn_forward.7
= control target key start
LH: loop header
LB: loop body
LE: loop exit
PB: predicated region body
PF: predicated region fallthrough
CT: control target
= control target key end

     0   :  { %v1512_v47 = vmov 1983009808   ;;  %v290_v49 = vlaneseq  ;;  %s2369_s0 = inlined_call_operand.vmem [shape: f32[2,2048], index: 0, kind: input, shape index: {}]   ;;  %s2370_s1 = inlined_call_operand.vmem [shape: f32[2048,128], index: 1, kind: input, shape index: {}]   ;;  %s2371_s2 = inlined_call_operand.vmem [shape: f32[1,128], index: 2, kind: input, shape index: {}]   ;;  %s2372_s3 = inlined_call_operand.hbm [shape: f32[2,128], index: 3, kind: output, shape index: {}]  }
   0x1   :  { %v35_v0 = vld [vmem:[%s2370_s1 + $0x80] sm:$0xff]  ;;  %v36_v1 = vld [vmem:[%s2370_s1 + $0x88] sm:$0xff]  ;;  %v37_v11 = vld [vmem:[%s2370_s1 + $0x90] sm:$0xff]  ;;  %v288_v48 = vunpack.c.l.s4 %v1512_v47 }
   0x2   :  { %v19_v2 = vld [vmem:[%s2370_s1] sm:$0xff]  ;;  %v1226_v3 = vpack.c.bf16 %v36_v1, %v35_v0  ;;  %v20_v4 = vld [vmem:[%s2370_s1 + $0x8] sm:$0xff]  ;;  %v38_v13 = vld [vmem:[%s2370_s1 + $0x98] sm:$0xff]  ;;  %v291_v0 = vshrl.u32 %v290_v49, 7 }
   0x3   :  { %v67_v5 = vld [vmem:[%s2370_s1 + $0x180] sm:$0xff]  ;;  %v68_v6 = vld [vmem:[%s2370_s1 + $0x188] sm:$0xff]  ;;  %v1228_v7 = vpack.c.bf16 %v20_v4, %v19_v2  ;;  %v21_v14 = vld [vmem:[%s2370_s1 + $0x10] sm:$0xff]  ;;  %v1230_v16 = vpack.c.bf16 %v38_v13, %v37_v11  ;;  %v289_v63 = vunpack.c.0.s8 %v288_v48 }
   0x4   :  { %v1258_v8 = vpack.c.bf16 %v68_v6, %v67_v5  ;;  %v51_v9 = vld [vmem:[%s2370_s1 + $0x100] sm:$0xff]  ;;  %v52_v10 = vld [vmem:[%s2370_s1 + $0x108] sm:$0xff]  ;;  %1227 = vmatprep.subr.bf16.mxu0 %v1226_v3  ;;  %v22_v15 = vld [vmem:[%s2370_s1 + $0x18] sm:$0xff] }
   0x5   :  { %v1260_v12 = vpack.c.bf16 %v52_v10, %v51_v9  ;;  %1229 = vmatpush3.bf16.msra.mxu0 %v1228_v7  ;;  %v1232_v17 = vpack.c.bf16 %v22_v15, %v21_v14  ;;  %v69_v18 = vld [vmem:[%s2370_s1 + $0x190] sm:$0xff]  ;;  %v70_v19 = vld [vmem:[%s2370_s1 + $0x198] sm:$0xff]  ;;  %v39_v23 = vld [vmem:[%s2370_s1 + $0xa0] sm:$0xff]  ;;  %v1684_v13 = vsub.s32 %v289_v63, %v291_v0 }
   0x6   :  { %1259 = vmatprep.subr.bf16.mxu1 %v1258_v8  ;;  %v53_v20 = vld [vmem:[%s2370_s1 + $0x110] sm:$0xff]  ;;  %v1262_v21 = vpack.c.bf16 %v70_v19, %v69_v18  ;;  %v54_v22 = vld [vmem:[%s2370_s1 + $0x118] sm:$0xff]  ;;  %v40_v24 = vld [vmem:[%s2370_s1 + $0xa8] sm:$0xff]  ;;  %1231 = vmatprep.subr.bf16.mxu0 %v1230_v16 }
   0x7   :  { %1261 = vmatpush3.bf16.msra.mxu1 %v1260_v12  ;;  %v1264_v25 = vpack.c.bf16 %v54_v22, %v53_v20  ;;  %v1234_v26 = vpack.c.bf16 %v40_v24, %v39_v23  ;;  %v23_v27 = vld [vmem:[%s2370_s1 + $0x20] sm:$0xff]  ;;  %v24_v28 = vld [vmem:[%s2370_s1 + $0x28] sm:$0xff]  ;;  %v41_v35 = vld [vmem:[%s2370_s1 + $0xb0] sm:$0xff] }
   0x8   :  { %v71_v29 = vld [vmem:[%s2370_s1 + $0x1a0] sm:$0xff]  ;;  %1263 = vmatprep.subr.bf16.mxu1 %v1262_v21  ;;  %v72_v30 = vld [vmem:[%s2370_s1 + $0x1a8] sm:$0xff]  ;;  %v1236_v33 = vpack.c.bf16 %v24_v28, %v23_v27  ;;  %v42_v36 = vld [vmem:[%s2370_s1 + $0xb8] sm:$0xff] }
   0x9   :  { %v55_v31 = vld [vmem:[%s2370_s1 + $0x120] sm:$0xff]  ;;  %v56_v32 = vld [vmem:[%s2370_s1 + $0x128] sm:$0xff]  ;;  %1233 = vmatpush3.bf16.msra.mxu0 %v1232_v17  ;;  %v1266_v34 = vpack.c.bf16 %v72_v30, %v71_v29  ;;  %v25_v37 = vld [vmem:[%s2370_s1 + $0x30] sm:$0xff]  ;;  %v1238_v39 = vpack.c.bf16 %v42_v36, %v41_v35 }
   0xa   :  { %1235 = vmatprep.subr.bf16.mxu0 %v1234_v26  ;;  %v1268_v38 = vpack.c.bf16 %v56_v32, %v55_v31  ;;  %v26_v40 = vld [vmem:[%s2370_s1 + $0x38] sm:$0xff]  ;;  %v73_v41 = vld [vmem:[%s2370_s1 + $0x1b0] sm:$0xff]  ;;  %v43_v46 = vld [vmem:[%s2370_s1 + $0xc0] sm:$0xff] }
   0xb   :  { %1265 = vmatpush3.bf16.msra.mxu1 %v1264_v25  ;;  %v74_v42 = vld [vmem:[%s2370_s1 + $0x1b8] sm:$0xff]  ;;  %v57_v44 = vld [vmem:[%s2370_s1 + $0x130] sm:$0xff]  ;;  %v44_v50 = vld [vmem:[%s2370_s1 + $0xc8] sm:$0xff]  ;;  %v1240_v51 = vpack.c.bf16 %v26_v40, %v25_v37 }
   0xc   :  { %1267 = vmatprep.subr.bf16.mxu1 %v1266_v34  ;;  %v1270_v43 = vpack.c.bf16 %v74_v42, %v73_v41  ;;  %v58_v45 = vld [vmem:[%s2370_s1 + $0x138] sm:$0xff]  ;;  %v75_v52 = vld [vmem:[%s2370_s1 + $0x1c0] sm:$0xff]  ;;  %v76_v53 = vld [vmem:[%s2370_s1 + $0x1c8] sm:$0xff]  ;;  %v1242_v55 = vpack.c.bf16 %v44_v50, %v43_v46 }
   0xd   :  { %1237 = vmatpush3.bf16.msra.mxu0 %v1236_v33  ;;  %v1272_v54 = vpack.c.bf16 %v58_v45, %v57_v44  ;;  %v27_v56 = vld [vmem:[%s2370_s1 + $0x40] sm:$0xff]  ;;  %v28_v57 = vld [vmem:[%s2370_s1 + $0x48] sm:$0xff]  ;;  %v1274_v59 = vpack.c.bf16 %v76_v53, %v75_v52  ;;  %v45_v61 = vld [vmem:[%s2370_s1 + $0xd0] sm:$0xff] }
   0xe   :  { %1239 = vmatprep.subr.bf16.mxu0 %v1238_v39  ;;  %v59_v58 = vld [vmem:[%s2370_s1 + $0x140] sm:$0xff]  ;;  %v60_v60 = vld [vmem:[%s2370_s1 + $0x148] sm:$0xff]  ;;  %v46_v62 = vld [vmem:[%s2370_s1 + $0xd8] sm:$0xff]  ;;  %v1244_v3 = vpack.c.bf16 %v28_v57, %v27_v56 }
   0xf   :  { %1269 = vmatpush3.bf16.msra.mxu1 %v1268_v38  ;;  %v77_v1 = vld [vmem:[%s2370_s1 + $0x1d0] sm:$0xff]  ;;  %v78_v2 = vld [vmem:[%s2370_s1 + $0x1d8] sm:$0xff]  ;;  %v1276_v4 = vpack.c.bf16 %v60_v60, %v59_v58  ;;  %v1246_v5 = vpack.c.bf16 %v46_v62, %v45_v61  ;;  %v47_v11 = vld [vmem:[%s2370_s1 + $0xe0] sm:$0xff] }
  0x10   :  { %1271 = vmatprep.subr.bf16.mxu1 %v1270_v43  ;;  %v29_v6 = vld [vmem:[%s2370_s1 + $0x50] sm:$0xff]  ;;  %v30_v7 = vld [vmem:[%s2370_s1 + $0x58] sm:$0xff]  ;;  %v1278_v9 = vpack.c.bf16 %v78_v2, %v77_v1  ;;  %v48_v12 = vld [vmem:[%s2370_s1 + $0xe8] sm:$0xff] }
  0x11   :  { %1241 = vmatpush3.bf16.msra.mxu0 %v1240_v51  ;;  %v61_v8 = vld [vmem:[%s2370_s1 + $0x150] sm:$0xff]  ;;  %v62_v10 = vld [vmem:[%s2370_s1 + $0x158] sm:$0xff]  ;;  %v79_v14 = vld [vmem:[%s2370_s1 + $0x1e0] sm:$0xff]  ;;  %v1248_v16 = vpack.c.bf16 %v30_v7, %v29_v6  ;;  %v1250_v19 = vpack.c.bf16 %v48_v12, %v47_v11 }
  0x12   :  { %1243 = vmatprep.subr.bf16.mxu0 %v1242_v55  ;;  %v80_v15 = vld [vmem:[%s2370_s1 + $0x1e8] sm:$0xff]  ;;  %v31_v17 = vld [vmem:[%s2370_s1 + $0x60] sm:$0xff]  ;;  %v1280_v18 = vpack.c.bf16 %v62_v10, %v61_v8  ;;  %v49_v25 = vld [vmem:[%s2370_s1 + $0xf0] sm:$0xff] }
  0x13   :  { %1273 = vmatpush3.bf16.msra.mxu1 %v1272_v54  ;;  %v32_v20 = vld [vmem:[%s2370_s1 + $0x68] sm:$0xff]  ;;  %v63_v21 = vld [vmem:[%s2370_s1 + $0x160] sm:$0xff]  ;;  %v1282_v23 = vpack.c.bf16 %v80_v15, %v79_v14  ;;  %v50_v26 = vld [vmem:[%s2370_s1 + $0xf8] sm:$0xff] }
  0x14   :  { %1275 = vmatprep.subr.bf16.mxu1 %v1274_v59  ;;  %v15_v22 = vld [vmem:[%s2369_s0] sm:$0xff]  ;;  %v64_v24 = vld [vmem:[%s2370_s1 + $0x168] sm:$0xff]  ;;  %v81_v29 = vld [vmem:[%s2370_s1 + $0x1f0] sm:$0xff]  ;;  %v1252_v31 = vpack.c.bf16 %v32_v20, %v31_v17  ;;  %v1254_v35 = vpack.c.bf16 %v50_v26, %v49_v25 }
  0x15   :  { %1245 = vmatpush3.bf16.msra.mxu0 %v1244_v3  ;;  %v293_v27 = vrot.slane %v15_v22, %v1684_v13  ;;  %v286_v28 = vcombine.high %v15_v22, %v15_v22  ;;  %v82_v30 = vld [vmem:[%s2370_s1 + $0x1f8] sm:$0xff]  ;;  %v1284_v34 = vpack.c.bf16 %v64_v24, %v63_v21  ;;  %v33_v36 = vld [vmem:[%s2370_s1 + $0x70] sm:$0xff]  ;;  %v99_v41 = vld [vmem:[%s2370_s1 + $0x280] sm:$0xff] }
  0x16   :  { %1247 = vmatprep.subr.bf16.mxu0 %v1246_v5  ;;  %v34_v37 = vld [vmem:[%s2370_s1 + $0x78] sm:$0xff]  ;;  %v65_v38 = vld [vmem:[%s2370_s1 + $0x170] sm:$0xff]  ;;  %v1286_v39 = vpack.c.bf16 %v82_v30, %v81_v29  ;;  %v100_v42 = vld [vmem:[%s2370_s1 + $0x288] sm:$0xff] }
  0x17   :  { %1277 = vmatpush3.bf16.msra.mxu1 %v1276_v4  ;;  %v301_v32 = vcombine.high %v293_v27, %v293_v27  ;;  %v300_v33 = vrot.slane %v286_v28, %v1684_v13  ;;  %v66_v40 = vld [vmem:[%s2370_s1 + $0x178] sm:$0xff]  ;;  %v131_v44 = vld [vmem:[%s2370_s1 + $0x380] sm:$0xff]  ;;  %v132_v45 = vld [vmem:[%s2370_s1 + $0x388] sm:$0xff]  ;;  %v1256_v46 = vpack.c.bf16 %v34_v37, %v33_v36  ;;  %v1290_v48 = vpack.c.bf16 %v100_v42, %v99_v41 }
  0x18   :  { %1279 = vmatprep.subr.bf16.mxu1 %v1278_v9  ;;  %v1288_v47 = vpack.c.bf16 %v66_v40, %v65_v38  ;;  %v83_v49 = vld [vmem:[%s2370_s1 + $0x200] sm:$0xff]  ;;  %v84_v50 = vld [vmem:[%s2370_s1 + $0x208] sm:$0xff]  ;;  %v1322_v52 = vpack.c.bf16 %v132_v45, %v131_v44  ;;  %v101_v54 = vld [vmem:[%s2370_s1 + $0x290] sm:$0xff] }
  0x19   :  { %1249 = vmatpush3.bf16.msra.mxu0 %v1248_v16  ;;  %434 = vmatprep.mubr.f32.mxu0 %v301_v32  ;;  %v302_v43 = vcombine.high %v300_v33, %v300_v33  ;;  %v115_v51 = vld [vmem:[%s2370_s1 + $0x300] sm:$0xff]  ;;  %v116_v53 = vld [vmem:[%s2370_s1 + $0x308] sm:$0xff]  ;;  %v102_v55 = vld [vmem:[%s2370_s1 + $0x298] sm:$0xff]  ;;  %v1292_v58 = vpack.c.bf16 %v84_v50, %v83_v49 }
  0x1a   :  { %1251 = vmatprep.subr.bf16.mxu0 %v1250_v19  ;;  %v133_v56 = vld [vmem:[%s2370_s1 + $0x390] sm:$0xff]  ;;  %v134_v57 = vld [vmem:[%s2370_s1 + $0x398] sm:$0xff]  ;;  %v1324_v59 = vpack.c.bf16 %v116_v53, %v115_v51  ;;  %v1294_v60 = vpack.c.bf16 %v102_v55, %v101_v54  ;;  %v103_v2 = vld [vmem:[%s2370_s1 + $0x2a0] sm:$0xff] }
  0x1b   :  { %1281 = vmatpush3.bf16.msra.mxu1 %v1280_v18  ;;  %504 = vmatprep.mubr.f32.mxu1 %v302_v43  ;;  %v85_v61 = vld [vmem:[%s2370_s1 + $0x210] sm:$0xff]  ;;  %v86_v62 = vld [vmem:[%s2370_s1 + $0x218] sm:$0xff]  ;;  %v1326_v0 = vpack.c.bf16 %v134_v57, %v133_v56  ;;  %v104_v3 = vld [vmem:[%s2370_s1 + $0x2a8] sm:$0xff] }
  0x1c   :  { %1283 = vmatprep.subr.bf16.mxu1 %v1282_v23  ;;  %v117_v63 = vld [vmem:[%s2370_s1 + $0x310] sm:$0xff]  ;;  %v118_v1 = vld [vmem:[%s2370_s1 + $0x318] sm:$0xff]  ;;  %v135_v4 = vld [vmem:[%s2370_s1 + $0x3a0] sm:$0xff]  ;;  %v1296_v6 = vpack.c.bf16 %v86_v62, %v85_v61  ;;  %v1298_v8 = vpack.c.bf16 %v104_v3, %v103_v2 }
  0x1d   :  { %1253 = vmatpush3.bf16.msra.mxu0 %v1252_v31  ;;  %v136_v5 = vld [vmem:[%s2370_s1 + $0x3a8] sm:$0xff]  ;;  %v1328_v7 = vpack.c.bf16 %v118_v1, %v117_v63  ;;  %v87_v9 = vld [vmem:[%s2370_s1 + $0x220] sm:$0xff]  ;;  %v105_v15 = vld [vmem:[%s2370_s1 + $0x2b0] sm:$0xff] }
  0x1e   :  { %1255 = vmatprep.subr.bf16.mxu0 %v1254_v35  ;;  %v88_v10 = vld [vmem:[%s2370_s1 + $0x228] sm:$0xff]  ;;  %v119_v11 = vld [vmem:[%s2370_s1 + $0x320] sm:$0xff]  ;;  %v1330_v12 = vpack.c.bf16 %v136_v5, %v135_v4  ;;  %v106_v16 = vld [vmem:[%s2370_s1 + $0x2b8] sm:$0xff] }
  0x1f   :  { %1285 = vmatpush3.bf16.msra.mxu1 %v1284_v34  ;;  %v120_v14 = vld [vmem:[%s2370_s1 + $0x328] sm:$0xff]  ;;  %v137_v17 = vld [vmem:[%s2370_s1 + $0x3b0] sm:$0xff]  ;;  %v138_v18 = vld [vmem:[%s2370_s1 + $0x3b8] sm:$0xff]  ;;  %v1300_v19 = vpack.c.bf16 %v88_v10, %v87_v9  ;;  %v1302_v21 = vpack.c.bf16 %v106_v16, %v105_v15 }
  0x20   :  { %1287 = vmatprep.subr.bf16.mxu1 %v1286_v39  ;;  %v1332_v20 = vpack.c.bf16 %v120_v14, %v119_v11  ;;  %v89_v22 = vld [vmem:[%s2370_s1 + $0x230] sm:$0xff]  ;;  %v90_v23 = vld [vmem:[%s2370_s1 + $0x238] sm:$0xff]  ;;  %v1334_v25 = vpack.c.bf16 %v138_v18, %v137_v17  ;;  %v108_v28 = vld [vmem:[%s2370_s1 + $0x2c8] sm:$0xff] }
  0x21   :  { %1257 = vmatpush3.bf16.msra.mxu0 %v1256_v46  ;;  %v121_v24 = vld [vmem:[%s2370_s1 + $0x330] sm:$0xff]  ;;  %v122_v26 = vld [vmem:[%s2370_s1 + $0x338] sm:$0xff]  ;;  %v139_v29 = vld [vmem:[%s2370_s1 + $0x3c0] sm:$0xff]  ;;  %v1304_v32 = vpack.c.bf16 %v90_v23, %v89_v22 }
  0x22   :  { %1291 = vmatprep.subr.bf16.mxu0 %v1290_v48  ;;  %v140_v30 = vld [vmem:[%s2370_s1 + $0x3c8] sm:$0xff]  ;;  %v1336_v35 = vpack.c.bf16 %v122_v26, %v121_v24  ;;  %v91_v37 = vld [vmem:[%s2370_s1 + $0x240] sm:$0xff]  ;;  %v109_v42 = vld [vmem:[%s2370_s1 + $0x2d0] sm:$0xff] }
  0x23   :  { %1289 = vmatpush3.bf16.msra.mxu1 %v1288_v47  ;;  %v16_v31 = vld [vmem:[%s2369_s0 + $0x8] sm:$0xff]  ;;  %v123_v39 = vld [vmem:[%s2370_s1 + $0x340] sm:$0xff]  ;;  %v1338_v40 = vpack.c.bf16 %v140_v30, %v139_v29  ;;  %v110_v43 = vld [vmem:[%s2370_s1 + $0x2d8] sm:$0xff] }
  0x24   :  { %1323 = vmatprep.subr.bf16.mxu1 %v1322_v52  ;;  %435 = vmatmul.mubr.f32.vlgmr.msra.gmra.mrb[0].mxu0 %v293_v27  ;;  %v107_v27 = vld [vmem:[%s2370_s1 + $0x2c0] sm:$0xff]  ;;  %v303_v34 = vcombine.high %v16_v31, %v16_v31  ;;  %v92_v38 = vld [vmem:[%s2370_s1 + $0x248] sm:$0xff]  ;;  %v141_v46 = vld [vmem:[%s2370_s1 + $0x3d0] sm:$0xff]  ;;  %v1310_v51 = vpack.c.bf16 %v110_v43, %v109_v42 }
  0x25   :  { %1293 = vmatpush3.bf16.msra.mxu0 %v1292_v58  ;;  %v1306_v36 = vpack.c.bf16 %v108_v28, %v107_v27  ;;  %v124_v41 = vld [vmem:[%s2370_s1 + $0x348] sm:$0xff]  ;;  %v142_v47 = vld [vmem:[%s2370_s1 + $0x3d8] sm:$0xff]  ;;  %v1308_v48 = vpack.c.bf16 %v92_v38, %v91_v37  ;;  %v93_v52 = vld [vmem:[%s2370_s1 + $0x250] sm:$0xff] }
  0x26   :  { %505 = vmatmul.mubr.f32.vlgmr.msra.gmra.mrb[0].mxu1 %v300_v33  ;;  %1295 = vmatprep.subr.bf16.mxu0 %v1294_v60  ;;  %v1845_v33 = vrot.slane %v16_v31, %v1684_v13  ;;  %v1868_v45 = vrot.slane %v303_v34, %v1684_v13  ;;  %v1340_v50 = vpack.c.bf16 %v124_v41, %v123_v39  ;;  %v94_v53 = vld [vmem:[%s2370_s1 + $0x258] sm:$0xff]  ;;  %v125_v54 = vld [vmem:[%s2370_s1 + $0x350] sm:$0xff]  ;;  %v111_v57 = vld [vmem:[%s2370_s1 + $0x2e0] sm:$0xff] }
  0x27   :  { %1325 = vmatpush3.bf16.msra.mxu1 %v1324_v59  ;;  %v1342_v55 = vpack.c.bf16 %v142_v47, %v141_v46  ;;  %v126_v56 = vld [vmem:[%s2370_s1 + $0x358] sm:$0xff]  ;;  %v112_v58 = vld [vmem:[%s2370_s1 + $0x2e8] sm:$0xff]  ;;  %v143_v59 = vld [vmem:[%s2370_s1 + $0x3e0] sm:$0xff]  ;;  %v1312_v61 = vpack.c.bf16 %v94_v53, %v93_v52 }
  0x28   :  { %1327 = vmatprep.subr.bf16.mxu1 %v1326_v0  ;;  %v318_v44 = vcombine.high %v1845_v33, %v1845_v33  ;;  %v319_v49 = vcombine.high %v1868_v45, %v1868_v45  ;;  %v144_v60 = vld [vmem:[%s2370_s1 + $0x3e8] sm:$0xff]  ;;  %v1344_v62 = vpack.c.bf16 %v126_v56, %v125_v54  ;;  %v1314_v63 = vpack.c.bf16 %v112_v58, %v111_v57  ;;  %v95_v0 = vld [vmem:[%s2370_s1 + $0x260] sm:$0xff]  ;;  %v113_v5 = vld [vmem:[%s2370_s1 + $0x2f0] sm:$0xff] }
  0x29   :  { %1297 = vmatpush3.bf16.msra.mxu0 %v1296_v6  ;;  %v96_v1 = vld [vmem:[%s2370_s1 + $0x268] sm:$0xff]  ;;  %v127_v2 = vld [vmem:[%s2370_s1 + $0x360] sm:$0xff]  ;;  %v1346_v3 = vpack.c.bf16 %v144_v60, %v143_v59  ;;  %v114_v6 = vld [vmem:[%s2370_s1 + $0x2f8] sm:$0xff] }
  0x2a   :  { %1299 = vmatprep.subr.bf16.mxu0 %v1298_v8  ;;  %574 = vmatprep.mubr.f32.mxu0 %v318_v44  ;;  %v128_v4 = vld [vmem:[%s2370_s1 + $0x368] sm:$0xff]  ;;  %v146_v8 = vld [vmem:[%s2370_s1 + $0x3f8] sm:$0xff]  ;;  %v1316_v9 = vpack.c.bf16 %v96_v1, %v95_v0  ;;  %v1318_v11 = vpack.c.bf16 %v114_v6, %v113_v5  ;;  %v129_v15 = vld [vmem:[%s2370_s1 + $0x370] sm:$0xff] }
  0x2b   :  { %1329 = vmatpush3.bf16.msra.mxu1 %v1328_v7  ;;  %644 = vmatprep.mubr.f32.mxu1 %v319_v49  ;;  %v145_v7 = vld [vmem:[%s2370_s1 + $0x3f0] sm:$0xff]  ;;  %v1348_v10 = vpack.c.bf16 %v128_v4, %v127_v2  ;;  %v98_v14 = vld [vmem:[%s2370_s1 + $0x278] sm:$0xff]  ;;  %v163_v18 = vld [vmem:[%s2370_s1 + $0x480] sm:$0xff] }
  0x2c   :  { %1331 = vmatprep.subr.bf16.mxu1 %v1330_v12  ;;  %v97_v12 = vld [vmem:[%s2370_s1 + $0x270] sm:$0xff]  ;;  %v1350_v16 = vpack.c.bf16 %v146_v8, %v145_v7  ;;  %v130_v17 = vld [vmem:[%s2370_s1 + $0x378] sm:$0xff]  ;;  %v147_v23 = vld [vmem:[%s2370_s1 + $0x400] sm:$0xff] }
  0x2d   :  { %1301 = vmatpush3.bf16.msra.mxu0 %v1300_v19  ;;  %v164_v19 = vld [vmem:[%s2370_s1 + $0x488] sm:$0xff]  ;;  %v1320_v22 = vpack.c.bf16 %v98_v14, %v97_v12  ;;  %v1352_v24 = vpack.c.bf16 %v130_v17, %v129_v15  ;;  %v179_v27 = vld [vmem:[%s2370_s1 + $0x500] sm:$0xff]  ;;  %v165_v30 = vld [vmem:[%s2370_s1 + $0x490] sm:$0xff] }
  0x2e   :  { %1303 = vmatprep.subr.bf16.mxu0 %v1302_v21  ;;  %v196_v21 = vld [vmem:[%s2370_s1 + $0x588] sm:$0xff]  ;;  %v166_v31 = vld [vmem:[%s2370_s1 + $0x498] sm:$0xff]  ;;  %v17_v37 = vld [vmem:[%s2369_s0 + $0x10] sm:$0xff] }
  0x2f   :  { %1333 = vmatpush3.bf16.msra.mxu1 %v1332_v20  ;;  %v195_v20 = vld [vmem:[%s2370_s1 + $0x580] sm:$0xff]  ;;  %v148_v26 = vld [vmem:[%s2370_s1 + $0x408] sm:$0xff]  ;;  %v198_v34 = vld [vmem:[%s2370_s1 + $0x598] sm:$0xff]  ;;  %v1358_v38 = vpack.c.bf16 %v166_v31, %v165_v30  ;;  %v1987_v42 = vrot.slane %v17_v37, %v1684_v13  ;;  %v320_v43 = vcombine.high %v17_v37, %v17_v37 }
  0x30   :  { %1335 = vmatprep.subr.bf16.mxu1 %v1334_v25  ;;  %v1354_v25 = vpack.c.bf16 %v164_v19, %v163_v18  ;;  %v180_v28 = vld [vmem:[%s2370_s1 + $0x508] sm:$0xff]  ;;  %v1386_v29 = vpack.c.bf16 %v196_v21, %v195_v20  ;;  %v149_v39 = vld [vmem:[%s2370_s1 + $0x410] sm:$0xff]  ;;  %v182_v46 = vld [vmem:[%s2370_s1 + $0x518] sm:$0xff] }
  0x31   :  { %1305 = vmatpush3.bf16.msra.mxu0 %v1304_v32  ;;  %v197_v32 = vld [vmem:[%s2370_s1 + $0x590] sm:$0xff]  ;;  %v167_v47 = vld [vmem:[%s2370_s1 + $0x4a0] sm:$0xff]  ;;  %v2008_v52 = vrot.slane %v320_v43, %v1684_v13  ;;  %v152_v56 = vld [vmem:[%s2370_s1 + $0x428] sm:$0xff] }
  0x32   :  { %1307 = vmatprep.subr.bf16.mxu0 %v1306_v36  ;;  %v1388_v36 = vpack.c.bf16 %v180_v28, %v179_v27  ;;  %v181_v41 = vld [vmem:[%s2370_s1 + $0x510] sm:$0xff]  ;;  %v1390_v44 = vpack.c.bf16 %v198_v34, %v197_v32  ;;  %v199_v49 = vld [vmem:[%s2370_s1 + $0x5a0] sm:$0xff]  ;;  %v184_v59 = vld [vmem:[%s2370_s1 + $0x528] sm:$0xff] }
  0x33   :  { %1337 = vmatpush3.bf16.msra.mxu1 %v1336_v35  ;;  %v1356_v35 = vpack.c.bf16 %v148_v26, %v147_v23  ;;  %v183_v57 = vld [vmem:[%s2370_s1 + $0x520] sm:$0xff]  ;;  %v169_v60 = vld [vmem:[%s2370_s1 + $0x4b0] sm:$0xff]  ;;  %v154_v4 = vld [vmem:[%s2370_s1 + $0x438] sm:$0xff] }
  0x34   :  { %1339 = vmatprep.subr.bf16.mxu1 %v1338_v40  ;;  %v150_v40 = vld [vmem:[%s2370_s1 + $0x418] sm:$0xff]  ;;  %v1396_v1 = vpack.c.bf16 %v184_v59, %v183_v57  ;;  %v185_v5 = vld [vmem:[%s2370_s1 + $0x530] sm:$0xff]  ;;  %v171_v8 = vld [vmem:[%s2370_s1 + $0x4c0] sm:$0xff] }
  0x35   :  { %1309 = vmatpush3.bf16.msra.mxu0 %v1308_v48  ;;  %v168_v48 = vld [vmem:[%s2370_s1 + $0x4a8] sm:$0xff]  ;;  %v1360_v53 = vpack.c.bf16 %v150_v40, %v149_v39  ;;  %v186_v7 = vld [vmem:[%s2370_s1 + $0x538] sm:$0xff]  ;;  %v187_v18 = vld [vmem:[%s2370_s1 + $0x540] sm:$0xff] }
  0x36   :  { %1311 = vmatprep.subr.bf16.mxu0 %v1310_v51  ;;  %v335_v51 = vcombine.high %v1987_v42, %v1987_v42  ;;  %v1362_v54 = vpack.c.bf16 %v168_v48, %v167_v47  ;;  %v1400_v14 = vpack.c.bf16 %v186_v7, %v185_v5  ;;  %v156_v17 = vld [vmem:[%s2370_s1 + $0x448] sm:$0xff]  ;;  %v173_v21 = vld [vmem:[%s2370_s1 + $0x4d0] sm:$0xff]  ;;  %v190_v32 = vld [vmem:[%s2370_s1 + $0x558] sm:$0xff] }
  0x37   :  { %1341 = vmatpush3.bf16.msra.mxu1 %v1340_v50  ;;  %v200_v50 = vld [vmem:[%s2370_s1 + $0x5a8] sm:$0xff]  ;;  %v205_v23 = vld [vmem:[%s2370_s1 + $0x5d0] sm:$0xff]  ;;  %v175_v34 = vld [vmem:[%s2370_s1 + $0x4e0] sm:$0xff] }
  0x38   :  { %1343 = vmatprep.subr.bf16.mxu1 %v1342_v55  ;;  %v151_v55 = vld [vmem:[%s2370_s1 + $0x420] sm:$0xff]  ;;  %v1394_v58 = vpack.c.bf16 %v200_v50, %v199_v49  ;;  %v188_v20 = vld [vmem:[%s2370_s1 + $0x548] sm:$0xff]  ;;  %v157_v28 = vld [vmem:[%s2370_s1 + $0x450] sm:$0xff] }
  0x39   :  { %1313 = vmatpush3.bf16.msra.mxu0 %v1312_v61  ;;  %v170_v61 = vld [vmem:[%s2370_s1 + $0x4b8] sm:$0xff]  ;;  %v1364_v0 = vpack.c.bf16 %v152_v56, %v151_v55  ;;  %v1404_v26 = vpack.c.bf16 %v188_v20, %v187_v18  ;;  %v189_v30 = vld [vmem:[%s2370_s1 + $0x550] sm:$0xff]  ;;  %v208_v37 = vld [vmem:[%s2370_s1 + $0x5e8] sm:$0xff] }
  0x3a   :  { %1315 = vmatprep.subr.bf16.mxu0 %v1314_v63  ;;  %v202_v63 = vld [vmem:[%s2370_s1 + $0x5b8] sm:$0xff]  ;;  %v1366_v2 = vpack.c.bf16 %v170_v61, %v169_v60  ;;  %v159_v39 = vld [vmem:[%s2370_s1 + $0x460] sm:$0xff]  ;;  %v1408_v40 = vpack.c.bf16 %v190_v32, %v189_v30  ;;  %v160_v43 = vld [vmem:[%s2370_s1 + $0x468] sm:$0xff] }
  0x3b   :  { %1345 = vmatpush3.bf16.msra.mxu1 %v1344_v62  ;;  %v201_v62 = vld [vmem:[%s2370_s1 + $0x5b0] sm:$0xff]  ;;  %v178_v49 = vld [vmem:[%s2370_s1 + $0x4f8] sm:$0xff] }
  0x3c   :  { %1347 = vmatprep.subr.bf16.mxu1 %v1346_v3  ;;  %v153_v3 = vld [vmem:[%s2370_s1 + $0x430] sm:$0xff]  ;;  %v1398_v6 = vpack.c.bf16 %v202_v63, %v201_v62 }
  0x3d   :  { %1317 = vmatpush3.bf16.msra.mxu0 %v1316_v9  ;;  %v172_v9 = vld [vmem:[%s2370_s1 + $0x4c8] sm:$0xff]  ;;  %v1368_v12 = vpack.c.bf16 %v154_v4, %v153_v3  ;;  %v177_v48 = vld [vmem:[%s2370_s1 + $0x4f0] sm:$0xff] }
  0x3e   :  { %1319 = vmatprep.subr.bf16.mxu0 %v1318_v11  ;;  %v204_v11 = vld [vmem:[%s2370_s1 + $0x5c8] sm:$0xff]  ;;  %v1370_v15 = vpack.c.bf16 %v172_v9, %v171_v8 }
  0x3f   :  { %1349 = vmatpush3.bf16.msra.mxu1 %v1348_v10  ;;  %v203_v10 = vld [vmem:[%s2370_s1 + $0x5c0] sm:$0xff] }
  0x40   :  { %1351 = vmatprep.subr.bf16.mxu1 %v1350_v16  ;;  %v155_v16 = vld [vmem:[%s2370_s1 + $0x440] sm:$0xff]  ;;  %v1402_v19 = vpack.c.bf16 %v204_v11, %v203_v10 }
  0x41   :  { %1321 = vmatpush3.bf16.msra.mxu0 %v1320_v22  ;;  %v174_v22 = vld [vmem:[%s2370_s1 + $0x4d8] sm:$0xff] }
  0x42   :  { %1355 = vmatprep.subr.bf16.mxu0 %v1354_v25  ;;  %v1372_v25 = vpack.c.bf16 %v156_v17, %v155_v16  ;;  %v1374_v27 = vpack.c.bf16 %v174_v22, %v173_v21 }
  0x43   :  { %1353 = vmatpush3.bf16.msra.mxu1 %v1352_v24  ;;  %v206_v24 = vld [vmem:[%s2370_s1 + $0x5d8] sm:$0xff] }
  0x44   :  { %1387 = vmatprep.subr.bf16.mxu1 %v1386_v29  ;;  %575 = vmatmul.mubr.f32.vlgmr.msra.gmra.mrb[2].mxu0 %v1845_v33  ;;  %v1392_v33 = vpack.c.bf16 %v182_v46, %v181_v41  ;;  %v158_v29 = vld [vmem:[%s2370_s1 + $0x458] sm:$0xff]  ;;  %v1406_v31 = vpack.c.bf16 %v206_v24, %v205_v23  ;;  %v192_v46 = vld [vmem:[%s2370_s1 + $0x568] sm:$0xff] }
  0x45   :  { %1357 = vmatpush3.bf16.msra.mxu0 %v1356_v35  ;;  %714 = vmatprep.mubr.f32.mxu0 %v335_v51  ;;  %v176_v35 = vld [vmem:[%s2370_s1 + $0x4e8] sm:$0xff] }
  0x46   :  { %645 = vmatmul.mubr.f32.vlgmr.msra.gmra.mrb[2].mxu1 %v1868_v45  ;;  %1359 = vmatprep.subr.bf16.mxu0 %v1358_v38  ;;  %v336_v45 = vcombine.high %v2008_v52, %v2008_v52  ;;  %v1376_v38 = vpack.c.bf16 %v158_v29, %v157_v28  ;;  %v1378_v41 = vpack.c.bf16 %v176_v35, %v175_v34 }
  0x47   :  { %1389 = vmatpush3.bf16.msra.mxu1 %v1388_v36  ;;  %v207_v36 = vld [vmem:[%s2370_s1 + $0x5e0] sm:$0xff] }
  0x48   :  { %1391 = vmatprep.subr.bf16.mxu1 %v1390_v44  ;;  %784 = vmatprep.mubr.f32.mxu1 %v336_v45  ;;  %v191_v44 = vld [vmem:[%s2370_s1 + $0x560] sm:$0xff]  ;;  %v1410_v47 = vpack.c.bf16 %v208_v37, %v207_v36 }
  0x49   :  { %1361 = vmatpush3.bf16.msra.mxu0 %v1360_v53 }
  0x4a   :  { %1363 = vmatprep.subr.bf16.mxu0 %v1362_v54 }
  0x4b   :  { %1393 = vmatpush3.bf16.msra.mxu1 %v1392_v33 }
  0x4c   :  { %1395 = vmatprep.subr.bf16.mxu1 %v1394_v58 }
  0x4d   :  { %1365 = vmatpush3.bf16.msra.mxu0 %v1364_v0 }
  0x4e   :  { %1367 = vmatprep.subr.bf16.mxu0 %v1366_v2 }
  0x4f   :  { %1397 = vmatpush3.bf16.msra.mxu1 %v1396_v1 }
  0x50   :  { %1399 = vmatprep.subr.bf16.mxu1 %v1398_v6 }
  0x51   :  { %1369 = vmatpush3.bf16.msra.mxu0 %v1368_v12 }
  0x52   :  { %1371 = vmatprep.subr.bf16.mxu0 %v1370_v15 }
  0x53   :  { %1401 = vmatpush3.bf16.msra.mxu1 %v1400_v14 }
  0x54   :  { %1403 = vmatprep.subr.bf16.mxu1 %v1402_v19 }
  0x55   :  { %1373 = vmatpush3.bf16.msra.mxu0 %v1372_v25 }
  0x56   :  { %1375 = vmatprep.subr.bf16.mxu0 %v1374_v27 }
  0x57   :  { %1405 = vmatpush3.bf16.msra.mxu1 %v1404_v26 }
  0x58   :  { %1407 = vmatprep.subr.bf16.mxu1 %v1406_v31 }
  0x59   :  { %8 = vsyncpa [#allocation3], 0  ;;  %v209_v50 = vld [vmem:[%s2370_s1 + $0x5f0] sm:$0xff]  ;;  %v210_v51 = vld [vmem:[%s2370_s1 + $0x5f8] sm:$0xff]  ;;  %1377 = vmatpush3.bf16.msra.mxu0 %v1376_v38  ;;  %v1380_v53 = vpack.c.bf16 %v160_v43, %v159_v39  ;;  %v1412_v54 = vpack.c.bf16 %v192_v46, %v191_v44  ;;  %v1382_v55 = vpack.c.bf16 %v178_v49, %v177_v48 }
  0x5a   :  { %v18_v33 = vld [vmem:[%s2369_s0 + $0x18] sm:$0xff]  ;;  %1379 = vmatprep.subr.bf16.mxu0 %v1378_v41  ;;  %v161_v56 = vld [vmem:[%s2370_s1 + $0x470] sm:$0xff]  ;;  %v1414_v58 = vpack.c.bf16 %v210_v51, %v209_v50  ;;  %v227_v60 = vld [vmem:[%s2370_s1 + $0x680] sm:$0xff] }
  0x5b   :  { %1409 = vmatpush3.bf16.msra.mxu1 %v1408_v40  ;;  %v162_v57 = vld [vmem:[%s2370_s1 + $0x478] sm:$0xff]  ;;  %v193_v45 = vld [vmem:[%s2370_s1 + $0x570] sm:$0xff]  ;;  %v228_v61 = vld [vmem:[%s2370_s1 + $0x688] sm:$0xff]  ;;  %v337_v0 = vcombine.high %v18_v33, %v18_v33  ;;  %v2179_v11 = vrot.slane %v18_v33, %v1684_v13 }
  0x5c   :  { %1411 = vmatprep.subr.bf16.mxu1 %v1410_v47  ;;  %v194_v59 = vld [vmem:[%s2370_s1 + $0x578] sm:$0xff]  ;;  %v259_v62 = vld [vmem:[%s2370_s1 + $0x780] sm:$0xff]  ;;  %v260_v63 = vld [vmem:[%s2370_s1 + $0x788] sm:$0xff]  ;;  %v1384_v1 = vpack.c.bf16 %v162_v57, %v161_v56  ;;  %v1418_v3 = vpack.c.bf16 %v228_v61, %v227_v60 }
  0x5d   :  { %1381 = vmatpush3.bf16.msra.mxu0 %v1380_v53  ;;  %v1416_v2 = vpack.c.bf16 %v194_v59, %v193_v45  ;;  %v211_v4 = vld [vmem:[%s2370_s1 + $0x600] sm:$0xff]  ;;  %v212_v5 = vld [vmem:[%s2370_s1 + $0x608] sm:$0xff]  ;;  %v1450_v7 = vpack.c.bf16 %v260_v63, %v259_v62  ;;  %v229_v9 = vld [vmem:[%s2370_s1 + $0x690] sm:$0xff]  ;;  %v2188_v15 = vrot.slane %v337_v0, %v1684_v13  ;;  %v352_v25 = vcombine.high %v2179_v11, %v2179_v11 }
  0x5e   :  { %1383 = vmatprep.subr.bf16.mxu0 %v1382_v55  ;;  %v243_v6 = vld [vmem:[%s2370_s1 + $0x700] sm:$0xff]  ;;  %v244_v8 = vld [vmem:[%s2370_s1 + $0x708] sm:$0xff]  ;;  %v230_v10 = vld [vmem:[%s2370_s1 + $0x698] sm:$0xff]  ;;  %v1420_v16 = vpack.c.bf16 %v212_v5, %v211_v4 }
  0x5f   :  { %1413 = vmatpush3.bf16.msra.mxu1 %v1412_v54  ;;  %v261_v12 = vld [vmem:[%s2370_s1 + $0x790] sm:$0xff]  ;;  %v262_v14 = vld [vmem:[%s2370_s1 + $0x798] sm:$0xff]  ;;  %v1452_v17 = vpack.c.bf16 %v244_v8, %v243_v6  ;;  %v1422_v18 = vpack.c.bf16 %v230_v10, %v229_v9  ;;  %v231_v23 = vld [vmem:[%s2370_s1 + $0x6a0] sm:$0xff]  ;;  %v353_v28 = vcombine.high %v2188_v15, %v2188_v15 }
  0x60   :  { %1415 = vmatprep.subr.bf16.mxu1 %v1414_v58  ;;  %v213_v19 = vld [vmem:[%s2370_s1 + $0x610] sm:$0xff]  ;;  %v214_v20 = vld [vmem:[%s2370_s1 + $0x618] sm:$0xff]  ;;  %v1454_v13 = vpack.c.bf16 %v262_v14, %v261_v12  ;;  %v232_v24 = vld [vmem:[%s2370_s1 + $0x6a8] sm:$0xff] }
  0x61   :  { %1385 = vmatpush3.bf16.msra.mxu0 %v1384_v1  ;;  %v245_v21 = vld [vmem:[%s2370_s1 + $0x710] sm:$0xff]  ;;  %v246_v22 = vld [vmem:[%s2370_s1 + $0x718] sm:$0xff]  ;;  %v263_v26 = vld [vmem:[%s2370_s1 + $0x7a0] sm:$0xff]  ;;  %v1424_v29 = vpack.c.bf16 %v214_v20, %v213_v19  ;;  %v1426_v31 = vpack.c.bf16 %v232_v24, %v231_v23 }
  0x62   :  { %1419 = vmatprep.subr.bf16.mxu0 %v1418_v3  ;;  %v264_v27 = vld [vmem:[%s2370_s1 + $0x7a8] sm:$0xff]  ;;  %v1456_v30 = vpack.c.bf16 %v246_v22, %v245_v21  ;;  %v247_v34 = vld [vmem:[%s2370_s1 + $0x720] sm:$0xff]  ;;  %v233_v36 = vld [vmem:[%s2370_s1 + $0x6b0] sm:$0xff] }
  0x63   :  { %1417 = vmatpush3.bf16.msra.mxu1 %v1416_v2  ;;  %v216_v32 = vld [vmem:[%s2370_s1 + $0x628] sm:$0xff]  ;;  %v1458_v35 = vpack.c.bf16 %v264_v27, %v263_v26  ;;  %v234_v37 = vld [vmem:[%s2370_s1 + $0x6b8] sm:$0xff]  ;;  %v265_v38 = vld [vmem:[%s2370_s1 + $0x7b0] sm:$0xff] }
  0x64   :  { %1451 = vmatprep.subr.bf16.mxu1 %v1450_v7  ;;  %715 = vmatmul.mubr.f32.vlgmr.msra.gmra.mrb[4].mxu0 %v1987_v42  ;;  %v215_v42 = vld [vmem:[%s2370_s1 + $0x620] sm:$0xff]  ;;  %v266_v39 = vld [vmem:[%s2370_s1 + $0x7b8] sm:$0xff]  ;;  %v1430_v43 = vpack.c.bf16 %v234_v37, %v233_v36  ;;  %v217_v44 = vld [vmem:[%s2370_s1 + $0x630] sm:$0xff] }
  0x65   :  { %1421 = vmatpush3.bf16.msra.mxu0 %v1420_v16  ;;  %854 = vmatprep.mubr.f32.mxu0 %v352_v25  ;;  %v1428_v40 = vpack.c.bf16 %v216_v32, %v215_v42  ;;  %v218_v46 = vld [vmem:[%s2370_s1 + $0x638] sm:$0xff]  ;;  %v249_v47 = vld [vmem:[%s2370_s1 + $0x730] sm:$0xff]  ;;  %v1462_v48 = vpack.c.bf16 %v266_v39, %v265_v38  ;;  %v235_v50 = vld [vmem:[%s2370_s1 + $0x6c0] sm:$0xff] }
  0x66   :  { %785 = vmatmul.mubr.f32.vlgmr.msra.gmra.mrb[4].mxu1 %v2008_v52  ;;  %1423 = vmatprep.subr.bf16.mxu0 %v1422_v18  ;;  %v248_v52 = vld [vmem:[%s2370_s1 + $0x728] sm:$0xff]  ;;  %v250_v49 = vld [vmem:[%s2370_s1 + $0x738] sm:$0xff]  ;;  %v267_v53 = vld [vmem:[%s2370_s1 + $0x7c0] sm:$0xff]  ;;  %v1432_v54 = vpack.c.bf16 %v218_v46, %v217_v44 }
  0x67   :  { %1453 = vmatpush3.bf16.msra.mxu1 %v1452_v17  ;;  %924 = vmatprep.mubr.f32.mxu1 %v353_v28  ;;  %v1460_v41 = vpack.c.bf16 %v248_v52, %v247_v34  ;;  %v236_v51 = vld [vmem:[%s2370_s1 + $0x6c8] sm:$0xff]  ;;  %v1464_v55 = vpack.c.bf16 %v250_v49, %v249_v47  ;;  %v219_v57 = vld [vmem:[%s2370_s1 + $0x640] sm:$0xff]  ;;  %v237_v61 = vld [vmem:[%s2370_s1 + $0x6d0] sm:$0xff] }
  0x68   :  { %1455 = vmatprep.subr.bf16.mxu1 %v1454_v13  ;;  %v268_v33 = vld [vmem:[%s2370_s1 + $0x7c8] sm:$0xff]  ;;  %v1434_v56 = vpack.c.bf16 %v236_v51, %v235_v50  ;;  %v251_v58 = vld [vmem:[%s2370_s1 + $0x740] sm:$0xff]  ;;  %v238_v62 = vld [vmem:[%s2370_s1 + $0x6d8] sm:$0xff] }
  0x69   :  { %1425 = vmatpush3.bf16.msra.mxu0 %v1424_v29  ;;  %v220_v45 = vld [vmem:[%s2370_s1 + $0x648] sm:$0xff]  ;;  %v1466_v59 = vpack.c.bf16 %v268_v33, %v267_v53  ;;  %v269_v63 = vld [vmem:[%s2370_s1 + $0x7d0] sm:$0xff]  ;;  %v270_v0 = vld [vmem:[%s2370_s1 + $0x7d8] sm:$0xff]  ;;  %v1438_v3 = vpack.c.bf16 %v238_v62, %v237_v61 }
  0x6a   :  { %1427 = vmatprep.subr.bf16.mxu0 %v1426_v31  ;;  %v252_v60 = vld [vmem:[%s2370_s1 + $0x748] sm:$0xff]  ;;  %v1436_v1 = vpack.c.bf16 %v220_v45, %v219_v57  ;;  %v221_v4 = vld [vmem:[%s2370_s1 + $0x650] sm:$0xff]  ;;  %v222_v5 = vld [vmem:[%s2370_s1 + $0x658] sm:$0xff]  ;;  %v1470_v7 = vpack.c.bf16 %v270_v0, %v269_v63 }
  0x6b   :  { %1457 = vmatpush3.bf16.msra.mxu1 %v1456_v30  ;;  %v1468_v2 = vpack.c.bf16 %v252_v60, %v251_v58  ;;  %v253_v6 = vld [vmem:[%s2370_s1 + $0x750] sm:$0xff]  ;;  %v254_v8 = vld [vmem:[%s2370_s1 + $0x758] sm:$0xff]  ;;  %v239_v9 = vld [vmem:[%s2370_s1 + $0x6e0] sm:$0xff]  ;;  %v1440_v16 = vpack.c.bf16 %v222_v5, %v221_v4 }
  0x6c   :  { %1459 = vmatprep.subr.bf16.mxu1 %v1458_v35  ;;  %v240_v10 = vld [vmem:[%s2370_s1 + $0x6e8] sm:$0xff]  ;;  %v271_v12 = vld [vmem:[%s2370_s1 + $0x7e0] sm:$0xff]  ;;  %v1472_v17 = vpack.c.bf16 %v254_v8, %v253_v6  ;;  %v241_v23 = vld [vmem:[%s2370_s1 + $0x6f0] sm:$0xff] }
  0x6d   :  { %1429 = vmatpush3.bf16.msra.mxu0 %v1428_v40  ;;  %v272_v14 = vld [vmem:[%s2370_s1 + $0x7e8] sm:$0xff]  ;;  %v1442_v18 = vpack.c.bf16 %v240_v10, %v239_v9  ;;  %v223_v19 = vld [vmem:[%s2370_s1 + $0x660] sm:$0xff]  ;;  %v242_v24 = vld [vmem:[%s2370_s1 + $0x6f8] sm:$0xff] }
  0x6e   :  { %1431 = vmatprep.subr.bf16.mxu0 %v1430_v43  ;;  %v224_v20 = vld [vmem:[%s2370_s1 + $0x668] sm:$0xff]  ;;  %v255_v21 = vld [vmem:[%s2370_s1 + $0x760] sm:$0xff]  ;;  %v1474_v13 = vpack.c.bf16 %v272_v14, %v271_v12  ;;  %v273_v25 = vld [vmem:[%s2370_s1 + $0x7f0] sm:$0xff]  ;;  %v1446_v29 = vpack.c.bf16 %v242_v24, %v241_v23 }
  0x6f   :  { %1461 = vmatpush3.bf16.msra.mxu1 %v1460_v41  ;;  %v256_v22 = vld [vmem:[%s2370_s1 + $0x768] sm:$0xff]  ;;  %v274_v26 = vld [vmem:[%s2370_s1 + $0x7f8] sm:$0xff]  ;;  %v1444_v27 = vpack.c.bf16 %v224_v20, %v223_v19  ;;  %v225_v30 = vld [vmem:[%s2370_s1 + $0x670] sm:$0xff] }
  0x70   :  { %1463 = vmatprep.subr.bf16.mxu1 %v1462_v48  ;;  %v1476_v28 = vpack.c.bf16 %v256_v22, %v255_v21  ;;  %v226_v31 = vld [vmem:[%s2370_s1 + $0x678] sm:$0xff]  ;;  %v1478_v42 = vpack.c.bf16 %v274_v26, %v273_v25  ;;  %v257_v32 = vld [vmem:[%s2370_s1 + $0x770] sm:$0xff]  ;;  %v945_v37 = vld [vmem:[%s2371_s2] ss:$0 sm:$0xff] }
  0x71   :  { %1433 = vmatpush3.bf16.msra.mxu0 %v1432_v54  ;;  %v258_v34 = vld [vmem:[%s2370_s1 + $0x778] sm:$0xff]  ;;  %v1448_v35 = vpack.c.bf16 %v226_v31, %v225_v30  ;;  %s1513_s1 = smov [#allocation2]  }
  0x72   :  { %1435 = vmatprep.subr.bf16.mxu0 %v1434_v56  ;;  %v1480_v52 = vpack.c.bf16 %v258_v34, %v257_v32  ;;  %s937_s2 = sshll.u32 %s1513_s1, 4  ;;  %s938_s2 = int_to_ptr.vmem [resolvable:$true] %s937_s2 }
  0x73   :  { %1465 = vmatpush3.bf16.msra.mxu1 %v1464_v55  ;;  %s1488_s16 = scalar_lea.vmem %s938_s2, 32  ;;  %p1493_p1 = scmp.lt.s32.totalorder %s938_s2, %s938_s2 }
  0x74   :  { %1467 = vmatprep.subr.bf16.mxu1 %v1466_v59  ;;  %p1489_p0 = scmp.ne.s32.totalorder %s938_s2, %s1488_s16  ;;  %p1494_p2 = scmp.lt.s32.totalorder %s1488_s16, %s1488_s16 }
  0x75   :  { %1437 = vmatpush3.bf16.msra.mxu0 %v1436_v1 }
  0x76   :  { %1439 = vmatprep.subr.bf16.mxu0 %v1438_v3  ;;  %p1495_p3 = por %p1494_p2, %p1493_p1 }
  0x77   :  { %1469 = vmatpush3.bf16.msra.mxu1 %v1468_v2 }
  0x78   :  { %1471 = vmatprep.subr.bf16.mxu1 %v1470_v7  ;;  %p1496_p4 = pnand %p1495_p3, %p1489_p0 }
  0x79   :  { %1441 = vmatpush3.bf16.msra.mxu0 %v1440_v16 }
  0x7a   :  { %1443 = vmatprep.subr.bf16.mxu0 %v1442_v18 }
  0x7b   :  { %1473 = vmatpush3.bf16.msra.mxu1 %v1472_v17 }
  0x7c   :  { %1475 = vmatprep.subr.bf16.mxu1 %v1474_v13 }
  0x7d   :  { %1445 = vmatpush3.bf16.msra.mxu0 %v1444_v27 }
  0x7e   :  { %1447 = vmatprep.subr.bf16.mxu0 %v1446_v29 }
  0x7f   :  { %1477 = vmatpush3.bf16.msra.mxu1 %v1476_v28 }
  0x80   :  { %1479 = vmatprep.subr.bf16.mxu1 %v1478_v42 }
  0x81   :  { %1449 = vmatpush3.bf16.msra.mxu0 %v1448_v35 }
  0x83   :  { %1481 = vmatpush3.bf16.msra.mxu1 %v1480_v52 }
  0x84   :  { %855 = vmatmul.mubr.f32.vlgmr.msra.gmra.mrb[6].mxu0 %v2179_v11 }
  0x86   :  { %925 = vmatmul.mubr.f32.vlgmr.msra.gmra.mrb[6].mxu1 %v2188_v15 }
  0xf7   :  { %v978_v36 = vpop.f32.mrb[0].mxu0 }
  0xf8   :  { %v979_v38 = vpop.f32.mrb[1].mxu0 }
  0xf9   :  { %v1013_v39 = vpop.f32.mrb[0].mxu1  ;;  %v980_v40 = vadd.f32 %v979_v38, %v978_v36 }
  0xfa   :  { %v1014_v41 = vpop.f32.mrb[1].mxu1 }
  0xfb   :  { %v1015_v43 = vadd.f32 %v1014_v41, %v1013_v39  ;;  %v437_v44 = vadd.f32 %v980_v40, %v945_v37 }
  0xfd   :  { %v507_v46 = vadd.f32 %v1015_v43, %v437_v44 }
 0x117   :  { %v1048_v47 = vpop.f32.mrb[2].mxu0 }
 0x118   :  { %v1049_v48 = vpop.f32.mrb[3].mxu0 }
 0x119   :  { %v1083_v49 = vpop.f32.mrb[2].mxu1  ;;  %v1050_v50 = vadd.f32 %v1049_v48, %v1048_v47 }
 0x11a   :  { %v1084_v51 = vpop.f32.mrb[3].mxu1 }
 0x11b   :  { %v1085_v11 = vadd.f32 %v1084_v51, %v1083_v49  ;;  %v577_v53 = vadd.f32 %v1050_v50, %v507_v46 }
 0x11d   :  { %v647_v15 = vadd.f32 %v1085_v11, %v577_v53 }
 0x137   :  { %v1118_v33 = vpop.f32.mrb[4].mxu0 }
 0x138   :  { %v1119_v54 = vpop.f32.mrb[5].mxu0 }
 0x139   :  { %v1153_v55 = vpop.f32.mrb[4].mxu1  ;;  %v1120_v56 = vadd.f32 %v1119_v54, %v1118_v33 }
 0x13a   :  { %v1154_v57 = vpop.f32.mrb[5].mxu1 }
 0x13b   :  { %v1155_v45 = vadd.f32 %v1154_v57, %v1153_v55  ;;  %v717_v58 = vadd.f32 %v1120_v56, %v647_v15 }
 0x13d   :  { %v787_v59 = vadd.f32 %v1155_v45, %v717_v58 }
 0x157   :  { %v1188_v60 = vpop.f32.mrb[6].mxu0 }
 0x158   :  { %v1189_v61 = vpop.f32.mrb[7].mxu0 }
 0x159   :  { %v1223_v62 = vpop.f32.mrb[6].mxu1  ;;  %v1190_v63 = vadd.f32 %v1189_v61, %v1188_v60 }
 0x15a   :  { %v1224_v0 = vpop.f32.mrb[7].mxu1 }
 0x15b   :  { %v1225_v1 = vadd.f32 %v1224_v0, %v1223_v62  ;;  %v857_v2 = vadd.f32 %v1190_v63, %v787_v59 }
 0x15d   :  { %v927_v3 = vadd.f32 %v1225_v1, %v857_v2 }
 0x15f   :  { %930 = vst [vmem:[#allocation2] sm:$0x3] %v927_v3 }
 0x160   :  { %1499 = shalt.err (!%p1496_p4)
}
 0x161   :  { %s1500_s19 = scalar_lea.hbm %s2372_s3, 32 }
 0x162   :  { %p1501_p5 = scmp.ne.s32.totalorder %s2372_s3, %s1500_s19  ;;  %p1504_p6 = scmp.lt.u32.totalorder %s1500_s19, %s2372_s3 }
 0x164   :  { %p1506_p7 = pnand %p1504_p6, %p1501_p5 }
 0x166   :  { %1509 = shalt.err (!%p1506_p7)
}
 0x167   :  { %940 = dma.vmem_to_hbm [thread:$0]  %s938_s2, 32, %s2372_s3, [#allocation3]  }
 0x168   :  { %1510 = dma.done.wait [#allocation3], 32  }
 0x169   :  { %1511 = vsyncadd [#allocation3], 4294967264 }
 0x16a   :  { %944 = vsyncpa [#allocation3], 1 }

</bundles_post_ra>
